<compile_context>
chip_gen: v7x
topology: tpu7x:2x2x1
jax: 0.10.0
libtpu: 0.0.40
codegen_flags: <defaults>
</compile_context>

<pallas_src>
import functools
import math

import jax
import jax.numpy as jnp
from jax.experimental import pallas as pl
from jax.experimental.pallas import tpu as pltpu


_HI = jax.lax.Precision.HIGHEST


def _softplus(v):
    # numerically stable log(1 + exp(v))
    return jnp.maximum(v, 0.0) + jnp.log(1.0 + jnp.exp(-jnp.abs(v)))


def _sign(v):
    # explicit compare/select sign (guaranteed Mosaic lowering)
    one = jnp.ones_like(v)
    return jnp.where(v > 0.0, one, jnp.where(v < 0.0, -one, jnp.zeros_like(v)))


def ssm_kernel(x_ref, tri_ref, W_ref, bias_ref, Prep_ref, Aflat_ref, invA_ref,
               Et_ref, o_ref, carryA_ref, carryT_ref):
    """One (batch, L-chunk) grid step; all big tensors are (Lc, D*N) lane-dense."""
    DN = Prep_ref.shape[1]

    # Reset the running prefix-sum carries at the start of every sequence.
    @pl.when(pl.program_id(1) == 0)
    def _():
        carryA_ref[...] = jnp.zeros_like(carryA_ref)
        carryT_ref[...] = jnp.zeros_like(carryT_ref)

    x = x_ref[0]                                             # (Lc, D)

    # Fused projection: [B_rep | C_rep | x_rep | Dcol] = x @ W_all + bias
    proj = jnp.dot(x, W_ref[...], preferred_element_type=jnp.float32,
                   precision=_HI) + bias_ref[...]            # (Lc, 3*DN + 1)
    B_rep = proj[:, 0:DN]                                    # s_B(x)[l,n] tiled over d
    C_rep = proj[:, DN:2 * DN]                               # s_C(x)[l,n] tiled over d
    x_rep = proj[:, 2 * DN:3 * DN]                           # x[l,d] repeated over n
    Dcol = proj[:, 3 * DN:3 * DN + 1]                        # s_D(x), (Lc, 1)

    disc = _softplus(Prep_ref[...] + Dcol)                   # (Lc, DN)
    abp = disc * Aflat_ref[...]                              # A_bar_pre
    em1 = jnp.exp(abp) - 1.0                                 # A_bar - 1 (matches reference)
    Bx = B_rep * invA_ref[...] * em1 * x_rep                 # B_bar * x

    tri = tri_ref[...]                                       # lower-triangular ones (Lc, Lc)

    # inclusive prefix sum of A_bar_pre over positions (MXU matmul) + chunk carry
    cumA = carryA_ref[...] + jnp.dot(
        tri, abp, preferred_element_type=jnp.float32, precision=_HI)

    bxlog = jnp.log(jnp.abs(Bx))
    clamp = jnp.maximum(cumA, bxlog - 70.0)
    term = _sign(Bx) * jnp.exp(bxlog - clamp)

    # inclusive prefix sum of the signed terms (second MXU matmul) + chunk carry
    cumT = carryT_ref[...] + jnp.dot(
        tri, term, preferred_element_type=jnp.float32, precision=_HI)

    h = cumT * jnp.exp(clamp)                                # hidden state, (Lc, DN)

    # y[l, d] = sum_n h[l, d, n] * C[l, n]  (selection matmul keeps it lane-dense)
    y = jnp.dot(h * C_rep, Et_ref[...], preferred_element_type=jnp.float32,
                precision=_HI)                               # (Lc, D)
    o_ref[0] = y.astype(o_ref.dtype)

    # Carry the running sums into the next chunk of this sequence.
    carryA_ref[...] = cumA[-1:, :]
    carryT_ref[...] = cumT[-1:, :]


@functools.partial(jax.jit, static_argnames=("chunk",))
def ssm_forward(x, wB_t, bB, wC_t, bC, wD_row, bD, P, Araw, *, chunk=None):
    B, L, D = x.shape
    N = Araw.shape[1]
    DN = D * N
    F = 3 * DN + 1
    f32 = jnp.float32

    # ---- sequence chunking (bounds VMEM; "arbitrary" grid axis carries state)
    if chunk is None:
        budget = 24 * 1024 * 1024                 # ~12 live (Lc, DN) f32 temporaries
        chunk = max(8, min(512, (budget // (12 * DN * 4)) // 8 * 8))
    Lc = max(8, (min(chunk, ((L + 7) // 8) * 8) // 8) * 8)
    n_chunks = -(-L // Lc)
    Lpad = n_chunks * Lc
    x_pad = jnp.pad(x.astype(f32), ((0, 0), (0, Lpad - L), (0, 0)))

    # ---- one-time parameter preprocessing (plain XLA, tiny tensors) ----------
    A = -jax.nn.softplus(Araw.astype(f32))                       # (D, N)
    A_flat = A.reshape(1, DN)
    invA_flat = (1.0 / A).reshape(1, DN)
    P_rep = jnp.repeat(P.astype(f32), N).reshape(1, DN)

    wB_rep = jnp.tile(wB_t.astype(f32), (1, D))                  # (D, DN)
    wC_rep = jnp.tile(wC_t.astype(f32), (1, D))                  # (D, DN)
    E = jnp.repeat(jnp.eye(D, dtype=f32), N, axis=1)             # (D, DN): x @ E == repeat(x, N)
    W_all = jnp.concatenate(
        [wB_rep, wC_rep, E, wD_row.astype(f32).reshape(D, 1)], axis=1)   # (D, F)
    bias_all = jnp.concatenate(
        [jnp.tile(bB.astype(f32), D), jnp.tile(bC.astype(f32), D),
         jnp.zeros((DN,), f32), bD.astype(f32).reshape(1)]).reshape(1, F)
    E_t = E.T                                                    # (DN, D)

    idx = jnp.arange(Lc)
    tri = (idx[:, None] >= idx[None, :]).astype(f32)             # inclusive prefix-sum matrix

    grid_spec = pltpu.PrefetchScalarGridSpec(
        num_scalar_prefetch=0,
        grid=(B, n_chunks),
        in_specs=[
            pl.BlockSpec((1, Lc, D), lambda b, l: (b, l, 0)),    # x
            pl.BlockSpec((Lc, Lc), lambda b, l: (0, 0)),         # tri
            pl.BlockSpec((D, F), lambda b, l: (0, 0)),           # W_all
            pl.BlockSpec((1, F), lambda b, l: (0, 0)),           # bias_all
            pl.BlockSpec((1, DN), lambda b, l: (0, 0)),          # P (repeated over n)
            pl.BlockSpec((1, DN), lambda b, l: (0, 0)),          # A (flattened)
            pl.BlockSpec((1, DN), lambda b, l: (0, 0)),          # 1/A (flattened)
            pl.BlockSpec((DN, D), lambda b, l: (0, 0)),          # E^T (n-reduction matrix)
        ],
        out_specs=pl.BlockSpec((1, Lc, D), lambda b, l: (b, l, 0)),
        scratch_shapes=[
            pltpu.VMEM((1, DN), f32),    # running prefix sum of A_bar_pre
            pltpu.VMEM((1, DN), f32),    # running prefix sum of the signed terms
        ],
    )

    y_pad = pl.pallas_call(
        ssm_kernel,
        out_shape=jax.ShapeDtypeStruct((B, Lpad, D), f32),
        grid_spec=grid_spec,
        compiler_params=pltpu.CompilerParams(
            dimension_semantics=("parallel", "arbitrary"),
            vmem_limit_bytes=64 * 1024 * 1024),
    )(x_pad, tri, W_all, bias_all, P_rep, A_flat, invA_flat, E_t)

    return y_pad[:, :L, :]


def ssm_reference(x, wB_t, bB, wC_t, bC, wD_row, bD, P, Araw):
    """Pure-JAX reference of the same forward (for correctness check)."""
    sp = jax.nn.softplus
    Dv = jnp.sum(x * wD_row[None, None, :], axis=-1, keepdims=True) + bD   # (B,L,1)
    disc = sp(P[None, None, :] + Dv)                                       # (B,L,D)
    A = -sp(Araw)                                                          # (D,N)
    abp = disc[..., None] * A
    A_bar = jnp.exp(abp)
    Bm = x @ wB_t + bB                                                     # (B,L,N)
    B_bar = Bm[:, :, None] / A * (A_bar - 1.0)
    Cm = x @ wC_t + bC
    Bx = B_bar * x[..., None]
    Bx_log = jnp.log(jnp.abs(Bx))
    cumA = jnp.cumsum(abp, axis=1)
    clamped = jnp.maximum(cumA, Bx_log - 70.0)
    term = jnp.exp(Bx_log - clamped) * jnp.sign(Bx)
    cumT = jnp.cumsum(term, axis=1)
    h = cumT * jnp.exp(clamped)
    return jnp.einsum('bldn,bln->bld', h, Cm)


if __name__ == "__main__":
    batch, seq, d_model, d_state = 2, 20, 32, 16

    key = jax.random.PRNGKey(0)
    kx, kA, kwB, kbB, kwC, kbC, kwD, kbD, kP = jax.random.split(key, 9)

    # deterministic parameter init (mirrors the shapes in SSM.__init__)
    Araw = jax.random.normal(kA, (d_model, d_state), jnp.float32) * math.sqrt(2.0 / d_state)
    Araw = jnp.maximum(Araw, -4.0)                      # clamp(min=-4)

    bound = 1.0 / math.sqrt(d_model)
    wB = jax.random.uniform(kwB, (d_state, d_model), jnp.float32, -bound, bound)
    bB = jax.random.uniform(kbB, (d_state,), jnp.float32, -bound, bound)
    wC = jax.random.uniform(kwC, (d_state, d_model), jnp.float32, -bound, bound)
    bC = jax.random.uniform(kbC, (d_state,), jnp.float32, -bound, bound)
    wD = jax.random.uniform(kwD, (1, d_model), jnp.float32, -bound, bound)
    bD = jax.random.uniform(kbD, (1,), jnp.float32, -bound, bound)
    P = jax.random.normal(kP, (d_model,), jnp.float32)

    x = jax.random.normal(kx, (batch, seq, d_model), jnp.float32)

    # chunk=8 exercises the multi-chunk carry path and the tail padding
    # (seq=20 -> 3 chunks of 8 with 4 padded positions).
    y = ssm_forward(x, wB.T, bB, wC.T, bC, wD[0], bD, P, Araw, chunk=8)
    y = jax.block_until_ready(y)

    y_ref = ssm_reference(x, wB.T, bB, wC.T, bC, wD[0], bD, P, Araw)

    assert y.shape == (batch, seq, d_model)
    assert bool(jnp.all(jnp.isfinite(y))), "NaN or Inf values detected in SSM output"
    assert bool(jnp.allclose(y, y_ref, rtol=1e-2, atol=1e-2)), (
        "kernel output mismatch vs reference")

    print("KERNEL_OK")
</pallas_src>

<mosaic_0001>
module attributes {stable_mosaic.version = 11 : i64} {
  func.func @ssm_kernel(%arg0: i32, %arg1: i32, %arg2: memref<1x8x32xf32, #tpu.memory_space<vmem>>, %arg3: memref<8x8xf32, #tpu.memory_space<vmem>>, %arg4: memref<32x1537xf32, #tpu.memory_space<vmem>>, %arg5: memref<1x1537xf32, #tpu.memory_space<vmem>>, %arg6: memref<1x512xf32, #tpu.memory_space<vmem>>, %arg7: memref<1x512xf32, #tpu.memory_space<vmem>>, %arg8: memref<1x512xf32, #tpu.memory_space<vmem>>, %arg9: memref<512x32xf32, #tpu.memory_space<vmem>>, %arg10: memref<1x8x32xf32, #tpu.memory_space<vmem>>, %arg11: memref<1x512xf32, #tpu.memory_space<vmem>>, %arg12: memref<1x512xf32, #tpu.memory_space<vmem>>) attributes {dimension_semantics = [#tpu.dimension_semantics<parallel>, #tpu.dimension_semantics<arbitrary>], iteration_bounds = array<i64: 2, 3>, scalar_prefetch = 0 : i64, scratch_operands = 2 : i64, tpu.core_type = #tpu.core_type<tc>, window_params = [{transform_indices = @transform_0, window_bounds = array<i64: 1, 8, 32>}, {pipeline_mode = #tpu.pipeline_mode<synchronous>, transform_indices = @transform_1, window_bounds = array<i64: 8, 8>}, {pipeline_mode = #tpu.pipeline_mode<synchronous>, transform_indices = @transform_2, window_bounds = array<i64: 32, 1537>}, {pipeline_mode = #tpu.pipeline_mode<synchronous>, transform_indices = @transform_3, window_bounds = array<i64: 1, 1537>}, {pipeline_mode = #tpu.pipeline_mode<synchronous>, transform_indices = @transform_4, window_bounds = array<i64: 1, 512>}, {pipeline_mode = #tpu.pipeline_mode<synchronous>, transform_indices = @transform_5, window_bounds = array<i64: 1, 512>}, {pipeline_mode = #tpu.pipeline_mode<synchronous>, transform_indices = @transform_6, window_bounds = array<i64: 1, 512>}, {pipeline_mode = #tpu.pipeline_mode<synchronous>, transform_indices = @transform_7, window_bounds = array<i64: 512, 32>}, {transform_indices = @transform_8, window_bounds = array<i64: 1, 8, 32>}]} {
    %c0_i32 = arith.constant 0 : i32
    %0 = arith.cmpi eq, %arg1, %c0_i32 : i32
    %1 = arith.extui %0 : i1 to i32
    %c0_i32_0 = arith.constant 0 : i32
    %2 = arith.cmpi ne, %1, %c0_i32_0 : i32
    scf.if %2 {
      %cst_41 = arith.constant 0.000000e+00 : f32
      %78 = vector.broadcast %cst_41 : f32 to vector<1x512xf32>
      %c0_42 = arith.constant 0 : index
      %c0_43 = arith.constant 0 : index
      %79 = vector.load %arg11[%c0_42, %c0_43] : memref<1x512xf32, #tpu.memory_space<vmem>>, vector<1x512xf32>
      tpu.vector_store %arg11[%c0_42, %c0_43], %78 {strides = array<i32>} : memref<1x512xf32, #tpu.memory_space<vmem>>, vector<1x512xf32>,
      %cst_44 = arith.constant 0.000000e+00 : f32
      %80 = vector.broadcast %cst_44 : f32 to vector<1x512xf32>
      %c0_45 = arith.constant 0 : index
      %c0_46 = arith.constant 0 : index
      %81 = vector.load %arg12[%c0_45, %c0_46] : memref<1x512xf32, #tpu.memory_space<vmem>>, vector<1x512xf32>
      tpu.vector_store %arg12[%c0_45, %c0_46], %80 {strides = array<i32>} : memref<1x512xf32, #tpu.memory_space<vmem>>, vector<1x512xf32>,
    } else {
    }
    %c0 = arith.constant 0 : index
    %c0_1 = arith.constant 0 : index
    %c0_2 = arith.constant 0 : index
    %3 = vector.load %arg2[%c0, %c0_1, %c0_2] : memref<1x8x32xf32, #tpu.memory_space<vmem>>, vector<1x8x32xf32>
    %4 = vector.shape_cast %3 : vector<1x8x32xf32> to vector<8x32xf32>
    %c0_3 = arith.constant 0 : index
    %c0_4 = arith.constant 0 : index
    %5 = vector.load %arg4[%c0_3, %c0_4] : memref<32x1537xf32, #tpu.memory_space<vmem>>, vector<32x1537xf32>
    %cst = arith.constant dense<0.000000e+00> : vector<8x1537xf32>
    %6 = tpu.matmul %4, %5, %cst {dimension_numbers = #tpu.dot_dimension_numbers<[1], [0], [0], [1], [0, 0, 1, 1], [], []>, precision = #tpu.contract_precision<fp32>} : vector<8x32xf32>, vector<32x1537xf32>, vector<8x1537xf32> -> vector<8x1537xf32>
    %c0_5 = arith.constant 0 : index
    %c0_6 = arith.constant 0 : index
    %7 = vector.load %arg5[%c0_5, %c0_6] : memref<1x1537xf32, #tpu.memory_space<vmem>>, vector<1x1537xf32>
    %8 = vector.broadcast %7 : vector<1x1537xf32> to vector<8x1537xf32>
    %9 = arith.addf %6, %8 : vector<8x1537xf32>
    %10 = vector.extract_strided_slice %9 {offsets = [0, 0], sizes = [8, 512], strides = [1, 1]} : vector<8x1537xf32> to vector<8x512xf32>
    %11 = vector.extract_strided_slice %9 {offsets = [0, 512], sizes = [8, 512], strides = [1, 1]} : vector<8x1537xf32> to vector<8x512xf32>
    %12 = vector.extract_strided_slice %9 {offsets = [0, 1024], sizes = [8, 512], strides = [1, 1]} : vector<8x1537xf32> to vector<8x512xf32>
    %13 = vector.extract_strided_slice %9 {offsets = [0, 1536], sizes = [8, 1], strides = [1, 1]} : vector<8x1537xf32> to vector<8x1xf32>
    %c0_7 = arith.constant 0 : index
    %c0_8 = arith.constant 0 : index
    %14 = vector.load %arg6[%c0_7, %c0_8] : memref<1x512xf32, #tpu.memory_space<vmem>>, vector<1x512xf32>
    %15 = vector.broadcast %14 : vector<1x512xf32> to vector<8x512xf32>
    %16 = vector.broadcast %13 : vector<8x1xf32> to vector<8x512xf32>
    %17 = arith.addf %15, %16 : vector<8x512xf32>
    %cst_9 = arith.constant 0.000000e+00 : f32
    %18 = vector.broadcast %cst_9 : f32 to vector<8x512xf32>
    %19 = arith.maximumf %17, %18 : vector<8x512xf32>
    %20 = math.absf %17 : vector<8x512xf32>
    %cst_10 = arith.constant 0.000000e+00 : f32
    %21 = vector.broadcast %cst_10 : f32 to vector<8x512xf32>
    %22 = arith.subf %21, %20 : vector<8x512xf32>
    %23 = math.exp %22 : vector<8x512xf32>
    %cst_11 = arith.constant 1.000000e+00 : f32
    %24 = vector.broadcast %cst_11 : f32 to vector<8x512xf32>
    %25 = arith.addf %24, %23 : vector<8x512xf32>
    %26 = math.log %25 : vector<8x512xf32>
    %27 = arith.addf %19, %26 : vector<8x512xf32>
    %c0_12 = arith.constant 0 : index
    %c0_13 = arith.constant 0 : index
    %28 = vector.load %arg7[%c0_12, %c0_13] : memref<1x512xf32, #tpu.memory_space<vmem>>, vector<1x512xf32>
    %29 = vector.broadcast %28 : vector<1x512xf32> to vector<8x512xf32>
    %30 = arith.mulf %27, %29 : vector<8x512xf32>
    %31 = math.exp %30 : vector<8x512xf32>
    %cst_14 = arith.constant 1.000000e+00 : f32
    %32 = vector.broadcast %cst_14 : f32 to vector<8x512xf32>
    %33 = arith.subf %31, %32 : vector<8x512xf32>
    %c0_15 = arith.constant 0 : index
    %c0_16 = arith.constant 0 : index
    %34 = vector.load %arg8[%c0_15, %c0_16] : memref<1x512xf32, #tpu.memory_space<vmem>>, vector<1x512xf32>
    %35 = vector.broadcast %34 : vector<1x512xf32> to vector<8x512xf32>
    %36 = arith.mulf %10, %35 : vector<8x512xf32>
    %37 = arith.mulf %36, %33 : vector<8x512xf32>
    %38 = arith.mulf %37, %12 : vector<8x512xf32>
    %c0_17 = arith.constant 0 : index
    %c0_18 = arith.constant 0 : index
    %39 = vector.load %arg3[%c0_17, %c0_18] : memref<8x8xf32, #tpu.memory_space<vmem>>, vector<8x8xf32>
    %c0_19 = arith.constant 0 : index
    %c0_20 = arith.constant 0 : index
    %40 = vector.load %arg11[%c0_19, %c0_20] : memref<1x512xf32, #tpu.memory_space<vmem>>, vector<1x512xf32>
    %cst_21 = arith.constant dense<0.000000e+00> : vector<8x512xf32>
    %41 = tpu.matmul %39, %30, %cst_21 {dimension_numbers = #tpu.dot_dimension_numbers<[1], [0], [0], [1], [0, 0, 1, 1], [], []>, precision = #tpu.contract_precision<fp32>} : vector<8x8xf32>, vector<8x512xf32>, vector<8x512xf32> -> vector<8x512xf32>
    %42 = vector.broadcast %40 : vector<1x512xf32> to vector<8x512xf32>
    %43 = arith.addf %42, %41 : vector<8x512xf32>
    %44 = math.absf %38 : vector<8x512xf32>
    %45 = math.log %44 : vector<8x512xf32>
    %cst_22 = arith.constant 7.000000e+01 : f32
    %46 = vector.broadcast %cst_22 : f32 to vector<8x512xf32>
    %47 = arith.subf %45, %46 : vector<8x512xf32>
    %48 = arith.maximumf %43, %47 : vector<8x512xf32>
    %cst_23 = arith.constant 1.000000e+00 : f32
    %49 = vector.broadcast %cst_23 : f32 to vector<8x512xf32>
    %cst_24 = arith.constant 0.000000e+00 : f32
    %50 = vector.broadcast %cst_24 : f32 to vector<8x512xf32>
    %51 = arith.cmpf ogt, %38, %50 : vector<8x512xf32>
    %cst_25 = arith.constant 0.000000e+00 : f32
    %52 = vector.broadcast %cst_25 : f32 to vector<8x512xf32>
    %53 = arith.cmpf olt, %38, %52 : vector<8x512xf32>
    %cst_26 = arith.constant 0.000000e+00 : f32
    %54 = vector.broadcast %cst_26 : f32 to vector<8x512xf32>
    %55 = arith.subf %54, %49 : vector<8x512xf32>
    %cst_27 = arith.constant 0.000000e+00 : f32
    %56 = vector.broadcast %cst_27 : f32 to vector<8x512xf32>
    %57 = arith.select %53, %55, %56 : vector<8x512xi1>, vector<8x512xf32>
    %58 = arith.select %51, %49, %57 : vector<8x512xi1>, vector<8x512xf32>
    %59 = arith.subf %45, %48 : vector<8x512xf32>
    %60 = math.exp %59 : vector<8x512xf32>
    %61 = arith.mulf %58, %60 : vector<8x512xf32>
    %c0_28 = arith.constant 0 : index
    %c0_29 = arith.constant 0 : index
    %62 = vector.load %arg12[%c0_28, %c0_29] : memref<1x512xf32, #tpu.memory_space<vmem>>, vector<1x512xf32>
    %cst_30 = arith.constant dense<0.000000e+00> : vector<8x512xf32>
    %63 = tpu.matmul %39, %61, %cst_30 {dimension_numbers = #tpu.dot_dimension_numbers<[1], [0], [0], [1], [0, 0, 1, 1], [], []>, precision = #tpu.contract_precision<fp32>} : vector<8x8xf32>, vector<8x512xf32>, vector<8x512xf32> -> vector<8x512xf32>
    %64 = vector.broadcast %62 : vector<1x512xf32> to vector<8x512xf32>
    %65 = arith.addf %64, %63 : vector<8x512xf32>
    %66 = math.exp %48 : vector<8x512xf32>
    %67 = arith.mulf %65, %66 : vector<8x512xf32>
    %68 = arith.mulf %67, %11 : vector<8x512xf32>
    %c0_31 = arith.constant 0 : index
    %c0_32 = arith.constant 0 : index
    %69 = vector.load %arg9[%c0_31, %c0_32] : memref<512x32xf32, #tpu.memory_space<vmem>>, vector<512x32xf32>
    %cst_33 = arith.constant dense<0.000000e+00> : vector<8x32xf32>
    %70 = tpu.matmul %68, %69, %cst_33 {dimension_numbers = #tpu.dot_dimension_numbers<[1], [0], [0], [1], [0, 0, 1, 1], [], []>, precision = #tpu.contract_precision<fp32>} : vector<8x512xf32>, vector<512x32xf32>, vector<8x32xf32> -> vector<8x32xf32>
    %c0_34 = arith.constant 0 : index
    %c0_35 = arith.constant 0 : index
    %c0_36 = arith.constant 0 : index
    %71 = vector.load %arg10[%c0_34, %c0_35, %c0_36] : memref<1x8x32xf32, #tpu.memory_space<vmem>>, vector<1x8x32xf32>
    %72 = vector.shape_cast %71 : vector<1x8x32xf32> to vector<8x32xf32>
    %73 = vector.shape_cast %70 : vector<8x32xf32> to vector<1x8x32xf32>
    tpu.vector_store %arg10[%c0_34, %c0_35, %c0_36], %73 {strides = array<i32>} : memref<1x8x32xf32, #tpu.memory_space<vmem>>, vector<1x8x32xf32>,
    %74 = vector.extract_strided_slice %43 {offsets = [7, 0], sizes = [1, 512], strides = [1, 1]} : vector<8x512xf32> to vector<1x512xf32>
    %c0_37 = arith.constant 0 : index
    %c0_38 = arith.constant 0 : index
    %75 = vector.load %arg11[%c0_37, %c0_38] : memref<1x512xf32, #tpu.memory_space<vmem>>, vector<1x512xf32>
    tpu.vector_store %arg11[%c0_37, %c0_38], %74 {strides = array<i32>} : memref<1x512xf32, #tpu.memory_space<vmem>>, vector<1x512xf32>,
    %76 = vector.extract_strided_slice %65 {offsets = [7, 0], sizes = [1, 512], strides = [1, 1]} : vector<8x512xf32> to vector<1x512xf32>
    %c0_39 = arith.constant 0 : index
    %c0_40 = arith.constant 0 : index
    %77 = vector.load %arg12[%c0_39, %c0_40] : memref<1x512xf32, #tpu.memory_space<vmem>>, vector<1x512xf32>
    tpu.vector_store %arg12[%c0_39, %c0_40], %76 {strides = array<i32>} : memref<1x512xf32, #tpu.memory_space<vmem>>, vector<1x512xf32>,
    return
  }
  func.func @transform_0(%arg0: i32, %arg1: i32) -> (i32, i32, i32) {
    %c0_i32 = arith.constant 0 : i32
    %c0_i32_0 = arith.constant 0 : i32
    return %arg0, %arg1, %c0_i32 : i32, i32, i32
  }
  func.func @transform_1(%arg0: i32, %arg1: i32) -> (i32, i32) {
    %c0_i32 = arith.constant 0 : i32
    %c0_i32_0 = arith.constant 0 : i32
    %c0_i32_1 = arith.constant 0 : i32
    return %c0_i32, %c0_i32_0 : i32, i32
  }
  func.func @transform_2(%arg0: i32, %arg1: i32) -> (i32, i32) {
    %c0_i32 = arith.constant 0 : i32
    %c0_i32_0 = arith.constant 0 : i32
    %c0_i32_1 = arith.constant 0 : i32
    return %c0_i32, %c0_i32_0 : i32, i32
  }
  func.func @transform_3(%arg0: i32, %arg1: i32) -> (i32, i32) {
    %c0_i32 = arith.constant 0 : i32
    %c0_i32_0 = arith.constant 0 : i32
    %c0_i32_1 = arith.constant 0 : i32
    return %c0_i32, %c0_i32_0 : i32, i32
  }
  func.func @transform_4(%arg0: i32, %arg1: i32) -> (i32, i32) {
    %c0_i32 = arith.constant 0 : i32
    %c0_i32_0 = arith.constant 0 : i32
    %c0_i32_1 = arith.constant 0 : i32
    return %c0_i32, %c0_i32_0 : i32, i32
  }
  func.func @transform_5(%arg0: i32, %arg1: i32) -> (i32, i32) {
    %c0_i32 = arith.constant 0 : i32
    %c0_i32_0 = arith.constant 0 : i32
    %c0_i32_1 = arith.constant 0 : i32
    return %c0_i32, %c0_i32_0 : i32, i32
  }
  func.func @transform_6(%arg0: i32, %arg1: i32) -> (i32, i32) {
    %c0_i32 = arith.constant 0 : i32
    %c0_i32_0 = arith.constant 0 : i32
    %c0_i32_1 = arith.constant 0 : i32
    return %c0_i32, %c0_i32_0 : i32, i32
  }
  func.func @transform_7(%arg0: i32, %arg1: i32) -> (i32, i32) {
    %c0_i32 = arith.constant 0 : i32
    %c0_i32_0 = arith.constant 0 : i32
    %c0_i32_1 = arith.constant 0 : i32
    return %c0_i32, %c0_i32_0 : i32, i32
  }
  func.func @transform_8(%arg0: i32, %arg1: i32) -> (i32, i32, i32) {
    %c0_i32 = arith.constant 0 : i32
    %c0_i32_0 = arith.constant 0 : i32
    return %arg0, %arg1, %c0_i32 : i32, i32, i32
  }
}

</mosaic_0001>

<bundles_post_ra>
// kernel: tile.33
= control target key start
LH: loop header
LB: loop body
LE: loop exit
PB: predicated region body
PF: predicated region fallthrough
CT: control target
= control target key end

     0   :  { %s40_s0 = inlined_call_operand.vmem [shape: f32[16], index: 0, kind: input, shape index: {}]   ;;  %s41_s1 = inlined_call_operand.vmem [shape: f32[32,16], index: 1, kind: output, shape index: {}]  }
   0x1   :  { %v4_v0 = vld [vmem:[%s40_s0] ss:$0 sm:$0xff] }
   0x2   :  { %5 = vst [vmem:[%s41_s1] sm:$0xff] %v4_v0  ;;  %12 = vst [vmem:[%s41_s1 + $0x8] sm:$0xff] %v4_v0 }
   0x3   :  { %13 = vst [vmem:[%s41_s1 + $0x10] sm:$0xff] %v4_v0  ;;  %14 = vst [vmem:[%s41_s1 + $0x18] sm:$0xff] %v4_v0 }

// kernel: tile.34
= control target key start
LH: loop header
LB: loop body
LE: loop exit
PB: predicated region body
PF: predicated region fallthrough
CT: control target
= control target key end

     0   :  { %s67_s8 = smov 112   ;;  %s68_s11 = smov 80   ;;  %vm3_vm0 = vcmask 130048   ;;  %vm9_vm1 = vcmask 1048448   ;;  %vm15_vm2 = vcmask 917248   ;;  %vm21_vm3 = vcmask 786048   ;;  %s111_s0 = inlined_call_operand.vmem [shape: f32[32,16], index: 0, kind: input, shape index: {}]   ;;  %s112_s1 = inlined_call_operand.vmem [shape: f32[512], index: 1, kind: output, shape index: {}]  }
   0x1   :  { %v53_v0 = vld [vmem:[%s111_s0 + $0x7] ss:$8 sm:$0xf]   ;;  %v55_v1 = vld [vmem:[%s111_s0 + $0x5] ss:$8 sm:$0xf]  }
   0x2   :  { %7 = vrot.lane.b32.xlu0 %v53_v0, %s67_s8  ;;  %19 = vrot.lane.b32.xlu1 %v55_v1, %s68_s11  ;;  %v54_v2 = vld [vmem:[%s111_s0 + $0x6] ss:$8 sm:$0xf]   ;;  %v56_v3 = vld [vmem:[%s111_s0 + $0x4] ss:$8 sm:$0xf]  }
   0x3   :  { %s69_s16 = smov 96   ;;  %v2_v4 = vld [vmem:[%s111_s0] ss:$8 sm:$0xf]   ;;  %s70_s19 = smov 64   ;;  %vm27_vm4 = vcmask 654848  }
   0x4   :  { %v57_v5 = vld [vmem:[%s111_s0 + $0x3] ss:$8 sm:$0xf]   ;;  %4 = vst.msk [vmem:[#allocation0] sm:$0xf] %vm3_vm0, %v2_v4   ;;  %s71_s24 = smov 48  }
   0x5   :  { %v58_v6 = vld [vmem:[%s111_s0 + $0x2] ss:$8 sm:$0xf]   ;;  %s72_s25 = smov 32   ;;  %vm33_vm5 = vcmask 523648   ;;  %vm39_vm6 = vcmask 392448  }
   0x6   :  { %13 = vrot.lane.b32.xlu0 %v54_v2, %s69_s16  ;;  %25 = vrot.lane.b32.xlu1 %v56_v3, %s70_s19  ;;  %v59_v7 = vld [vmem:[%s111_s0 + $0x1] ss:$8 sm:$0xf]   ;;  %s73_s0 = smov 16   ;;  %vm45_vm7 = vcmask 261248  }
   0xa   :  { %31 = vrot.lane.b32.xlu0 %v57_v5, %s71_s24  ;;  %37 = vrot.lane.b32.xlu1 %v58_v6, %s72_s25 }
   0xe   :  { %43 = vrot.lane.b32.xlu0 %v59_v7, %s73_s0 }
  0x74   :  { %v8_v8 = vpop.permute.xlu0 %7   ;;  %v20_v9 = vpop.permute.xlu1 %19  }
  0x75   :  { %10 = vst.msk [vmem:[#allocation0] sm:$0xf] %vm9_vm1, %v8_v8  }
  0x78   :  { %v14_v10 = vpop.permute.xlu0 %13   ;;  %v26_v11 = vpop.permute.xlu1 %25  }
  0x79   :  { %16 = vst.msk [vmem:[#allocation0] sm:$0xf] %vm15_vm2, %v14_v10  }
  0x7a   :  { %22 = vst.msk [vmem:[#allocation0] sm:$0xf] %vm21_vm3, %v20_v9  }
  0x7b   :  { %28 = vst.msk [vmem:[#allocation0] sm:$0xf] %vm27_vm4, %v26_v11  }
  0x7c   :  { %v32_v12 = vpop.permute.xlu0 %31   ;;  %v38_v13 = vpop.permute.xlu1 %37  }
  0x7d   :  { %34 = vst.msk [vmem:[#allocation0] sm:$0xf] %vm33_vm5, %v32_v12  }
  0x7e   :  { %40 = vst.msk [vmem:[#allocation0] sm:$0xf] %vm39_vm6, %v38_v13  }
  0x80   :  { %v44_v14 = vpop.permute.xlu0 %43  }
  0x81   :  { %46 = vst.msk [vmem:[#allocation0] sm:$0xf] %vm45_vm7, %v44_v14  }
  0x88   :  { %v50_v15 = vld [vmem:[#allocation0] sm:$0xf] }
  0x89   :  { %52 = vst [vmem:[%s112_s1] sm:$0xf] %v50_v15 }

// kernel: ssm_forward.1
= control target key start
LH: loop header
LB: loop body
LE: loop exit
PB: predicated region body
PF: predicated region fallthrough
CT: control target
= control target key end

     0   :  { %s13129_s0 = inlined_call_operand.hbm [shape: f32[2,24,32], index: 0, kind: input, shape index: {}]   ;;  %s13130_s1 = inlined_call_operand.hbm [shape: f32[8,8], index: 1, kind: input, shape index: {}]   ;;  %s13131_s2 = inlined_call_operand.hbm [shape: f32[32,1537], index: 2, kind: input, shape index: {}]   ;;  %s13132_s3 = inlined_call_operand.hbm [shape: f32[1,1537], index: 3, kind: input, shape index: {}]   ;;  %s13133_s4 = inlined_call_operand.hbm [shape: f32[1,512], index: 4, kind: input, shape index: {}]   ;;  %s13134_s5 = inlined_call_operand.hbm [shape: f32[1,512], index: 5, kind: input, shape index: {}]   ;;  %s13135_s6 = inlined_call_operand.hbm [shape: f32[1,512], index: 6, kind: input, shape index: {}]   ;;  %s13136_s7 = inlined_call_operand.hbm [shape: f32[512,32], index: 7, kind: input, shape index: {}]   ;;  %s13137_s8 = inlined_call_operand.hbm [shape: f32[2,24,32], index: 8, kind: output, shape index: {}]  }
   0x1   :  { %13281 = sst [smem:[#allocation72_spill]] %s13130_s1 }
   0x2   :  { %13282 = sst [smem:[#allocation73_spill]] %s13131_s2 }
   0x3   :  { %13283 = sst [smem:[#allocation74_spill]] %s13132_s3 }
   0x4   :  { %13284 = sst [smem:[#allocation75_spill]] %s13133_s4 }
   0x5   :  { %13285 = sst [smem:[#allocation76_spill]] %s13134_s5 }
   0x6   :  { %13286 = sst [smem:[#allocation77_spill]] %s13137_s8 }
   0x7   :  { %13 = vsyncpa [#allocation5], 0 }
   0x8   :  { %15 = vsyncpa [#allocation5 + $0x1], 0 }
   0x9   :  { %16 = vsyncpa [#allocation8], 0 }
   0xa   :  { %17 = vsyncpa [#allocation11], 0 }
   0xb   :  { %18 = vsyncpa [#allocation14], 0 }
   0xc   :  { %19 = vsyncpa [#allocation17], 0 }
   0xd   :  { %20 = vsyncpa [#allocation6], 0 }
   0xe   :  { %22 = vsyncpa [#allocation6 + $0x1], 0  ;;  %s10457_s27 = smov 0   ;;  %s10459_s28 = smov 0  }
   0xf   :  { %s10461_s29 = smov 0   ;;  %s10463_s30 = smov 0  }
  0x10   :  { %s10465_s9 = smov 0   ;;  %s10467_s10 = smov 0  }
  0x11   :  { %s10469_s11 = smov 0   ;;  %s10471_s12 = smov 0  }
  0x12 LB: > { %13287 = sst [smem:[#allocation25_spill]] %s10379_s9  ;;  %s13138_s13 = sadd.s32 4294967295, %s10391_s12   ;;  %s10391_s12 = sphi %s10471_s12, %s28_s12   ;;  %s10387_s11 = sphi %s10469_s11, %s13640_s11   ;;  %s10383_s10 = sphi %s10467_s10, %s13639_s10   ;;  %s10379_s9 = sphi %s10465_s9, %s13638_s9   ;;  %s10375_s30 = sphi %s10463_s30, %s13637_s30   ;;  %s10371_s29 = sphi %s10461_s29, %s13636_s29   ;;  %s10367_s28 = sphi %s10459_s28, %s13635_s28   ;;  %s10363_s27 = sphi %s10457_s27, %s13634_s27  }
  0x13   : > { %p8459_p0 = scmp.ge.s32.totalorder %s10391_s12, 1  ;;  %p10501_p1 = scmp.eq.s32.totalorder %s13138_s13, 0 }
  0x14   : > { %p248_p2 = scmp.lt.s32.totalorder %s10391_s12, 7  ;;  %s10393_s16 = smov [#allocation7]  }
  0x15   : > { %s13288_s14 = scalar_select %p10501_p1, 1, 0 }
  0x16   : > { %p10506_p3 = pnand %p8459_p0, %p248_p2  ;;  %s261_s17 = sshll.u32 %s10393_s16, 4  ;;  %s262_s17 = int_to_ptr.vmem [resolvable:$true] %s261_s17 }
  0x17   : > { %s10394_s18 = smov [#allocation10]   ;;  %s10395_s21 = smov [#allocation13]  }
  0x18   : > { %s13289_s15 = scalar_select %p10506_p3, 1, 0 }
  0x19   : > { %p9874_p4 = pneg %p10506_p3  ;;  %s285_s19 = sshll.u32 %s10394_s18, 4  ;;  %s10518_s19 = int_to_ptr.vmem [resolvable:$true] %s285_s19 }
  0x1a   : > { %s307_s22 = sshll.u32 %s10395_s21, 4  ;;  %s13291_s1 = sld [smem:[#allocation72_spill]]  ;;  %s10520_s22 = int_to_ptr.vmem [resolvable:$true] %s307_s22 }
  0x1b   : > { %p10514_p5 = pnand %p9874_p4, %p10501_p1 }
  0x1d   : > { %p10530_p7 = pneg %p10514_p5 }
  0x20   : > { %s10051_s25 = scalar_lea.hbm %s13291_s1, 128 }
  0x21   : > { %p10052_p6 = scmp.ne.s32.totalorder %s13291_s1, %s10051_s25  ;;  %p10058_p10 = scmp.lt.u32.totalorder %s10051_s25, %s13291_s1 }
  0x23   : > { %p10054_p8 = pnand %p10530_p7, %p10052_p6 }
  0x25   : > { %p10055_p9 = pneg %p10054_p8 }
  0x27   : > { %p10060_p11 = pnand %p10058_p10, %p10055_p9 }
  0x29   : > { %10063 = shalt.err (!%p10060_p11)
}
  0x2a   : > { %s10064_s23 = scalar_lea.vmem %s262_s17, 128  ;;  %p10072_p2 = scmp.lt.s32.totalorder %s262_s17, %s262_s17 }
  0x2b   : > { %p10065_p12 = scmp.ne.s32.totalorder %s262_s17, %s10064_s23  ;;  %p10073_p4 = scmp.lt.s32.totalorder %s10064_s23, %s10064_s23 }
  0x2d   : > { %p10067_p13 = pnand %p10065_p12, %p10530_p7  ;;  %p10074_p3 = por %p10073_p4, %p10072_p2 }
  0x2f   : > { %p10068_p0 = pneg %p10067_p13 }
  0x31   : > { %p10075_p1 = pnand %p10074_p3, %p10068_p0 }
  0x33   : > { %10078 = shalt.err (!%p10075_p1)
}
  0x34   : > { %9877 = dma.hbm_to_vmem [thread:$0]  (!%p10514_p5), %s13291_s1, 128, %s262_s17, [#allocation8]  }
  0x35   : > { %s13293_s3 = sld [smem:[#allocation74_spill]] }
  0x3b   : > { %s10079_s16 = scalar_lea.hbm %s13293_s3, 208 }
  0x3c   : > { %p10080_p6 = scmp.ne.s32.totalorder %s13293_s3, %s10079_s16  ;;  %p10086_p1 = scmp.lt.u32.totalorder %s10079_s16, %s13293_s3 }
  0x3e   : > { %p10082_p8 = pnand %p10080_p6, %p10530_p7 }
  0x40   : > { %p10083_p9 = pneg %p10082_p8 }
  0x42   : > { %p10088_p3 = pnand %p10086_p1, %p10083_p9 }
  0x44   : > { %10091 = shalt.err (!%p10088_p3)
}
  0x45   : > { %s10092_s17 = scalar_lea.vmem %s10518_s19, 208  ;;  %s10099_s8 = scalar_lea.vmem %s10518_s19, 224 }
  0x46   : > { %p10093_p10 = scmp.ne.s32.totalorder %s10518_s19, %s10092_s17  ;;  %p10100_p13 = scmp.lt.s32.totalorder %s10518_s19, %s10518_s19 }
  0x47   : > { %p10101_p0 = scmp.lt.s32.totalorder %s10099_s8, %s10092_s17 }
  0x48   : > { %p10095_p11 = pnand %p10093_p10, %p10530_p7 }
  0x49   : > { %p10102_p2 = por %p10101_p0, %p10100_p13 }
  0x4a   : > { %p10096_p12 = pneg %p10095_p11 }
  0x4c   : > { %p10103_p4 = pnand %p10102_p2, %p10096_p12 }
  0x4e   : > { %10106 = shalt.err (!%p10103_p4)
}
  0x4f   : > { %9883 = dma.hbm_to_vmem [thread:$0]  (!%p10514_p5), %s13293_s3, 208, %s10518_s19, [#allocation11]  }
  0x50   : > { %s13294_s5 = sld [smem:[#allocation76_spill]] }
  0x56   : > { %s10107_s25 = scalar_lea.hbm %s13294_s5, 64 }
  0x57   : > { %p10108_p6 = scmp.ne.s32.totalorder %s13294_s5, %s10107_s25  ;;  %p10114_p1 = scmp.lt.u32.totalorder %s10107_s25, %s13294_s5 }
  0x59   : > { %p10110_p8 = pnand %p10108_p6, %p10530_p7 }
  0x5b   : > { %p10111_p9 = pneg %p10110_p8 }
  0x5d   : > { %p10116_p3 = pnand %p10114_p1, %p10111_p9 }
  0x5f   : > { %10119 = shalt.err (!%p10116_p3)
}
  0x60   : > { %s10120_s19 = scalar_lea.vmem %s10520_s22, 64  ;;  %p10128_p13 = scmp.lt.s32.totalorder %s10520_s22, %s10520_s22 }
  0x61   : > { %p10121_p10 = scmp.ne.s32.totalorder %s10520_s22, %s10120_s19  ;;  %p10129_p0 = scmp.lt.s32.totalorder %s10120_s19, %s10120_s19 }
  0x63   : > { %p10123_p11 = pnand %p10121_p10, %p10530_p7  ;;  %p10130_p2 = por %p10129_p0, %p10128_p13 }
  0x65   : > { %p10124_p12 = pneg %p10123_p11 }
  0x67   : > { %p10131_p4 = pnand %p10130_p2, %p10124_p12 }
  0x69   : > { %10134 = shalt.err (!%p10131_p4)
}
  0x6a   : > { %9889 = dma.hbm_to_vmem [thread:$0]  (!%p10514_p5), %s13294_s5, 64, %s10520_s22, [#allocation14]  }
  0x6b   : > { %s10396_s24 = smov [#allocation9]   ;;  %s13295_s2 = sld [smem:[#allocation73_spill]] }
  0x6c   : > { %s271_s26 = sshll.u32 %s10396_s24, 4  ;;  %s272_s26 = int_to_ptr.vmem [resolvable:$true] %s271_s26 }
  0x71   : > { %s10135_s16 = scalar_lea.hbm %s13295_s2, 6656 }
  0x72   : > { %p10136_p6 = scmp.ne.s32.totalorder %s13295_s2, %s10135_s16  ;;  %p10142_p1 = scmp.lt.u32.totalorder %s10135_s16, %s13295_s2 }
  0x74   : > { %p10138_p8 = pnand %p10136_p6, %p10530_p7 }
  0x76   : > { %p10139_p9 = pneg %p10138_p8 }
  0x78   : > { %p10144_p3 = pnand %p10142_p1, %p10139_p9 }
  0x7a   : > { %10147 = shalt.err (!%p10144_p3)
}
  0x7b   : > { %s10148_s22 = scalar_lea.vmem %s272_s26, 6656  ;;  %p10156_p13 = scmp.lt.s32.totalorder %s272_s26, %s272_s26 }
  0x7c   : > { %p10149_p10 = scmp.ne.s32.totalorder %s272_s26, %s10148_s22  ;;  %p10157_p0 = scmp.lt.s32.totalorder %s10148_s22, %s10148_s22 }
  0x7e   : > { %p10151_p11 = pnand %p10149_p10, %p10530_p7  ;;  %p10158_p2 = por %p10157_p0, %p10156_p13 }
  0x80   : > { %p10152_p12 = pneg %p10151_p11 }
  0x82   : > { %p10159_p4 = pnand %p10158_p2, %p10152_p12 }
  0x84   : > { %10162 = shalt.err (!%p10159_p4)
}
  0x85   : > { %s10397_s8 = smov 1664   ;;  %s10398_s9 = smov 104  }
  0x86   : > { %9880 = dma.hbm_to_vmem [thread:$0]  (!%p10514_p5), %s13295_s2, 6656, %s272_s26, [#allocation8], %s10397_s8, %s10397_s8, %s10398_s9  }
  0x87   : > { %s10399_s25 = smov [#allocation12]   ;;  %s10400_s21 = smov [#allocation15]  }
  0x88   : > { %s296_s16 = sshll.u32 %s10399_s25, 4  ;;  %s318_s23 = sshll.u32 %s10400_s21, 4  ;;  %s297_s16 = int_to_ptr.vmem [resolvable:$true] %s296_s16  ;;  %s10611_s23 = int_to_ptr.vmem [resolvable:$true] %s318_s23 }
  0x89   : > { %s13296_s4 = sld [smem:[#allocation75_spill]] }
  0x8f   : > { %s10163_s22 = scalar_lea.hbm %s13296_s4, 64 }
  0x90   : > { %p10164_p6 = scmp.ne.s32.totalorder %s13296_s4, %s10163_s22  ;;  %p10170_p1 = scmp.lt.u32.totalorder %s10163_s22, %s13296_s4 }
  0x92   : > { %p10166_p8 = pnand %p10164_p6, %p10530_p7 }
  0x94   : > { %p10167_p9 = pneg %p10166_p8 }
  0x96   : > { %p10172_p3 = pnand %p10170_p1, %p10167_p9 }
  0x98   : > { %10175 = shalt.err (!%p10172_p3)
}
  0x99   : > { %s10176_s8 = scalar_lea.vmem %s297_s16, 64  ;;  %p10184_p13 = scmp.lt.s32.totalorder %s297_s16, %s297_s16 }
  0x9a   : > { %p10177_p10 = scmp.ne.s32.totalorder %s297_s16, %s10176_s8  ;;  %p10185_p0 = scmp.lt.s32.totalorder %s10176_s8, %s10176_s8 }
  0x9c   : > { %p10179_p11 = pnand %p10177_p10, %p10530_p7  ;;  %p10186_p2 = por %p10185_p0, %p10184_p13 }
  0x9e   : > { %p10180_p12 = pneg %p10179_p11 }
  0xa0   : > { %p10187_p4 = pnand %p10186_p2, %p10180_p12 }
  0xa2   : > { %10190 = shalt.err (!%p10187_p4)
}
  0xa3   : > { %9886 = dma.hbm_to_vmem [thread:$0]  (!%p10514_p5), %s13296_s4, 64, %s297_s16, [#allocation11]  }
  0xa4   : > { %s10191_s25 = scalar_lea.hbm %s13135_s6, 64 }
  0xa5   : > { %p10192_p6 = scmp.ne.s32.totalorder %s13135_s6, %s10191_s25  ;;  %p10198_p1 = scmp.lt.u32.totalorder %s10191_s25, %s13135_s6 }
  0xa7   : > { %p10194_p8 = pnand %p10192_p6, %p10530_p7 }
  0xa9   : > { %p10195_p9 = pneg %p10194_p8 }
  0xab   : > { %p10200_p3 = pnand %p10198_p1, %p10195_p9 }
  0xad   : > { %10203 = shalt.err (!%p10200_p3)
}
  0xae   : > { %s10204_s16 = scalar_lea.vmem %s10611_s23, 64  ;;  %p10212_p13 = scmp.lt.s32.totalorder %s10611_s23, %s10611_s23 }
  0xaf   : > { %p10205_p10 = scmp.ne.s32.totalorder %s10611_s23, %s10204_s16  ;;  %p10213_p0 = scmp.lt.s32.totalorder %s10204_s16, %s10204_s16 }
  0xb1   : > { %p10207_p11 = pnand %p10205_p10, %p10530_p7  ;;  %p10214_p2 = por %p10213_p0, %p10212_p13 }
  0xb3   : > { %p10208_p12 = pneg %p10207_p11 }
  0xb5   : > { %p10215_p4 = pnand %p10214_p2, %p10208_p12 }
  0xb7   : > { %10218 = shalt.err (!%p10215_p4)
}
  0xb8   : > { %9892 = dma.hbm_to_vmem [thread:$0]  (!%p10514_p5), %s13135_s6, 64, %s10611_s23, [#allocation14]  }
  0xb9   : > { %s10401_s8 = smov [#allocation16]   ;;  %s10219_s13 = scalar_lea.hbm %s13136_s7, 8192 }
  0xba   : > { %s328_s1 = sshll.u32 %s10401_s8, 4  ;;  %p10220_p6 = scmp.ne.s32.totalorder %s13136_s7, %s10219_s13  ;;  %s329_s1 = int_to_ptr.vmem [resolvable:$true] %s328_s1 }
  0xbb   : > { %p10226_p1 = scmp.lt.u32.totalorder %s10219_s13, %s13136_s7 }
  0xbc   : > { %p10222_p8 = pnand %p10220_p6, %p10530_p7 }
  0xbe   : > { %p10223_p9 = pneg %p10222_p8 }
  0xc0   : > { %p10228_p3 = pnand %p10226_p1, %p10223_p9 }
  0xc2   : > { %10231 = shalt.err (!%p10228_p3)
}
  0xc3   : > { %s10232_s23 = scalar_lea.vmem %s329_s1, 8192  ;;  %p10240_p13 = scmp.lt.s32.totalorder %s329_s1, %s329_s1 }
  0xc4   : > { %p10233_p10 = scmp.ne.s32.totalorder %s329_s1, %s10232_s23  ;;  %p10241_p0 = scmp.lt.s32.totalorder %s10232_s23, %s10232_s23 }
  0xc6   : > { %p10235_p11 = pnand %p10233_p10, %p10530_p7  ;;  %p10242_p2 = por %p10241_p0, %p10240_p13 }
  0xc8   : > { %p10236_p12 = pneg %p10235_p11 }
  0xca   : > { %p10243_p4 = pnand %p10242_p2, %p10236_p12 }
  0xcc   : > { %10246 = shalt.err (!%p10243_p4)
}
  0xcd   : > { %s10402_s22 = smov 128   ;;  %s10403_s18 = smov 8  }
  0xce   : > { %9895 = dma.hbm_to_vmem [thread:$0]  (!%p10514_p5), %s13136_s7, 8192, %s329_s1, [#allocation17], %s10402_s22, %s10402_s22, %s10403_s18  }
  0xcf   : > { %s8458_s26 = sadd.s32 4294967294, %s10391_s12   ;;  %s37_s8 = sadd.s32 1, %s10383_s10 }
  0xd0   : > { %s40_s3 = sadd.s32 1, %s10387_s11  ;;  %p38_p7 = scmp.ge.s32.totalorder %s37_s8, 3 }
  0xd1   : > { %s49_s9 = sadd.s32 1, %s10371_s29  ;;  %p56_p6 = scmp.ne.s32.totalorder %s10371_s29, %s10367_s28 }
  0xd2   : > { %p57_p8 = scmp.eq.s32.totalorder %s10391_s12, 0  ;;  %s13642_s8 = smov (%p38_p7, %s37_s8), 0 }
  0xd3   : > { %s13644_s3 = smov (!%p38_p7, %s40_s3), %s10387_s11  ;;  %s45_s20 = ssub.s32 %s10383_s10, %s13642_s8 }
  0xd4   : > { %p10684_p9 = por %p57_p8, %p56_p6  ;;  %p42_p5 = scmp.ge.s32.totalorder %s13644_s3, 2 }
  0xd5   : > { %p62_p1 = scmp.ne.s32.totalorder %s10367_s28, %s10363_s27  ;;  %s13298_s1 = sadd.s32 4294967295, %s10391_s12  }
  0xd6   : > { %p235_p3 = scmp.eq.s32.totalorder %s13298_s1, 5  ;;  %p241_p10 = scmp.eq.s32.totalorder %s8458_s26, 5 }
  0xd7   : > { %s13646_s3 = smov (%p42_p5, %s13644_s3), 0  ;;  %p13299_p11 = scmp.ne.s32.totalorder %s13288_s14, 0 }
  0xd8   : > { %p10700_p13 = por %p235_p3, %p56_p6  ;;  %s44_s17 = ssub.s32 %s10387_s11, %s13646_s3 }
  0xd9   : > { %p10696_p12 = por %p13299_p11, %p62_p1  ;;  %p10706_p0 = por %p241_p10, %p62_p1 }
  0xda   : > { %s13301_s21 = scalar_select %p10700_p13, 1, 0 }
  0xdb   : > { %s13302_s19 = scalar_select %p10706_p0, 1, 0 }
  0xdc   : > { %s46_s23 = sor.u32 %s45_s20, %s44_s17  ;;  %p9911_p2 = scmp.lt.s32.totalorder %s10391_s12, 6 }
  0xdd   : > { %p47_p4 = scmp.eq.s32.totalorder %s46_s23, 0  ;;  %s342_s22 = sand.u32 1, %s10371_s29  }
  0xde   : > { %s8468_s18 = sshll.u32 %s342_s22, 3  ;;  %s9840_s24 = smul.u32 3, %s10387_s11 }
  0xdf   : > { %s10713_s16 = scalar_select %p47_p4, %s10371_s29, %s49_s9  }
  0xe0   : > { %s346_s26 = scalar_lea.vmem [#allocation4], %s8468_s18  ;;  %p10718_p7 = pnand %p9911_p2, %p10684_p9 }
  0xe1   : > { %s355_s1 = sshll.u32 %s346_s26, 4  ;;  %s351_s4 = sadd.s32 %s10383_s10, %s9840_s24  ;;  %s10723_s1 = int_to_ptr.vmem [resolvable:$true] %s355_s1 }
  0xe2   : > { %s8469_s20 = sshll.u32 %s351_s4, 7  ;;  %s343_s9 = scalar_lea.sflag [#allocation5], %s342_s22 }
  0xe3   : > { %s10728_s5 = scalar_lea.hbm %s13129_s0, %s8469_s20  ;;  %p10249_p8 = pneg %p10718_p7 }
  0xe4   : > { %s10247_s13 = scalar_lea.hbm %s10728_s5, 128  ;;  %s10252_s24 = scalar_lea.hbm %s13129_s0, 768 }
  0xe5   : > { %p10248_p6 = scmp.ne.s32.totalorder %s10728_s5, %s10247_s13  ;;  %p10253_p1 = scmp.lt.u32.totalorder %s10728_s5, %s13129_s0 }
  0xe6   : > { %p10254_p3 = scmp.lt.u32.totalorder %s10252_s24, %s10247_s13  ;;  %p10256_p11 = scmp.lt.u32.totalorder %s10247_s13, %s10728_s5 }
  0xe7   : > { %p10250_p9 = pnand %p10249_p8, %p10248_p6 }
  0xe8   : > { %p10255_p10 = por %p10254_p3, %p10253_p1 }
  0xe9   : > { %p10251_p5 = pneg %p10250_p9 }
  0xea   : > { %p10257_p2 = por %p10256_p11, %p10255_p10 }
  0xec   : > { %p10258_p4 = pnand %p10257_p2, %p10251_p5 }
  0xee   : > { %10261 = shalt.err (!%p10258_p4)
}
  0xef   : > { %s10262_s22 = scalar_lea.vmem %s10723_s1, 128  ;;  %s10404_s17 = smov [#allocation4]  }
  0xf0   : > { %p10263_p6 = scmp.ne.s32.totalorder %s10723_s1, %s10262_s22  ;;  %s10267_s23 = sshll.u32 %s10404_s17, 4  ;;  %s10268_s23 = int_to_ptr.vmem [resolvable:$false] %s10267_s23 }
  0xf1   : > { %s10269_s18 = scalar_lea.vmem %s10268_s23, 256  ;;  %p10270_p13 = scmp.lt.s32.totalorder %s10723_s1, %s10268_s23 }
  0xf2   : > { %p10265_p9 = pnand %p10263_p6, %p10249_p8  ;;  %p10271_p1 = scmp.lt.s32.totalorder %s10269_s18, %s10262_s22 }
  0xf4   : > { %p10266_p0 = pneg %p10265_p9  ;;  %p10272_p3 = por %p10271_p1, %p10270_p13 }
  0xf6   : > { %p10273_p10 = pnand %p10272_p3, %p10266_p0 }
  0xf8   : > { %10276 = shalt.err (!%p10273_p10)
}
  0xf9   : > { %9899 = dma.hbm_to_vmem [thread:$0]  (!%p10718_p7), %s10728_s5, 128, %s10723_s1, %s343_s9  }
  0xfa   : > { %p13304_p5 = scmp.ne.s32.totalorder %s13289_s15, 0 }
  0xfc   : > { %364 = sbr.rel (%p13304_p5) target bundleno = 1818 (0x71a), region = 52 }
 0x103   : > { %s10758_s13 = sand.u32 1, %s10367_s28  }
 0x104   : > { %s8471_s4 = sshll.u32 %s10758_s13, 3  ;;  %s367_s24 = scalar_lea.sflag [#allocation5], %s10758_s13 }
 0x105   : > { %s10762_s26 = scalar_lea.vmem [#allocation4], %s8471_s4 }
 0x106   : > { %10338 = dma.done.wait (%p10696_p12), %s367_s24, 128  }
 0x107   : > { %10340 = vsyncadd (%p10696_p12), %s367_s24, 4294967168  ;;  %p13305_p13 = scmp.ne.s32.totalorder %s13288_s14, 0 }
 0x109   : > { %10342 = dma.done.wait (%p13305_p13), [#allocation8], 6784  }
 0x10a   : > { %10344 = vsyncadd (%p13305_p13), [#allocation8], 4294960512 }
 0x10b   : > { %10346 = dma.done.wait (%p13305_p13), [#allocation11], 272  }
 0x10c   : > { %10348 = vsyncadd (%p13305_p13), [#allocation11], 4294967024 }
 0x10d   : > { %10350 = dma.done.wait (%p13305_p13), [#allocation14], 128  }
 0x10e   : > { %10352 = vsyncadd (%p13305_p13), [#allocation14], 4294967168 }
 0x10f   : > { %10354 = dma.done.wait (%p13305_p13), [#allocation17], 8192  }
 0x110   : > { %10356 = vsyncadd (%p13305_p13), [#allocation17], 4294959104  ;;  %s10784_s2 = scalar_lea.vmem [#allocation18], %s8471_s4  ;;  %p8480_p12 = scmp.ne.s32.totalorder %s10375_s30, 0 }
 0x111   : > { %v435_v0 = vlaneseq (!%p8480_p12)  ;;  %v10405_v1 = vmov (!%p8480_p12), 0.0  }
 0x112   : > { %434 = sbr.rel (%p8480_p12) target bundleno = 281 (0x119), region = 88 }
 0x113   : > { %vm437_vm0 = vcmp.lt.s32.totalorder (!%p8480_p12), %v435_v0, 512 }
 0x114   : > { %439 = vst.msk [vmem:[#allocation2] sm:$0xf] (!%p8480_p12), %vm437_vm0, %v10405_v1  ;;  %440 = vst.msk [vmem:[#allocation3] sm:$0xf] (!%p8480_p12), %vm437_vm0, %v10405_v1 }
 0x119 PF: > { %v443_v2 = vld [vmem:[#allocation9 + $0x8] sm:$0xff]  ;;  %v456_v3 = vld [vmem:[#allocation9 + $0x70] sm:$0xff]  ;;  %v442_v4 = vld [vmem:[#allocation9] sm:$0xff]  ;;  %vm563_vm1 = vcmask 261120   ;;  %v13157_v11 = vmov 0.0   ;;  %vm10408_vm2 = vmmov 0  }
 0x11a   : > { %v567_v5 = vand.u32 4294901760, %v443_v2  ;;  %v571_v6 = vand.u32 4294901760, %v456_v3  ;;  %v455_v7 = vld [vmem:[#allocation9 + $0x68] sm:$0xff]  ;;  %v569_v8 = vand.u32 4294901760, %v442_v4  ;;  %v469_v9 = vld [vmem:[#allocation9 + $0xd8] sm:$0xff]  ;;  %v482_v10 = vld [vmem:[#allocation9 + $0x140] sm:$0xff]  ;;  %639 = vmatprep.mubr.f32.mxu0 %v13157_v11  ;;  %1182 = vmatprep.mubr.f32.mxu1 %v13157_v11 }
 0x11b   : > { %v573_v12 = vand.u32 4294901760, %v455_v7  ;;  %v575_v13 = vand.u32 4294901760, %v469_v9  ;;  %v579_v14 = vand.u32 4294901760, %v482_v10  ;;  %v468_v15 = vld [vmem:[#allocation9 + $0xd0] sm:$0xff]  ;;  %v481_v16 = vld [vmem:[#allocation9 + $0x138] sm:$0xff]  ;;  %vm4451_vm3 = vcmask 64512  }
 0x11c   : > { %v441_v17 = vld [vmem:[%s10762_s26] sm:$0xff]  ;;  %v10790_v18 = vpack.c.bf16 %v571_v6, %v567_v5  ;;  %v10792_v19 = vsub.f32 %v443_v2, %v567_v5  ;;  %v10794_v20 = vsub.f32 %v456_v3, %v571_v6  ;;  %v10796_v21 = vsub.f32 %v442_v4, %v569_v8  ;;  %s13630_s5 = sld [smem:[#allocation25_spill]]  ;;  %s8305_s1 = sshll.u32 %s10784_s2, 4  ;;  %s13075_s1 = int_to_ptr.vmem [resolvable:$true] %s8305_s1 }
 0x11d   : > { %v10798_v22 = vpack.c.bf16 %v573_v12, %v569_v8  ;;  %v10800_v23 = vsub.f32 %v455_v7, %v573_v12  ;;  %v10802_v24 = vpack.c.bf16 %v579_v14, %v575_v13  ;;  %v10804_v25 = vsub.f32 %v469_v9, %v575_v13  ;;  %v447_v7 = vld [vmem:[#allocation9 + $0x28] sm:$0xff]  ;;  %v460_v8 = vld [vmem:[#allocation9 + $0x90] sm:$0xff]  ;;  %s13631_s22 = sld [smem:[#allocation77_spill]]  ;;  %s8290_s23 = scalar_lea.sflag [#allocation6], %s10758_s13 }
 0x11e   : > { %9010 = vmatprep.subr.bf16.mxu0 %v10790_v18  ;;  %v10807_v26 = vsub.f32 %v482_v10, %v579_v14  ;;  %v577_v27 = vand.u32 4294901760, %v468_v15  ;;  %v581_v28 = vand.u32 4294901760, %v481_v16  ;;  %v565_v29 = vsel %vm563_vm1, %v441_v17, 0  ;;  %v446_v14 = vld [vmem:[#allocation9 + $0x20] sm:$0xff]  ;;  %p13632_p7 = scmp.ne.s32.totalorder %s13301_s21, 0  ;;  %s10411_s18 = smov [#allocation18]  }
 0x11f   : > { %9012 = vmatpush1.bf16.msra.mxu0 %v10798_v22  ;;  %v10811_v30 = vand.u32 4294901760, %v565_v29  ;;  %v653_v31 = vand.u32 4294901760, %v10792_v19  ;;  %v665_v32 = vand.u32 4294901760, %v10794_v20  ;;  %v659_v33 = vand.u32 4294901760, %v10796_v21  ;;  %v486_v17 = vld [vmem:[#allocation9 + $0x160] sm:$0xff]  ;;  %s10281_s4 = sshll.u32 %s10411_s18, 4  ;;  %s10282_s4 = int_to_ptr.vmem [resolvable:$false] %s10281_s4 }
 0x120   : > { %9014 = vmatprep.subr.bf16.mxu0 %v10802_v24  ;;  %v10817_v34 = vpack.c.bf16 %v581_v28, %v577_v27  ;;  %v10819_v35 = vsub.f32 %v468_v15, %v577_v27  ;;  %v10821_v36 = vsub.f32 %v481_v16, %v581_v28  ;;  %v671_v37 = vand.u32 4294901760, %v10800_v23  ;;  %v459_v15 = vld [vmem:[#allocation9 + $0x88] sm:$0xff]  ;;  %v473_v16 = vld [vmem:[#allocation9 + $0xf8] sm:$0xff]  ;;  %v472_v28 = vld [vmem:[#allocation9 + $0xf0] sm:$0xff]  ;;  %s10283_s24 = scalar_lea.vmem %s10282_s4, 256  ;;  %p10284_p2 = scmp.lt.s32.totalorder %s13075_s1, %s10282_s4 }
 0x121   : > { %v10825_v38 = vsub.f32 %v565_v29, %v10811_v30  ;;  %v654_v39 = vsub.f32 %v10792_v19, %v653_v31  ;;  %v666_v40 = vsub.f32 %v10794_v20, %v665_v32  ;;  %v660_v41 = vsub.f32 %v10796_v21, %v659_v33  ;;  %v485_v29 = vld [vmem:[#allocation9 + $0x158] sm:$0xff] }
 0x122   : > { %v672_v42 = vsub.f32 %v10800_v23, %v671_v37  ;;  %v677_v43 = vand.u32 4294901760, %v10804_v25  ;;  %v689_v44 = vand.u32 4294901760, %v10807_v26  ;;  %v683_v45 = vand.u32 4294901760, %v10819_v35  ;;  %s9841_s14 = smul.u32 3, %s13630_s5 }
 0x123   : > { %9016 = vmatpush1.bf16.msra.mxu0 %v10817_v34  ;;  %v10836_v46 = vand.u32 4294901760, %v10825_v38  ;;  %v655_v47 = vand.u32 4294901760, %v654_v39  ;;  %v667_v48 = vand.u32 4294901760, %v666_v40  ;;  %v661_v49 = vand.u32 4294901760, %v660_v41 }
 0x124   : > { %v673_v50 = vand.u32 4294901760, %v672_v42  ;;  %v678_v51 = vsub.f32 %v10804_v25, %v677_v43  ;;  %v690_v52 = vsub.f32 %v10807_v26, %v689_v44  ;;  %v684_v53 = vsub.f32 %v10819_v35, %v683_v45  ;;  %s8301_s15 = sadd.s32 %s10375_s30, %s9841_s14  ;;  %s10277_s30 = scalar_lea.vmem %s13075_s1, 128 }
 0x125   : > { %v643_v54 = vsub.f32 %v10825_v38, %v10836_v46  ;;  %v9017_v55 = vpack.c.bf16 %v667_v48, %v655_v47  ;;  %v695_v56 = vand.u32 4294901760, %v10821_v36  ;;  %v9025_v2 = vpack.c.bf16 %v10794_v20, %v10792_v19  ;;  %s8490_s25 = sshll.u32 %s8301_s15, 7  ;;  %p10278_p0 = scmp.ne.s32.totalorder %s13075_s1, %s10277_s30 }
 0x126   : > { %v9019_v57 = vpack.c.bf16 %v673_v50, %v661_v49  ;;  %v679_v58 = vand.u32 4294901760, %v678_v51  ;;  %v691_v59 = vand.u32 4294901760, %v690_v52  ;;  %v685_v61 = vand.u32 4294901760, %v684_v53  ;;  %s13073_s17 = scalar_lea.hbm %s13631_s22, %s8490_s25  ;;  %p10285_p4 = scmp.lt.s32.totalorder %s10283_s24, %s10277_s30 }
 0x127   : > { %v10844_v60 = vand.u32 4294901760, %v643_v54  ;;  %9018 = vmatprep.subr.bf16.mxu0 %v9017_v55  ;;  %v696_v62 = vsub.f32 %v10821_v36, %v695_v56  ;;  %v9027_v3 = vpack.c.bf16 %v10800_v23, %v10796_v21  ;;  %v9029_v4 = vpack.c.bf16 %v10807_v26, %v10804_v25  ;;  %p10279_p8 = pnand %p10278_p0, %p13632_p7 }
 0x128   : > { %v9021_v63 = vpack.c.bf16 %v691_v59, %v679_v58  ;;  %v9031_v5 = vpack.c.bf16 %v10821_v36, %v10819_v35  ;;  %v9041_v6 = vpack.c.bf16 %v665_v32, %v653_v31  ;;  %v9043_v9 = vpack.c.bf16 %v671_v37, %v659_v33  ;;  %p10286_p6 = por %p10285_p4, %p10284_p2 }
 0x129   : > { %645 = vmatmul.mubr.f32.vlgmr.msra.gmra.mrb[0].mxu0 %v10844_v60  ;;  %v697_v0 = vand.u32 4294901760, %v696_v62  ;;  %v9045_v10 = vpack.c.bf16 %v689_v44, %v677_v43  ;;  %v1653_v12 = vand.u32 4294901760, %v447_v7  ;;  %v1657_v13 = vand.u32 4294901760, %v460_v8  ;;  %p10280_p11 = pneg %p10279_p8 }
 0x12a   : > { %9020 = vmatpush1.bf16.msra.mxu0 %v9019_v57  ;;  %755 = vmatprep.mubr.f32.mxu0 %v13157_v11  ;;  %v9047_v19 = vpack.c.bf16 %v695_v56, %v683_v45  ;;  %v1655_v20 = vand.u32 4294901760, %v446_v14  ;;  %v1659_v21 = vand.u32 4294901760, %v459_v15  ;;  %v1661_v26 = vand.u32 4294901760, %v473_v16 }
 0x12b   : > { %9022 = vmatprep.subr.bf16.mxu0 %v9021_v63  ;;  %v9023_v1 = vpack.c.bf16 %v697_v0, %v685_v61  ;;  %v10867_v23 = vsub.f32 %v447_v7, %v1653_v12  ;;  %v10869_v25 = vsub.f32 %v460_v8, %v1657_v13  ;;  %v1665_v27 = vand.u32 4294901760, %v486_v17  ;;  %p10287_p9 = pnand %p10286_p6, %p10280_p11 }
 0x12c   : > { %v10871_v31 = vsub.f32 %v446_v14, %v1655_v20  ;;  %v10873_v32 = vsub.f32 %v459_v15, %v1659_v21  ;;  %v1663_v33 = vand.u32 4294901760, %v472_v28  ;;  %v1667_v35 = vand.u32 4294901760, %v485_v29 }
 0x12d   : > { %v10876_v36 = vsub.f32 %v473_v16, %v1661_v26  ;;  %v10878_v37 = vsub.f32 %v486_v17, %v1665_v27  ;;  %v1739_v39 = vand.u32 4294901760, %v10867_v23  ;;  %v1751_v40 = vand.u32 4294901760, %v10869_v25  ;;  %v457_v17 = vld [vmem:[#allocation9 + $0x78] sm:$0xff] }
 0x12e   : > { %9024 = vmatpush1.bf16.msra.mxu0 %v9023_v1  ;;  %v10883_v41 = vpack.c.bf16 %v1657_v13, %v1653_v12  ;;  %v10887_v42 = vsub.f32 %v472_v28, %v1663_v33  ;;  %v10889_v43 = vsub.f32 %v485_v29, %v1667_v35  ;;  %v1757_v44 = vand.u32 4294901760, %v10873_v32  ;;  %v458_v12 = vld [vmem:[#allocation9 + $0x80] sm:$0xff]  ;;  %v444_v13 = vld [vmem:[#allocation9 + $0x10] sm:$0xff] }
 0x12f   : > { %9026 = vmatprep.subr.bf16.mxu0 %v9025_v2  ;;  %v1740_v45 = vsub.f32 %v10867_v23, %v1739_v39  ;;  %v1763_v47 = vand.u32 4294901760, %v10876_v36  ;;  %v1775_v48 = vand.u32 4294901760, %v10878_v37  ;;  %v10902_v49 = vpack.c.bf16 %v1659_v21, %v1655_v20  ;;  %v471_v20 = vld [vmem:[#allocation9 + $0xe8] sm:$0xff]  ;;  %v484_v21 = vld [vmem:[#allocation9 + $0x150] sm:$0xff]  ;;  %v470_v29 = vld [vmem:[#allocation9 + $0xe0] sm:$0xff] }
 0x130   : > { %v10904_v50 = vpack.c.bf16 %v1665_v27, %v1661_v26  ;;  %v1758_v51 = vsub.f32 %v10873_v32, %v1757_v44  ;;  %v1769_v52 = vand.u32 4294901760, %v10887_v42  ;;  %v1781_v53 = vand.u32 4294901760, %v10889_v43 }
 0x131   : > { %757 = vmatmul.mubr.f32.vlgmr.msra.gmra.mrb[0].mxu0 %v10811_v30  ;;  %v1741_v54 = vand.u32 4294901760, %v1740_v45  ;;  %v1776_v56 = vsub.f32 %v10878_v37, %v1775_v48  ;;  %v10923_v57 = vpack.c.bf16 %v1667_v35, %v1663_v33  ;;  %v9121_v7 = vpack.c.bf16 %v10869_v25, %v10867_v23  ;;  %v483_v33 = vld [vmem:[#allocation9 + $0x148] sm:$0xff] }
 0x132   : > { %9028 = vmatpush1.bf16.msra.mxu0 %v9027_v3  ;;  %843 = vmatprep.mubr.f32.mxu0 %v13157_v11  ;;  %v1759_v59 = vand.u32 4294901760, %v1758_v51  ;;  %v1770_v61 = vsub.f32 %v10887_v42, %v1769_v52  ;;  %v1782_v62 = vsub.f32 %v10889_v43, %v1781_v53  ;;  %v9123_v8 = vpack.c.bf16 %v10873_v32, %v10871_v31 }
 0x133   : > { %9030 = vmatprep.subr.bf16.mxu0 %v9029_v4  ;;  %v1777_v1 = vand.u32 4294901760, %v1776_v56  ;;  %v9127_v14 = vpack.c.bf16 %v10889_v43, %v10887_v42  ;;  %v1114_v16 = vand.u32 4294901760, %v458_v12  ;;  %v1116_v26 = vand.u32 4294901760, %v457_v17 }
 0x134   : > { %v1771_v3 = vand.u32 4294901760, %v1770_v61  ;;  %v1783_v4 = vand.u32 4294901760, %v1782_v62  ;;  %v1118_v27 = vand.u32 4294901760, %v471_v20  ;;  %v1122_v28 = vand.u32 4294901760, %v484_v21 }
 0x136   : > { %9032 = vmatpush1.bf16.msra.mxu0 %v9031_v5  ;;  %v10964_v56 = vsub.f32 %v484_v21, %v1122_v28  ;;  %v464_v21 = vld [vmem:[#allocation9 + $0xb0] sm:$0xff] }
 0x137   : > { %9034 = vmatprep.subr.bf16.mxu0 %v10790_v18 }
 0x139   : > { %846 = vmatmul.mubr.f32.vlgmr.msra.gmra.mrb[0].mxu0 %v10825_v38 }
 0x13a   : > { %9036 = vmatpush1.bf16.msra.mxu0 %v10798_v22  ;;  %924 = vmatprep.mubr.f32.mxu0 %v13157_v11 }
 0x13b   : > { %9038 = vmatprep.subr.bf16.mxu0 %v10802_v24 }
 0x13e   : > { %9040 = vmatpush1.bf16.msra.mxu0 %v10817_v34 }
 0x13f   : > { %9042 = vmatprep.subr.bf16.mxu0 %v9041_v6  ;;  %v9119_v6 = vpack.c.bf16 %v1783_v4, %v1771_v3 }
 0x141   : > { %928 = vmatmul.mubr.f32.vlgmr.msra.gmra.mrb[0].mxu0 %v10836_v46 }
 0x142   : > { %9044 = vmatpush1.bf16.msra.mxu0 %v9043_v9  ;;  %1022 = vmatprep.mubr.f32.mxu0 %v13157_v11  ;;  %v9125_v9 = vpack.c.bf16 %v10878_v37, %v10876_v36  ;;  %v9143_v37 = vpack.c.bf16 %v1781_v53, %v1769_v52 }
 0x143   : > { %9046 = vmatprep.subr.bf16.mxu0 %v9045_v10  ;;  %v445_v10 = vld [vmem:[#allocation9 + $0x18] sm:$0xff] }
 0x144   : > { %v1110_v15 = vand.u32 4294901760, %v445_v10 }
 0x146   : > { %9048 = vmatpush1.bf16.msra.mxu0 %v9047_v19  ;;  %v1112_v19 = vand.u32 4294901760, %v444_v13  ;;  %v10947_v35 = vpack.c.bf16 %v1114_v16, %v1110_v15  ;;  %v10949_v45 = vsub.f32 %v445_v10, %v1110_v15  ;;  %v9137_v15 = vpack.c.bf16 %v1751_v40, %v1739_v39 }
 0x147   : > { %9050 = vmatprep.subr.bf16.mxu0 %v10790_v18  ;;  %v1745_v18 = vand.u32 4294901760, %v10871_v31 }
 0x148   : > { %v10955_v51 = vpack.c.bf16 %v1116_v26, %v1112_v19  ;;  %9058 = vmatprep.subr.bf16.mxu1 %v10947_v35  ;;  %v1196_v61 = vand.u32 4294901760, %v10949_v45 }
 0x149   : > { %1024 = vmatmul.mubr.f32.vlgmr.msra.gmra.mrb[0].mxu0 %v10811_v30 }
 0x14a   : > { %9052 = vmatpush1.bf16.msra.mxu0 %v10798_v22  ;;  %1102 = vmatprep.mubr.f32.mxu0 %v13157_v11  ;;  %v1752_v22 = vsub.f32 %v10869_v25, %v1751_v40  ;;  %v9139_v40 = vpack.c.bf16 %v1757_v44, %v1745_v18 }
 0x14b   : > { %9054 = vmatprep.subr.bf16.mxu0 %v10802_v24  ;;  %v1746_v24 = vsub.f32 %v10871_v31, %v1745_v18  ;;  %9060 = vmatpush1.bf16.msra.mxu1 %v10955_v51  ;;  %v477_v31 = vld [vmem:[#allocation9 + $0x118] sm:$0xff] }
 0x14c   : > { %v1753_v55 = vand.u32 4294901760, %v1752_v22  ;;  %v10951_v22 = vsub.f32 %v458_v12, %v1114_v16  ;;  %v1232_v12 = vand.u32 4294901760, %v10964_v56 }
 0x14d   : > { %v1747_v58 = vand.u32 4294901760, %v1746_v24  ;;  %v10953_v24 = vsub.f32 %v444_v13, %v1112_v19 }
 0x14e   : > { %9056 = vmatpush1.bf16.msra.mxu0 %v10817_v34  ;;  %v1764_v34 = vsub.f32 %v10876_v36, %v1763_v47  ;;  %v9113_v63 = vpack.c.bf16 %v1753_v55, %v1741_v54  ;;  %v10957_v54 = vsub.f32 %v457_v17, %v1116_v26  ;;  %v10959_v55 = vpack.c.bf16 %v1122_v28, %v1118_v27 }
 0x14f   : > { %9106 = vmatprep.subr.bf16.mxu0 %v10883_v41  ;;  %v9115_v2 = vpack.c.bf16 %v1759_v59, %v1747_v58  ;;  %v1120_v58 = vand.u32 4294901760, %v470_v29  ;;  %v1124_v59 = vand.u32 4294901760, %v483_v33  ;;  %v1208_v62 = vand.u32 4294901760, %v10951_v22 }
 0x150   : > { %v1765_v0 = vand.u32 4294901760, %v1764_v34  ;;  %v10961_v34 = vsub.f32 %v471_v20, %v1118_v27  ;;  %9062 = vmatprep.subr.bf16.mxu1 %v10959_v55  ;;  %v451_v20 = vld [vmem:[#allocation9 + $0x48] sm:$0xff]  ;;  %v1233_v27 = vsub.f32 %v10964_v56, %v1232_v12  ;;  %v9073_v36 = vpack.c.bf16 %v10951_v22, %v10949_v45 }
 0x151   : > { %1104 = vmatmul.mubr.f32.vlgmr.msra.gmra.mrb[0].mxu0 %v10811_v30  ;;  %v10976_v3 = vsub.f32 %v470_v29, %v1120_v58  ;;  %v10978_v4 = vsub.f32 %v483_v33, %v1124_v59  ;;  %v9075_v42 = vpack.c.bf16 %v10957_v54, %v10953_v24 }
 0x152   : > { %9108 = vmatpush1.bf16.msra.mxu0 %v10902_v49  ;;  %1725 = vmatprep.mubr.f32.mxu0 %v13157_v11  ;;  %v9117_v5 = vpack.c.bf16 %v1777_v1, %v1765_v0  ;;  %v1214_v0 = vand.u32 4294901760, %v10957_v54  ;;  %v1220_v1 = vand.u32 4294901760, %v10961_v34  ;;  %v1234_v29 = vand.u32 4294901760, %v1233_v27 }
 0x153   : > { %9110 = vmatprep.subr.bf16.mxu0 %v10904_v50  ;;  %v1226_v13 = vand.u32 4294901760, %v10976_v3  ;;  %v9077_v43 = vpack.c.bf16 %v10964_v56, %v10961_v34  ;;  %v475_v56 = vld [vmem:[#allocation9 + $0x108] sm:$0xff] }
 0x155   : > { %v1227_v28 = vsub.f32 %v10976_v3, %v1226_v13 }
 0x156   : > { %9112 = vmatpush1.bf16.msra.mxu0 %v10923_v57 }
 0x157   : > { %9114 = vmatprep.subr.bf16.mxu0 %v9113_v63  ;;  %v1202_v63 = vand.u32 4294901760, %v10953_v24  ;;  %v1228_v33 = vand.u32 4294901760, %v1227_v28 }
 0x159   : > { %1731 = vmatmul.mubr.f32.vlgmr.msra.gmra.mrb[2].mxu0 %v10844_v60 }
 0x15a   : > { %9116 = vmatpush1.bf16.msra.mxu0 %v9115_v2  ;;  %1841 = vmatprep.mubr.f32.mxu0 %v13157_v11  ;;  %v10974_v2 = vpack.c.bf16 %v1124_v59, %v1120_v58  ;;  %v9141_v59 = vpack.c.bf16 %v1775_v48, %v1763_v47 }
 0x15b   : > { %9118 = vmatprep.subr.bf16.mxu0 %v9117_v5  ;;  %v1197_v5 = vsub.f32 %v10949_v45, %v1196_v61  ;;  %v9093_v45 = vpack.c.bf16 %v1232_v12, %v1220_v1  ;;  %v2204_v12 = vand.u32 4294901760, %v475_v56 }
 0x15c   : > { %9064 = vmatpush1.bf16.msra.mxu1 %v10974_v2 }
 0x15d   : > { %v1198_v10 = vand.u32 4294901760, %v1197_v5  ;;  %v2739_v5 = vand.u32 4294901760, %v451_v20 }
 0x15e   : > { %9120 = vmatpush1.bf16.msra.mxu0 %v9119_v6  ;;  %v1209_v6 = vsub.f32 %v10951_v22, %v1208_v62 }
 0x15f   : > { %9122 = vmatprep.subr.bf16.mxu0 %v9121_v7  ;;  %v1203_v7 = vsub.f32 %v10953_v24, %v1202_v63  ;;  %1188 = vmatmul.mubr.f32.vlgmr.msra.gmra.mrb[0].mxu1 %v10844_v60  ;;  %v11035_v48 = vsub.f32 %v451_v20, %v2739_v5  ;;  %v449_v24 = vld [vmem:[#allocation9 + $0x38] sm:$0xff] }
 0x160   : > { %v1210_v16 = vand.u32 4294901760, %v1209_v6  ;;  %v2743_v6 = vand.u32 4294901760, %v464_v21  ;;  %1298 = vmatprep.mubr.f32.mxu1 %v13157_v11 }
 0x161   : > { %1843 = vmatmul.mubr.f32.vlgmr.msra.gmra.mrb[2].mxu0 %v10811_v30  ;;  %v1204_v17 = vand.u32 4294901760, %v1203_v7  ;;  %v450_v7 = vld [vmem:[#allocation9 + $0x40] sm:$0xff]  ;;  %v2825_v28 = vand.u32 4294901760, %v11035_v48 }
 0x162   : > { %9124 = vmatpush1.bf16.msra.mxu0 %v9123_v8  ;;  %1929 = vmatprep.mubr.f32.mxu0 %v13157_v11  ;;  %v1215_v8 = vsub.f32 %v10957_v54, %v1214_v0  ;;  %v9065_v25 = vpack.c.bf16 %v1210_v16, %v1198_v10  ;;  %v2741_v44 = vand.u32 4294901760, %v450_v7  ;;  %v11037_v10 = vsub.f32 %v464_v21, %v2743_v6  ;;  %v462_v54 = vld [vmem:[#allocation9 + $0xa0] sm:$0xff] }
 0x163   : > { %9126 = vmatprep.subr.bf16.mxu0 %v9125_v9  ;;  %v1221_v9 = vsub.f32 %v10961_v34, %v1220_v1  ;;  %v488_v1 = vld [vmem:[#allocation9 + $0x170] sm:$0xff] }
 0x164   : > { %v1216_v19 = vand.u32 4294901760, %v1215_v8  ;;  %v463_v8 = vld [vmem:[#allocation9 + $0xa8] sm:$0xff]  ;;  %9066 = vmatprep.subr.bf16.mxu1 %v9065_v25  ;;  %v11043_v52 = vsub.f32 %v450_v7, %v2741_v44  ;;  %v9079_v25 = vpack.c.bf16 %v10978_v4, %v10976_v3 }
 0x165   : > { %v1222_v26 = vand.u32 4294901760, %v1221_v9  ;;  %v490_v9 = vld [vmem:[#allocation9 + $0x180] sm:$0xff]  ;;  %v2745_v47 = vand.u32 4294901760, %v463_v8 }
 0x166   : > { %9128 = vmatpush1.bf16.msra.mxu0 %v9127_v14  ;;  %v1238_v14 = vand.u32 4294901760, %v10978_v4  ;;  %v9067_v39 = vpack.c.bf16 %v1216_v19, %v1204_v17  ;;  %v2751_v16 = vand.u32 4294901760, %v490_v9  ;;  %v476_v17 = vld [vmem:[#allocation9 + $0x110] sm:$0xff]  ;;  %v489_v19 = vld [vmem:[#allocation9 + $0x178] sm:$0xff] }
 0x167   : > { %9130 = vmatprep.subr.bf16.mxu0 %v10883_v41  ;;  %v9069_v32 = vpack.c.bf16 %v1234_v29, %v1222_v26  ;;  %v11045_v53 = vsub.f32 %v463_v8, %v2745_v47  ;;  %v2749_v20 = vand.u32 4294901760, %v476_v17  ;;  %v2753_v21 = vand.u32 4294901760, %v489_v19 }
 0x168   : > { %v1239_v23 = vsub.f32 %v10978_v4, %v1238_v14  ;;  %9068 = vmatpush1.bf16.msra.mxu1 %v9067_v39  ;;  %v11050_v27 = vsub.f32 %v490_v9, %v2751_v16  ;;  %v11059_v39 = vpack.c.bf16 %v2743_v6, %v2739_v5  ;;  %v2831_v29 = vand.u32 4294901760, %v11043_v52 }
 0x169   : > { %1932 = vmatmul.mubr.f32.vlgmr.msra.gmra.mrb[2].mxu0 %v10825_v38  ;;  %9070 = vmatprep.subr.bf16.mxu1 %v9069_v32  ;;  %v11078_v6 = vpack.c.bf16 %v2745_v47, %v2741_v44  ;;  %v9095_v22 = vpack.c.bf16 %v1238_v14, %v1226_v13  ;;  %v2208_v13 = vand.u32 4294901760, %v488_v1  ;;  %v11192_v14 = vld [vmem:[#allocation9 + $0x100] sm:$0xff] }
 0x16a   : > { %9132 = vmatpush1.bf16.msra.mxu0 %v10902_v49  ;;  %2010 = vmatprep.mubr.f32.mxu0 %v13157_v11  ;;  %v1240_v58 = vand.u32 4294901760, %v1239_v23  ;;  %v2837_v23 = vand.u32 4294901760, %v11037_v10  ;;  %v2861_v5 = vand.u32 4294901760, %v11050_v27 }
 0x16b   : > { %9134 = vmatprep.subr.bf16.mxu0 %v10904_v50 }
 0x16c   : > { %v9071_v18 = vpack.c.bf16 %v1240_v58, %v1228_v33  ;;  %v2843_v33 = vand.u32 4294901760, %v11045_v53  ;;  %v2826_v58 = vsub.f32 %v11035_v48, %v2825_v28 }
 0x16e   : > { %9136 = vmatpush1.bf16.msra.mxu0 %v10923_v57  ;;  %9072 = vmatpush1.bf16.msra.mxu1 %v9071_v18  ;;  %v2844_v8 = vsub.f32 %v11045_v53, %v2843_v33  ;;  %v2827_v32 = vand.u32 4294901760, %v2826_v58 }
 0x16f   : > { %9138 = vmatprep.subr.bf16.mxu0 %v9137_v15  ;;  %v2747_v15 = vand.u32 4294901760, %v477_v31  ;;  %9074 = vmatprep.subr.bf16.mxu1 %v9073_v36  ;;  %v2862_v36 = vsub.f32 %v11050_v27, %v2861_v5 }
 0x170   : > { %v2845_v47 = vand.u32 4294901760, %v2844_v8 }
 0x171   : > { %2014 = vmatmul.mubr.f32.vlgmr.msra.gmra.mrb[2].mxu0 %v10836_v46  ;;  %v11048_v26 = vsub.f32 %v477_v31, %v2747_v15  ;;  %1300 = vmatmul.mubr.f32.vlgmr.msra.gmra.mrb[0].mxu1 %v10811_v30  ;;  %v11080_v7 = vpack.c.bf16 %v2751_v16, %v2747_v15 }
 0x172   : > { %9140 = vmatpush1.bf16.msra.mxu0 %v9139_v40  ;;  %2108 = vmatprep.mubr.f32.mxu0 %v13157_v11  ;;  %v11065_v40 = vsub.f32 %v489_v19, %v2753_v21 }
 0x173   : > { %9142 = vmatprep.subr.bf16.mxu0 %v9141_v59  ;;  %9076 = vmatpush1.bf16.msra.mxu1 %v9075_v42  ;;  %v2849_v59 = vand.u32 4294901760, %v11048_v26  ;;  %v2863_v42 = vand.u32 4294901760, %v2862_v36  ;;  %v9221_v8 = vpack.c.bf16 %v11050_v27, %v11048_v26  ;;  %v9235_v36 = vpack.c.bf16 %v2843_v33, %v2831_v29 }
 0x174   : > { %1386 = vmatprep.mubr.f32.mxu1 %v13157_v11  ;;  %9078 = vmatprep.subr.bf16.mxu1 %v9077_v43  ;;  %v2867_v9 = vand.u32 4294901760, %v11065_v40 }
 0x176   : > { %9144 = vmatpush1.bf16.msra.mxu0 %v9143_v37  ;;  %v11103_v37 = vpack.c.bf16 %v2753_v21, %v2749_v20  ;;  %v2868_v16 = vsub.f32 %v11065_v40, %v2867_v9 }
 0x177   : > { %9146 = vmatprep.subr.bf16.mxu0 %v10883_v41  ;;  %v11063_v41 = vsub.f32 %v476_v17, %v2749_v20  ;;  %9080 = vmatpush1.bf16.msra.mxu1 %v9079_v25 }
 0x178   : > { %9082 = vmatprep.subr.bf16.mxu1 %v10947_v35  ;;  %v2869_v21 = vand.u32 4294901760, %v2868_v16 }
 0x179   : > { %2110 = vmatmul.mubr.f32.vlgmr.msra.gmra.mrb[2].mxu0 %v10811_v30  ;;  %v2855_v31 = vand.u32 4294901760, %v11063_v41 }
 0x17a   : > { %9148 = vmatpush1.bf16.msra.mxu0 %v10902_v49  ;;  %2188 = vmatprep.mubr.f32.mxu0 %v13157_v11  ;;  %v2838_v49 = vsub.f32 %v11037_v10, %v2837_v23 }
 0x17b   : > { %9150 = vmatprep.subr.bf16.mxu0 %v10904_v50  ;;  %v2832_v50 = vsub.f32 %v11043_v52, %v2831_v29  ;;  %1389 = vmatmul.mubr.f32.vlgmr.msra.gmra.mrb[0].mxu1 %v10825_v38  ;;  %v2856_v15 = vsub.f32 %v11063_v41, %v2855_v31 }
 0x17c   : > { %v2839_v18 = vand.u32 4294901760, %v2838_v49  ;;  %9084 = vmatpush1.bf16.msra.mxu1 %v10955_v51  ;;  %1467 = vmatprep.mubr.f32.mxu1 %v13157_v11  ;;  %v9217_v49 = vpack.c.bf16 %v11037_v10, %v11035_v48  ;;  %v11150_v48 = vld [vmem:[#allocation9 + $0x130] sm:$0xff]  ;;  %v9239_v10 = vpack.c.bf16 %v2867_v9, %v2855_v31 }
 0x17d   : > { %9086 = vmatprep.subr.bf16.mxu1 %v10959_v55  ;;  %v2833_v44 = vand.u32 4294901760, %v2832_v50  ;;  %v2857_v20 = vand.u32 4294901760, %v2856_v15  ;;  %v9219_v50 = vpack.c.bf16 %v11045_v53, %v11043_v52  ;;  %v493_v53 = vld [vmem:[#allocation9 + $0x198] sm:$0xff]  ;;  %v3832_v27 = vand.u32 4294901760, %v11150_v48 }
 0x17e   : > { %9152 = vmatpush1.bf16.msra.mxu0 %v10923_v57  ;;  %v2850_v57 = vsub.f32 %v11048_v26, %v2849_v59  ;;  %v9209_v17 = vpack.c.bf16 %v2839_v18, %v2827_v32  ;;  %v9223_v32 = vpack.c.bf16 %v11065_v40, %v11063_v41  ;;  %v9233_v18 = vpack.c.bf16 %v2837_v23, %v2825_v28 }
 0x17f   : > { %9202 = vmatprep.subr.bf16.mxu0 %v11059_v39  ;;  %v9211_v43 = vpack.c.bf16 %v2845_v47, %v2833_v44  ;;  %v9215_v58 = vpack.c.bf16 %v2869_v21, %v2857_v20  ;;  %v9237_v44 = vpack.c.bf16 %v2861_v5, %v2849_v59  ;;  %v467_v47 = vld [vmem:[#allocation9 + $0xc8] sm:$0xff]  ;;  %v3835_v28 = vand.u32 4294901760, %v493_v53 }
 0x180   : > { %v2851_v19 = vand.u32 4294901760, %v2850_v57  ;;  %9088 = vmatpush1.bf16.msra.mxu1 %v10974_v2  ;;  %v454_v57 = vld [vmem:[#allocation9 + $0x60] sm:$0xff]  ;;  %v3829_v52 = vand.u32 4294901760, %v467_v47  ;;  %v9089_v23 = vpack.c.bf16 %v1208_v62, %v1196_v61  ;;  %v9091_v40 = vpack.c.bf16 %v1214_v0, %v1202_v63  ;;  %v11183_v61 = vld [vmem:[#allocation9 + $0x30] sm:$0xff]  ;;  %v11194_v59 = vld [vmem:[#allocation9 + $0x168] sm:$0xff] }
 0x181   : > { %2190 = vmatmul.mubr.f32.vlgmr.msra.gmra.mrb[2].mxu0 %v10811_v30  ;;  %v3826_v15 = vand.u32 4294901760, %v454_v57  ;;  %v11172_v29 = vsub.f32 %v11150_v48, %v3832_v27  ;;  %v11186_v62 = vsub.f32 %v493_v53, %v3835_v28  ;;  %v2196_v63 = vand.u32 4294901760, %v449_v24 }
 0x182   : > { %9204 = vmatpush1.bf16.msra.mxu0 %v11078_v6  ;;  %2811 = vmatprep.mubr.f32.mxu0 %v13157_v11  ;;  %v9213_v25 = vpack.c.bf16 %v2863_v42, %v2851_v19  ;;  %v11164_v41 = vsub.f32 %v467_v47, %v3829_v52  ;;  %v2200_v0 = vand.u32 4294901760, %v462_v54  ;;  %v2198_v34 = vand.u32 4294901760, %v11183_v61 }
 0x183   : > { %9206 = vmatprep.subr.bf16.mxu0 %v11080_v7  ;;  %1471 = vmatmul.mubr.f32.vlgmr.msra.gmra.mrb[0].mxu1 %v10836_v46  ;;  %v11157_v26 = vsub.f32 %v454_v57, %v3826_v15  ;;  %v11197_v5 = vpack.c.bf16 %v3829_v52, %v3826_v15  ;;  %v11199_v31 = vsub.f32 %v449_v24, %v2196_v63  ;;  %v2206_v19 = vand.u32 4294901760, %v11192_v14 }
 0x184   : > { %1565 = vmatprep.mubr.f32.mxu1 %v13157_v11  ;;  %9090 = vmatprep.subr.bf16.mxu1 %v9089_v23  ;;  %v3914_v3 = vand.u32 4294901760, %v11164_v41  ;;  %v11201_v9 = vsub.f32 %v462_v54, %v2200_v0  ;;  %v11205_v16 = vsub.f32 %v11183_v61, %v2198_v34  ;;  %v3928_v42 = vand.u32 4294901760, %v11186_v62 }
 0x185   : > { %v3907_v33 = vand.u32 4294901760, %v11157_v26  ;;  %9092 = vmatpush1.bf16.msra.mxu1 %v9091_v40  ;;  %v2210_v20 = vand.u32 4294901760, %v11194_v59  ;;  %v11264_v53 = vpack.c.bf16 %v2208_v13, %v2204_v12 }
 0x186   : > { %9208 = vmatpush1.bf16.msra.mxu0 %v11103_v37  ;;  %9094 = vmatprep.subr.bf16.mxu1 %v9093_v45 }
 0x187   : > { %9210 = vmatprep.subr.bf16.mxu0 %v9209_v17  ;;  %v3908_v21 = vsub.f32 %v11157_v26, %v3907_v33 }
 0x189   : > { %2817 = vmatmul.mubr.f32.vlgmr.msra.gmra.mrb[4].mxu0 %v10844_v60  ;;  %9096 = vmatpush1.bf16.msra.mxu1 %v9095_v22  ;;  %v3909_v15 = vand.u32 4294901760, %v3908_v21 }
 0x18a   : > { %9212 = vmatpush1.bf16.msra.mxu0 %v9211_v43  ;;  %2927 = vmatprep.mubr.f32.mxu0 %v13157_v11  ;;  %v11214_v43 = vsub.f32 %v488_v1, %v2208_v13 }
 0x18b   : > { %9214 = vmatprep.subr.bf16.mxu0 %v9213_v25  ;;  %9098 = vmatprep.subr.bf16.mxu1 %v10947_v35  ;;  %v3915_v25 = vsub.f32 %v11164_v41, %v3914_v3  ;;  %v2294_v35 = vand.u32 4294901760, %v11201_v9 }
 0x18c   : > { %1567 = vmatmul.mubr.f32.vlgmr.msra.gmra.mrb[0].mxu1 %v10811_v30  ;;  %v2318_v47 = vand.u32 4294901760, %v11214_v43 }
 0x18d   : > { %9100 = vmatpush1.bf16.msra.mxu1 %v10955_v51  ;;  %1645 = vmatprep.mubr.f32.mxu1 %v13157_v11 }
 0x18e   : > { %9216 = vmatpush1.bf16.msra.mxu0 %v9215_v58  ;;  %v2282_v58 = vand.u32 4294901760, %v11199_v31  ;;  %9102 = vmatprep.subr.bf16.mxu1 %v10959_v55  ;;  %v3916_v55 = vand.u32 4294901760, %v3915_v25  ;;  %v2319_v24 = vsub.f32 %v11214_v43, %v2318_v47  ;;  %v9310_v25 = vpack.c.bf16 %v11164_v41, %v11157_v26 }
 0x18f   : > { %9218 = vmatprep.subr.bf16.mxu0 %v9217_v49  ;;  %v10407_v49 = vmov 0.0|0.0  }
 0x190   : > { %v2283_v51 = vsub.f32 %v11199_v31, %v2282_v58  ;;  %v9304_v54 = vpack.c.bf16 %v3916_v55, %v3909_v15  ;;  %v2320_v13 = vand.u32 4294901760, %v2319_v24  ;;  %v9313_v15 = vpack.c.bf16 %v11186_v62, %v11172_v29 }
 0x191   : > { %2929 = vmatmul.mubr.f32.vlgmr.msra.gmra.mrb[4].mxu0 %v10811_v30  ;;  %9104 = vmatpush1.bf16.msra.mxu1 %v10974_v2  ;;  %v9185_v41 = vpack.c.bf16 %v2294_v35, %v2282_v58  ;;  %v479_v58 = vld [vmem:[#allocation9 + $0x128] sm:$0xff] }
 0x192   : > { %9220 = vmatpush1.bf16.msra.mxu0 %v9219_v50  ;;  %3015 = vmatprep.mubr.f32.mxu0 %v13157_v11  ;;  %v11227_v50 = vpack.c.bf16 %v3835_v28, %v3832_v27  ;;  %v2284_v45 = vand.u32 4294901760, %v2283_v51 }
 0x193   : > { %9222 = vmatprep.subr.bf16.mxu0 %v9221_v8  ;;  %v11235_v8 = vsub.f32 %v11192_v14, %v2206_v19 }
 0x194   : > { %1647 = vmatmul.mubr.f32.vlgmr.msra.gmra.mrb[0].mxu1 %v10811_v30 }
 0x195   : > { %v2312_v23 = vand.u32 4294901760, %v11235_v8  ;;  %2268 = vmatprep.mubr.f32.mxu1 %v13157_v11 }
 0x196   : > { %9224 = vmatpush1.bf16.msra.mxu0 %v9223_v32  ;;  %v11238_v32 = vsub.f32 %v11194_v59, %v2210_v20 }
 0x197   : > { %9226 = vmatprep.subr.bf16.mxu0 %v11059_v39 }
 0x198   : > { %v2324_v40 = vand.u32 4294901760, %v11238_v32 }
 0x199   : > { %3018 = vmatmul.mubr.f32.vlgmr.msra.gmra.mrb[4].mxu0 %v10825_v38 }
 0x19a   : > { %9228 = vmatpush1.bf16.msra.mxu0 %v11078_v6  ;;  %3096 = vmatprep.mubr.f32.mxu0 %v13157_v11  ;;  %v2325_v1 = vsub.f32 %v11238_v32, %v2324_v40 }
 0x19b   : > { %9230 = vmatprep.subr.bf16.mxu0 %v11080_v7 }
 0x19e   : > { %9232 = vmatpush1.bf16.msra.mxu0 %v11103_v37 }
 0x19f   : > { %9234 = vmatprep.subr.bf16.mxu0 %v9233_v18  ;;  %v2288_v18 = vand.u32 4294901760, %v11205_v16 }
 0x1a1   : > { %3100 = vmatmul.mubr.f32.vlgmr.msra.gmra.mrb[4].mxu0 %v10836_v46  ;;  %v2289_v27 = vsub.f32 %v11205_v16, %v2288_v18 }
 0x1a2   : > { %9236 = vmatpush1.bf16.msra.mxu0 %v9235_v36  ;;  %3194 = vmatprep.mubr.f32.mxu0 %v13157_v11  ;;  %v2295_v36 = vsub.f32 %v11201_v9, %v2294_v35  ;;  %v492_v35 = vld [vmem:[#allocation9 + $0x190] sm:$0xff] }
 0x1a3   : > { %9238 = vmatprep.subr.bf16.mxu0 %v9237_v44 }
 0x1a4   : > { %v2296_v22 = vand.u32 4294901760, %v2295_v36  ;;  %v9169_v36 = vpack.c.bf16 %v11201_v9, %v11199_v31 }
 0x1a6   : > { %9240 = vmatpush1.bf16.msra.mxu0 %v9239_v10  ;;  %v3929_v10 = vsub.f32 %v11186_v62, %v3928_v42  ;;  %v466_v62 = vld [vmem:[#allocation9 + $0xc0] sm:$0xff] }
 0x1a7   : > { %9242 = vmatprep.subr.bf16.mxu0 %v11059_v39  ;;  %v461_v39 = vld [vmem:[#allocation9 + $0x98] sm:$0xff]  ;;  %v3286_v9 = vand.u32 4294901760, %v466_v62 }
 0x1a8   : > { %v2202_v4 = vand.u32 4294901760, %v461_v39 }
 0x1a9   : > { %3196 = vmatmul.mubr.f32.vlgmr.msra.gmra.mrb[4].mxu0 %v10811_v30 }
 0x1aa   : > { %9244 = vmatpush1.bf16.msra.mxu0 %v11078_v6  ;;  %3274 = vmatprep.mubr.f32.mxu0 %v13157_v11  ;;  %v3921_v6 = vand.u32 4294901760, %v11172_v29  ;;  %v11207_v17 = vsub.f32 %v461_v39, %v2202_v4  ;;  %v11262_v52 = vpack.c.bf16 %v2202_v4, %v2198_v34  ;;  %v2290_v39 = vand.u32 4294901760, %v2289_v27 }
 0x1ab   : > { %9246 = vmatprep.subr.bf16.mxu0 %v11080_v7  ;;  %v11212_v7 = vsub.f32 %v475_v56, %v2204_v12  ;;  %v2313_v56 = vsub.f32 %v11235_v8, %v2312_v23  ;;  %v9161_v4 = vpack.c.bf16 %v2296_v22, %v2284_v45  ;;  %v9322_v27 = vpack.c.bf16 %v3914_v3, %v3907_v33  ;;  %v453_v33 = vld [vmem:[#allocation9 + $0x58] sm:$0xff]  ;;  %v452_v3 = vld [vmem:[#allocation9 + $0x50] sm:$0xff] }
 0x1ac   : > { %v2300_v57 = vand.u32 4294901760, %v11207_v17  ;;  %v3922_v48 = vsub.f32 %v11172_v29, %v3921_v6  ;;  %v9171_v55 = vpack.c.bf16 %v11207_v17, %v11205_v16  ;;  %v9325_v26 = vpack.c.bf16 %v3928_v42, %v3921_v6  ;;  %v465_v42 = vld [vmem:[#allocation9 + $0xb8] sm:$0xff] }
 0x1ad   : > { %v2306_v44 = vand.u32 4294901760, %v11212_v7  ;;  %v3282_v6 = vand.u32 4294901760, %v453_v33  ;;  %v9191_v16 = vpack.c.bf16 %v2324_v40, %v2312_v23 }
 0x1ae   : > { %9248 = vmatpush1.bf16.msra.mxu0 %v11103_v37  ;;  %v11230_v37 = vpack.c.bf16 %v2200_v0, %v2196_v63  ;;  %v2301_v28 = vsub.f32 %v11207_v17, %v2300_v57  ;;  %v3923_v61 = vand.u32 4294901760, %v3922_v48  ;;  %v3930_v63 = vand.u32 4294901760, %v3929_v10 }
 0x1af   : > { %9297 = vmatprep.subr.bf16.mxu0 %v10407_v49  ;;  %v2307_v2 = vsub.f32 %v11212_v7, %v2306_v44  ;;  %v11285_v0 = vpack.c.bf16 %v2210_v20, %v2206_v19  ;;  %v2314_v19 = vand.u32 4294901760, %v2313_v56  ;;  %v2326_v20 = vand.u32 4294901760, %v2325_v1 }
 0x1b0   : > { %9154 = vmatprep.subr.bf16.mxu1 %v11230_v37  ;;  %v2302_v34 = vand.u32 4294901760, %v2301_v28  ;;  %v9307_v14 = vpack.c.bf16 %v3930_v63, %v3923_v61  ;;  %v9173_v48 = vpack.c.bf16 %v11214_v43, %v11212_v7  ;;  %v9175_v10 = vpack.c.bf16 %v11238_v32, %v11235_v8  ;;  %v491_v28 = vld [vmem:[#allocation9 + $0x188] sm:$0xff] }
 0x1b1   : > { %3276 = vmatmul.mubr.f32.vlgmr.msra.gmra.mrb[4].mxu0 %v10811_v30  ;;  %9156 = vmatpush1.bf16.msra.mxu1 %v11262_v52  ;;  %v2308_v12 = vand.u32 4294901760, %v2307_v2  ;;  %v9167_v51 = vpack.c.bf16 %v2326_v20, %v2314_v19  ;;  %v9187_v29 = vpack.c.bf16 %v2300_v57, %v2288_v18  ;;  %v9189_v31 = vpack.c.bf16 %v2318_v47, %v2306_v44  ;;  %v478_v47 = vld [vmem:[#allocation9 + $0x120] sm:$0xff] }
 0x1b2   : > { %9299 = vmatpush3.bf16.msra.mxu0 %v11197_v5  ;;  %8951 = vmatprep.mubr.msk.f32.mxu0 %vm10408_vm2, %v13157_v11  ;;  %v9163_v59 = vpack.c.bf16 %v2302_v34, %v2290_v39  ;;  %v3284_v17 = vand.u32 4294901760, %v452_v3  ;;  %v3288_v7 = vand.u32 4294901760, %v465_v42  ;;  %v11370_v43 = vsub.f32 %v453_v33, %v3282_v6 }
 0x1b3   : > { %9300 = vmatprep.subr.bf16.mxu0 %v10407_v49  ;;  %9158 = vmatprep.subr.bf16.mxu1 %v11264_v53  ;;  %v9165_v21 = vpack.c.bf16 %v2320_v13, %v2308_v12  ;;  %v11372_v18 = vsub.f32 %v466_v62, %v3286_v9  ;;  %v3290_v57 = vand.u32 4294901760, %v479_v58  ;;  %v3294_v44 = vand.u32 4294901760, %v492_v35 }
 0x1b4   : > { %v11376_v8 = vsub.f32 %v452_v3, %v3284_v17  ;;  %v3292_v32 = vand.u32 4294901760, %v478_v47  ;;  %v3296_v23 = vand.u32 4294901760, %v491_v28  ;;  %v11389_v2 = vpack.c.bf16 %v3286_v9, %v3282_v6 }
 0x1b5   : > { %9160 = vmatpush1.bf16.msra.mxu1 %v11285_v0  ;;  %v11382_v40 = vsub.f32 %v479_v58, %v3290_v57  ;;  %v11384_v45 = vsub.f32 %v492_v35, %v3294_v44  ;;  %v3380_v22 = vand.u32 4294901760, %v11372_v18  ;;  %v11410_v34 = vpack.c.bf16 %v3288_v7, %v3284_v17 }
 0x1b6   : > { %9302 = vmatpush3.bf16.msra.mxu0 %v11227_v50  ;;  %9162 = vmatprep.subr.bf16.mxu1 %v9161_v4  ;;  %v11393_v24 = vsub.f32 %v478_v47, %v3292_v32  ;;  %v11412_v56 = vpack.c.bf16 %v3294_v44, %v3290_v57  ;;  %v9255_v20 = vpack.c.bf16 %v3296_v23, %v3292_v32 }
 0x1b7   : > { %9303 = vmatprep.subr.bf16.mxu0 %v10407_v49  ;;  %v3392_v63 = vand.u32 4294901760, %v11382_v40  ;;  %v3404_v39 = vand.u32 4294901760, %v11384_v45  ;;  %v9269_v62 = vpack.c.bf16 %v11384_v45, %v11382_v40 }
 0x1b8   : > { %2274 = vmatmul.mubr.f32.vlgmr.msra.gmra.mrb[2].mxu1 %v10844_v60  ;;  %v3398_v4 = vand.u32 4294901760, %v11393_v24 }
 0x1b9   : > { %8952 = vmatmul.mubr.f32.vlgmr.msra.gmra.mrb[6].mxu0 %v10844_v60  ;;  %9164 = vmatpush1.bf16.msra.mxu1 %v9163_v59  ;;  %v3393_v59 = vsub.f32 %v11382_v40, %v3392_v63  ;;  %v3405_v19 = vsub.f32 %v11384_v45, %v3404_v39  ;;  %v9285_v6 = vpack.c.bf16 %v3404_v39, %v3392_v63 }
 0x1ba   : > { %9305 = vmatpush3.bf16.msra.mxu0 %v9304_v54  ;;  %8962 = vmatprep.mubr.msk.f32.mxu0 %vm10408_vm2, %v13157_v11 }
 0x1bb   : > { %9306 = vmatprep.subr.bf16.mxu0 %v10407_v49  ;;  %2384 = vmatprep.mubr.f32.mxu1 %v13157_v11 }
 0x1bc   : > { %9166 = vmatprep.subr.bf16.mxu1 %v9165_v21 }
 0x1bd   : > { %9168 = vmatpush1.bf16.msra.mxu1 %v9167_v51 }
 0x1be   : > { %9308 = vmatpush3.bf16.msra.mxu0 %v9307_v14  ;;  %9170 = vmatprep.subr.bf16.mxu1 %v9169_v36 }
 0x1bf   : > { %9309 = vmatprep.subr.bf16.mxu0 %v10407_v49 }
 0x1c0   : > { %2386 = vmatmul.mubr.f32.vlgmr.msra.gmra.mrb[2].mxu1 %v10811_v30 }
 0x1c1   : > { %8963 = vmatmul.mubr.f32.vlgmr.msra.gmra.mrb[6].mxu0 %v10811_v30  ;;  %9172 = vmatpush1.bf16.msra.mxu1 %v9171_v55  ;;  %v3406_v55 = vand.u32 4294901760, %v3405_v19 }
 0x1c2   : > { %9311 = vmatpush3.bf16.msra.mxu0 %v9310_v25  ;;  %8973 = vmatprep.mubr.msk.f32.mxu0 %vm10408_vm2, %v13157_v11  ;;  %v3399_v25 = vsub.f32 %v11393_v24, %v3398_v4 }
 0x1c3   : > { %9312 = vmatprep.subr.bf16.mxu0 %v10407_v49  ;;  %2472 = vmatprep.mubr.f32.mxu1 %v13157_v11 }
 0x1c4   : > { %9174 = vmatprep.subr.bf16.mxu1 %v9173_v48 }
 0x1c5   : > { %9176 = vmatpush1.bf16.msra.mxu1 %v9175_v10  ;;  %v3400_v10 = vand.u32 4294901760, %v3399_v25 }
 0x1c6   : > { %9314 = vmatpush3.bf16.msra.mxu0 %v9313_v15  ;;  %9178 = vmatprep.subr.bf16.mxu1 %v11230_v37  ;;  %v3394_v15 = vand.u32 4294901760, %v3393_v59 }
 0x1c7   : > { %9315 = vmatprep.subr.bf16.mxu0 %v10407_v49 }
 0x1c8   : > { %2475 = vmatmul.mubr.f32.vlgmr.msra.gmra.mrb[2].mxu1 %v10825_v38 }
 0x1c9   : > { %8974 = vmatmul.mubr.f32.vlgmr.msra.gmra.mrb[6].mxu0 %v10825_v38  ;;  %9180 = vmatpush1.bf16.msra.mxu1 %v11262_v52 }
 0x1ca   : > { %9317 = vmatpush3.bf16.msra.mxu0 %v11197_v5  ;;  %8984 = vmatprep.mubr.msk.f32.mxu0 %vm10408_vm2, %v13157_v11 }
 0x1cb   : > { %9318 = vmatprep.subr.bf16.mxu0 %v10407_v49  ;;  %2553 = vmatprep.mubr.f32.mxu1 %v13157_v11 }
 0x1cc   : > { %9182 = vmatprep.subr.bf16.mxu1 %v11264_v53 }
 0x1cd   : > { %9184 = vmatpush1.bf16.msra.mxu1 %v11285_v0 }
 0x1ce   : > { %9320 = vmatpush3.bf16.msra.mxu0 %v11227_v50  ;;  %9186 = vmatprep.subr.bf16.mxu1 %v9185_v41 }
 0x1cf   : > { %9321 = vmatprep.subr.bf16.mxu0 %v10407_v49 }
 0x1d0   : > { %2557 = vmatmul.mubr.f32.vlgmr.msra.gmra.mrb[2].mxu1 %v10836_v46 }
 0x1d1   : > { %8985 = vmatmul.mubr.f32.vlgmr.msra.gmra.mrb[6].mxu0 %v10836_v46  ;;  %9188 = vmatpush1.bf16.msra.mxu1 %v9187_v29  ;;  %v9265_v29 = vpack.c.bf16 %v11372_v18, %v11370_v43 }
 0x1d2   : > { %9323 = vmatpush3.bf16.msra.mxu0 %v9322_v27  ;;  %8995 = vmatprep.mubr.msk.f32.mxu0 %vm10408_vm2, %v13157_v11 }
 0x1d3   : > { %9324 = vmatprep.subr.bf16.mxu0 %v10407_v49  ;;  %9190 = vmatprep.subr.bf16.mxu1 %v9189_v31 }
 0x1d4   : > { %2651 = vmatprep.mubr.f32.mxu1 %v13157_v11 }
 0x1d5   : > { %9192 = vmatpush1.bf16.msra.mxu1 %v9191_v16 }
 0x1d6   : > { %9326 = vmatpush3.bf16.msra.mxu0 %v9325_v26  ;;  %9194 = vmatprep.subr.bf16.mxu1 %v11230_v37  ;;  %v3374_v37 = vand.u32 4294901760, %v11376_v8  ;;  %v9261_v26 = vpack.c.bf16 %v3406_v55, %v3394_v15 }
 0x1d7   : > { %9327 = vmatprep.subr.bf16.mxu0 %v10407_v49 }
 0x1d8   : > { %2653 = vmatmul.mubr.f32.vlgmr.msra.gmra.mrb[2].mxu1 %v10811_v30 }
 0x1d9   : > { %8996 = vmatmul.mubr.f32.vlgmr.msra.gmra.mrb[6].mxu0 %v10811_v30  ;;  %9196 = vmatpush1.bf16.msra.mxu1 %v11262_v52  ;;  %v3381_v52 = vsub.f32 %v11372_v18, %v3380_v22  ;;  %v11474_v18 = vld [vmem:[#allocation10 + $0x8] sm:$0x1f] }
 0x1da   : > { %9329 = vmatpush3.bf16.msra.mxu0 %v11197_v5  ;;  %9006 = vmatprep.mubr.msk.f32.mxu0 %vm10408_vm2, %v13157_v11  ;;  %v11378_v5 = vsub.f32 %v465_v42, %v3288_v7  ;;  %v10409_v42 = vmov 0   ;;  %v498_v7 = vlaneseq }
 0x1db   : > { %9330 = vmatprep.subr.bf16.mxu0 %v10407_v49  ;;  %v3368_v49 = vand.u32 4294901760, %v11370_v43  ;;  %9198 = vmatprep.subr.bf16.mxu1 %v11264_v53  ;;  %v3375_v53 = vsub.f32 %v11376_v8, %v3374_v37  ;;  %v3382_v14 = vand.u32 4294901760, %v3381_v52 }
 0x1dc   : > { %v3386_v54 = vand.u32 4294901760, %v11378_v5  ;;  %2731 = vmatprep.mubr.f32.mxu1 %v13157_v11  ;;  %v9267_v33 = vpack.c.bf16 %v11378_v5, %v11376_v8  ;;  %10001 = vset.pattern.permute.xlu0 %v10409_v42  ;;  %vm11682_vm8 = vcmp.lt.s32.totalorder %v498_v7, 512 }
 0x1dd   : > { %v3369_v61 = vsub.f32 %v11370_v43, %v3368_v49  ;;  %9200 = vmatpush1.bf16.msra.mxu1 %v11285_v0  ;;  %v3376_v0 = vand.u32 4294901760, %v3375_v53  ;;  %v9281_v3 = vpack.c.bf16 %v3380_v22, %v3368_v49  ;;  %v11471_v43 = vshrl.u32 %v498_v7, 7  ;;  %v11699_v7 = vld [vmem:[#allocation16] sm:$0xff] }
 0x1de   : > { %9332 = vmatpush3.bf16.msra.mxu0 %v11227_v50  ;;  %v11395_v50 = vsub.f32 %v491_v28, %v3296_v23  ;;  %v3387_v1 = vsub.f32 %v11378_v5, %v3386_v54  ;;  %9250 = vmatprep.subr.bf16.mxu1 %v11389_v2  ;;  %v9283_v31 = vpack.c.bf16 %v3386_v54, %v3374_v37 }
 0x1df   : > { %v3370_v13 = vand.u32 4294901760, %v3369_v61  ;;  %v11492_v49 = vsub.s32 2, %v11471_v43  ;;  %v11495_v22 = vsub.s32 3, %v11471_v43 }
 0x1e0   : > { %v3410_v12 = vand.u32 4294901760, %v11395_v50  ;;  %2733 = vmatmul.mubr.f32.vlgmr.msra.gmra.mrb[2].mxu1 %v10811_v30  ;;  %v3388_v21 = vand.u32 4294901760, %v3387_v1 }
 0x1e1   : > { %9007 = vmatmul.mubr.f32.vlgmr.msra.gmra.mrb[6].mxu0 %v10811_v30  ;;  %9252 = vmatpush1.bf16.msra.mxu1 %v11410_v34  ;;  %v9257_v36 = vpack.c.bf16 %v3382_v14, %v3370_v13  ;;  %13308 = vst [vmem:[#allocation28_spill] sm:$0xff] %v11492_v49  ;;  %13309 = vst [vmem:[#allocation29_spill] sm:$0xff] %v11495_v22 }
 0x1e2   : > { %5529 = vmatprep.mubr.f32.mxu0 %v13157_v11  ;;  %3354 = vmatprep.mubr.f32.mxu1 %v13157_v11  ;;  %v3411_v51 = vsub.f32 %v11395_v50, %v3410_v12  ;;  %v9259_v48 = vpack.c.bf16 %v3388_v21, %v3376_v0  ;;  %v9287_v9 = vpack.c.bf16 %v3410_v12, %v3398_v4 }
 0x1e3   : > { %9254 = vmatprep.subr.bf16.mxu1 %v11412_v56 }
 0x1e4   : > { %v3412_v27 = vand.u32 4294901760, %v3411_v51 }
 0x1e5   : > { %9256 = vmatpush1.bf16.msra.mxu1 %v9255_v20 }
 0x1e6   : > { %9258 = vmatprep.subr.bf16.mxu1 %v9257_v36  ;;  %v9263_v41 = vpack.c.bf16 %v3412_v27, %v3400_v10  ;;  %v4449_v36 = vld [vmem:[#allocation7] sm:$0xff] }
 0x1e8   : > { %3360 = vmatmul.mubr.f32.vlgmr.msra.gmra.mrb[4].mxu1 %v10844_v60  ;;  %v9271_v60 = vpack.c.bf16 %v11395_v50, %v11393_v24  ;;  %v11498_v24 = vsub.s32 0, %v11471_v43  ;;  %v11501_v50 = vsub.s32 1, %v11471_v43 }
 0x1e9   : > { %9260 = vmatpush1.bf16.msra.mxu1 %v9259_v48  ;;  %3470 = vmatprep.mubr.f32.mxu1 %v13157_v11 }
 0x1ea   : > { %9262 = vmatprep.subr.bf16.mxu1 %v9261_v26  ;;  %v4453_v26 = vsel %vm4451_vm3, %v4449_v36, 0 }
 0x1ed   : > { %9264 = vmatpush1.bf16.msra.mxu1 %v9263_v41 }
 0x1ee   : > { %9266 = vmatprep.subr.bf16.mxu1 %v9265_v29 }
 0x1f0   : > { %3472 = vmatmul.mubr.f32.vlgmr.msra.gmra.mrb[4].mxu1 %v10811_v30 }
 0x1f1   : > { %9268 = vmatpush1.bf16.msra.mxu1 %v9267_v33  ;;  %3558 = vmatprep.mubr.f32.mxu1 %v13157_v11 }
 0x1f2   : > { %9270 = vmatprep.subr.bf16.mxu1 %v9269_v62  ;;  %v11507_v62 = vand.u32 4294901760, %v4453_v26 }
 0x1f5   : > { %9272 = vmatpush1.bf16.msra.mxu1 %v9271_v60  ;;  %v11510_v60 = vsub.f32 %v4453_v26, %v11507_v62 }
 0x1f6   : > { %9274 = vmatprep.subr.bf16.mxu1 %v11389_v2 }
 0x1f8   : > { %3561 = vmatmul.mubr.f32.vlgmr.msra.gmra.mrb[4].mxu1 %v10825_v38 }
 0x1f9   : > { %9276 = vmatpush1.bf16.msra.mxu1 %v11410_v34  ;;  %3639 = vmatprep.mubr.f32.mxu1 %v13157_v11 }
 0x1fa   : > { %9278 = vmatprep.subr.bf16.mxu1 %v11412_v56 }
 0x1fd   : > { %9280 = vmatpush1.bf16.msra.mxu1 %v9255_v20 }
 0x1fe   : > { %9282 = vmatprep.subr.bf16.mxu1 %v9281_v3  ;;  %v4377_v3 = vld [vmem:[#allocation13] sm:$0xf] }
 0x1ff   : > { %v4382_v42 = vrot.slane %v4377_v3, %v11498_v24 }
 0x200   : > { %3643 = vmatmul.mubr.f32.vlgmr.msra.gmra.mrb[4].mxu1 %v10836_v46 }
 0x201   : > { %9284 = vmatpush1.bf16.msra.mxu1 %v9283_v31  ;;  %3737 = vmatprep.mubr.f32.mxu1 %v13157_v11 }
 0x202   : > { %9286 = vmatprep.subr.bf16.mxu1 %v9285_v6  ;;  %v11513_v6 = vand.u32 4294901760, %v11510_v60 }
 0x205   : > { %9288 = vmatpush1.bf16.msra.mxu1 %v9287_v9 }
 0x206   : > { %9290 = vmatprep.subr.bf16.mxu1 %v11389_v2  ;;  %v4310_v2 = vld [vmem:[#allocation12] sm:$0xf] }
 0x207   : > { %v4315_v37 = vrot.slane %v4310_v2, %v11498_v24  ;;  %v4319_v54 = vrot.slane %v4310_v2, %v11501_v50  ;;  %v4323_v61 = vrot.slane %v4310_v2, %v11492_v49  ;;  %v4327_v52 = vrot.slane %v4310_v2, %v11495_v22 }
 0x208   : > { %3739 = vmatmul.mubr.f32.vlgmr.msra.gmra.mrb[4].mxu1 %v10811_v30  ;;  %v4390_v2 = vrot.slane %v4377_v3, %v11492_v49 }
 0x209   : > { %9292 = vmatpush1.bf16.msra.mxu1 %v11410_v34  ;;  %3817 = vmatprep.mubr.f32.mxu1 %v13157_v11 }
 0x20a   : > { %9294 = vmatprep.subr.bf16.mxu1 %v11412_v56 }
 0x20d   : > { %9296 = vmatpush1.bf16.msra.mxu1 %v9255_v20 }
 0x210   : > { %3819 = vmatmul.mubr.f32.vlgmr.msra.gmra.mrb[4].mxu1 %v10811_v30  ;;  %v13144_v30 = vsub.s32 4, %v11471_v43 }
 0x211   : > { %4521 = vmatprep.mubr.f32.mxu1 %v13157_v11 }
 0x212   : > { %v549_v57 = vrot.slane %v11474_v18, %v13144_v30 }
 0x224   : > { %v11458_v38 = vpop.f32.mrb[0].mxu0 }
 0x225   : > { %v11460_v46 = vpop.f32.mrb[1].mxu0 }
 0x254   : > { %v11462_v58 = vpop.f32.mrb[2].mxu0 }
 0x255   : > { %v11464_v35 = vpop.f32.mrb[3].mxu0 }
 0x267   : > { %v11479_v8 = vpop.f32.mrb[0].mxu1 }
 0x268   : > { %v11481_v5 = vpop.f32.mrb[1].mxu1 }
 0x284   : > { %v11466_v16 = vpop.f32.mrb[4].mxu0 }
 0x285   : > { %v11468_v17 = vpop.f32.mrb[5].mxu0 }
 0x2b3   : > { %v11483_v32 = vpop.f32.mrb[2].mxu1 }
 0x2b4   : > { %v4306_v44 = vpop.f32.mrb[6].mxu0  ;;  %13306 = vst [vmem:[#allocation26_spill] sm:$0xff] %v11483_v32  ;;  %v11485_v23 = vpop.f32.mrb[3].mxu1 }
 0x2b5   : > { %v9729_v47 = vadd.f32 %v4306_v44, %v549_v57  ;;  %v9008_v28 = vpop.f32.mrb[7].mxu0  ;;  %13307 = vst [vmem:[#allocation27_spill] sm:$0xff] %v11485_v23 }
 0x2b6   : > { %v4386_v28 = vrot.slane %v4377_v3, %v11501_v50 }
 0x2b7   : > { %4334 = vperm.xlu0 %10001, %v9729_v47  }
 0x2e3   : > { %v11487_v40 = vpop.f32.mrb[4].mxu1 }
 0x2e4   : > { %v11489_v45 = vpop.f32.mrb[5].mxu1 }
 0x336   : > { %v4335_v63 = vpop.permute.xlu0 %4334 }
 0x337   : > { %v4337_v39 = vadd.f32 %v4335_v63, %v4315_v37  ;;  %v4338_v34 = vadd.f32 %v4335_v63, %v4319_v54  ;;  %v4339_v56 = vadd.f32 %v4335_v63, %v4323_v61  ;;  %v4340_v53 = vadd.f32 %v4335_v63, %v4327_v52 }
 0x338   : > { %v4394_v52 = vrot.slane %v4377_v3, %v11495_v22 }
 0x339   : > { %v4345_v1 = vand.u32 2147483647, %v4337_v39  ;;  %v4346_v4 = vand.u32 2147483647, %v4338_v34  ;;  %v4347_v12 = vand.u32 2147483647, %v4339_v56 }
 0x33a   : > { %v4348_v13 = vand.u32 2147483647, %v4340_v53  ;;  %v4341_v57 = vmax.f32 %v4337_v39, 0.0  ;;  %v4342_v37 = vmax.f32 %v4338_v34, 0.0  ;;  %v4343_v63 = vmax.f32 %v4339_v56, 0.0 }
 0x33b   : > { %v4349_v14 = vsub.f32 0.0, %v4345_v1  ;;  %v4350_v59 = vsub.f32 0.0, %v4346_v4  ;;  %v4351_v19 = vsub.f32 0.0, %v4347_v12  ;;  %v4344_v12 = vmax.f32 %v4340_v53, 0.0 }
 0x33c   : > { %v4352_v20 = vsub.f32 0.0, %v4348_v13  ;;  %v4525_v39 = vsub.f32 %v11510_v60, %v11513_v6 }
 0x33d   : > { %v4353_v0 = vmul.f32 1.442695, %v4349_v14  ;;  %v4355_v21 = vmul.f32 1.442695, %v4350_v59  ;;  %v4357_v25 = vmul.f32 1.442695, %v4351_v19 }
 0x33e   : > { %v4359_v51 = vmul.f32 1.442695, %v4352_v20  ;;  %v11529_v53 = vand.u32 4294901760, %v4525_v39 }
 0x33f   : > { %10002 = vpow2.f32 %v4353_v0 }
 0x340   : > { %10004 = vpow2.f32 %v4355_v21 }
 0x341   : > { %10006 = vpow2.f32 %v4357_v25 }
 0x342   : > { %10008 = vpow2.f32 %v4359_v51 }
 0x349   : > { %v10003_v15 = vpop.eup %10002 }
 0x34a   : > { %v10005_v55 = vpop.eup %10004  ;;  %v4361_v48 = vadd.f32 1.0, %v10003_v15  ;;  %v494_v15 = vld [vmem:[#allocation10] sm:$0xff] }
 0x34b   : > { %v10007_v10 = vpop.eup %10006  ;;  %v4362_v27 = vadd.f32 1.0, %v10005_v55 }
 0x34c   : > { %v10009_v41 = vpop.eup %10008  ;;  %v4363_v29 = vadd.f32 1.0, %v10007_v10  ;;  %10010 = vlog2.f32 %v4361_v48 }
 0x34d   : > { %v4364_v33 = vadd.f32 1.0, %v10009_v41  ;;  %10012 = vlog2.f32 %v4362_v27  ;;  %v501_v41 = vrot.slane %v494_v15, %v11498_v24 }
 0x34e   : > { %10014 = vlog2.f32 %v4363_v29  ;;  %v4415_v29 = vld [vmem:[#allocation15] sm:$0xf] }
 0x34f   : > { %10016 = vlog2.f32 %v4364_v33  ;;  %v509_v33 = vrot.slane %v494_v15, %v11492_v49 }
 0x356   : > { %v10011_v31 = vpop.eup %10010 }
 0x357   : > { %v10013_v9 = vpop.eup %10012  ;;  %v4366_v44 = vmul.f32 0.6931472, %v10011_v31  ;;  %v505_v31 = vrot.slane %v494_v15, %v11501_v50 }
 0x358   : > { %v10015_v47 = vpop.eup %10014  ;;  %v4368_v54 = vmul.f32 0.6931472, %v10013_v9  ;;  %v513_v9 = vrot.slane %v494_v15, %v11495_v22 }
 0x359   : > { %v10017_v61 = vpop.eup %10016  ;;  %v4370_v1 = vmul.f32 0.6931472, %v10015_v47  ;;  %v4373_v4 = vadd.f32 %v4366_v44, %v4341_v57  ;;  %v4420_v44 = vrot.slane %v4415_v29, %v11498_v24 }
 0x35a   : > { %v4372_v13 = vmul.f32 0.6931472, %v10017_v61  ;;  %v4374_v14 = vadd.f32 %v4368_v54, %v4342_v37  ;;  %v4428_v37 = vrot.slane %v4415_v29, %v11492_v49  ;;  %v9718_v61 = vadd.f32 %v11460_v46, %v505_v31 }
 0x35b   : > { %v4375_v59 = vadd.f32 %v4370_v1, %v4343_v63  ;;  %v4399_v19 = vmul.f32 %v4382_v42, %v4373_v4  ;;  %v9720_v63 = vadd.f32 %v11481_v5, %v513_v9  ;;  %v4432_v1 = vrot.slane %v4415_v29, %v11495_v22 }
 0x35c   : > { %v4376_v20 = vadd.f32 %v4372_v13, %v4344_v12  ;;  %v4400_v0 = vmul.f32 %v4386_v28, %v4374_v14  ;;  %v9717_v28 = vadd.f32 %v11458_v38, %v501_v41  ;;  %v533_v4 = vrot.slane %v11474_v18, %v11498_v24 }
 0x35d   : > { %v11521_v21 = vmul.f32 %v4390_v2, %v4375_v59  ;;  %v4403_v34 = vmul.f32 1.442695, %v4399_v19  ;;  %v11523_v25 = vand.u32 4294901760, %v4399_v19  ;;  %v9719_v2 = vadd.f32 %v11479_v8, %v509_v33 }
 0x35e   : > { %v11525_v51 = vmul.f32 %v4394_v52, %v4376_v20  ;;  %v4405_v56 = vmul.f32 1.442695, %v4400_v0  ;;  %v11527_v36 = vand.u32 4294901760, %v4400_v0  ;;  %v4424_v52 = vrot.slane %v4415_v29, %v11501_v50 }
 0x35f   : > { %10018 = vpow2.f32 %v4403_v34  ;;  %v11532_v55 = vsub.f32 %v4399_v19, %v11523_v25  ;;  %v4407_v48 = vmul.f32 1.442695, %v11521_v21  ;;  %v541_v38 = vrot.slane %v11474_v18, %v11492_v49 }
 0x360   : > { %10020 = vpow2.f32 %v4405_v56  ;;  %4456 = vmatprep.subr.mxu1 %v11527_v36  ;;  %v11537_v10 = vsub.f32 %v4400_v0, %v11527_v36  ;;  %v4409_v27 = vmul.f32 1.442695, %v11525_v51  ;;  %v537_v8 = vrot.slane %v11474_v18, %v11501_v50 }
 0x361   : > { %4458 = vmatpush1.msra.mxu1 %v11523_v25  ;;  %v4541_v26 = vand.u32 4294901760, %v11532_v55  ;;  %10022 = vpow2.f32 %v4407_v48  ;;  %v545_v46 = vrot.slane %v11474_v18, %v11495_v22  ;;  %v4437_v14 = vmul.f32 %v9717_v28, %v4420_v44 }
 0x362   : > { %4527 = vmatmul.mubr.f32.vlgmr.msra.gmra.mrb[6].mxu1 %v11529_v53  ;;  %v4535_v3 = vand.u32 4294901760, %v11537_v10  ;;  %10024 = vpow2.f32 %v4409_v27  ;;  %v4439_v39 = vmul.f32 %v9719_v2, %v4428_v37  ;;  %v4438_v19 = vmul.f32 %v9718_v61, %v4424_v52  ;;  %v11617_v2 = vld [vmem:[#allocation2] sm:$0xf] }
 0x363   : > { %v4542_v42 = vsub.f32 %v11532_v55, %v4541_v26  ;;  %4607 = vmatprep.mubr.f32.mxu1 %v13157_v11  ;;  %v4440_v0 = vmul.f32 %v9720_v63, %v4432_v1  ;;  %v9725_v56 = vadd.f32 %v11466_v16, %v533_v4  ;;  %v9727_v18 = vadd.f32 %v11487_v40, %v541_v38 }
 0x364   : > { %v4536_v57 = vsub.f32 %v11537_v10, %v4535_v3  ;;  %v9726_v27 = vadd.f32 %v11468_v17, %v537_v8  ;;  %v4920_v17 = vand.u32 4294901760, %v11525_v51  ;;  %v4922_v40 = vand.u32 4294901760, %v11521_v21 }
 0x365   : > { %v4543_v47 = vand.u32 4294901760, %v4542_v42  ;;  %v5393_v52 = vrot.slane %v11617_v2, %v11501_v50 }
 0x366   : > { %v4537_v54 = vand.u32 4294901760, %v4536_v57  ;;  %v5005_v44 = vsub.f32 %v11521_v21, %v4922_v40 }
 0x368   : > { %4538 = vmatprep.subr.mxu1 %v4537_v54  ;;  %v5389_v54 = vrot.slane %v11617_v2, %v11498_v24 }
 0x369   : > { %v10019_v12 = vpop.eup %10018  ;;  %4544 = vmatpush1.msra.mxu1 %v4543_v47 }
 0x36a   : > { %v10021_v13 = vpop.eup %10020  ;;  %v8481_v5 = vadd.f32 -1.0, %v10019_v12  ;;  %4609 = vmatmul.mubr.f32.vlgmr.msra.gmra.mrb[6].mxu1 %v11507_v62  ;;  %4617 = vmatprep.subr.mxu1 %v11537_v10  ;;  %v9728_v10 = vadd.f32 %v11489_v45, %v545_v46  ;;  %v4999_v45 = vsub.f32 %v11525_v51, %v4920_v17 }
 0x36b   : > { %v10023_v59 = vpop.eup %10022  ;;  %v8482_v20 = vadd.f32 -1.0, %v10021_v13  ;;  %4620 = vmatpush1.msra.mxu1 %v11532_v55  ;;  %4683 = vmatprep.mubr.f32.mxu1 %v13157_v11  ;;  %v5006_v55 = vand.u32 4294901760, %v5005_v44 }
 0x36c   : > { %v10025_v34 = vpop.eup %10024  ;;  %v8483_v15 = vadd.f32 -1.0, %v10023_v59  ;;  %4693 = vmatprep.subr.mxu1 %v11527_v36  ;;  %v4441_v48 = vmul.f32 %v8481_v5, %v4437_v14 }
 0x36d   : > { %v8484_v41 = vadd.f32 -1.0, %v10025_v34  ;;  %v4442_v29 = vmul.f32 %v8482_v20, %v4438_v19  ;;  %v5007_v47 = vsub.f32 %v5005_v44, %v5006_v55 }
 0x36e   : > { %v4443_v33 = vmul.f32 %v8483_v15, %v4439_v39  ;;  %v11578_v31 = vmul.f32 %v9725_v56, %v4441_v48 }
 0x36f   : > { %v4444_v9 = vmul.f32 %v8484_v41, %v4440_v0  ;;  %v11580_v42 = vmul.f32 %v9726_v27, %v4442_v29  ;;  %v5008_v51 = vand.u32 4294901760, %v5007_v47  ;;  %v10410_v47 = vmov 1966171168  }
 0x370   : > { %v11582_v57 = vmul.f32 %v9727_v18, %v4443_v33  ;;  %v5410_v21 = vand.u32 2147483647, %v11578_v31  ;;  %vm5434_vm4 = vcmp.lt.f32.partialorder %v11578_v31, 0.0  ;;  %vm5430_vm6 = vcmp.gt.f32.partialorder %v11578_v31, 0.0 }
 0x371   : > { %v11584_v16 = vmul.f32 %v9728_v10, %v4444_v9  ;;  %vm5435_vm5 = vcmp.lt.f32.partialorder %v11580_v42, 0.0  ;;  %v5438_v0 = vsel %vm5434_vm4, -1.0, %v13157_v11  ;;  %vm5431_vm7 = vcmp.gt.f32.partialorder %v11580_v42, 0.0 }
 0x372   : > { %4686 = vmatmul.mubr.f32.vlgmr.msra.gmra.mrb[6].mxu1 %v11510_v60  ;;  %10026 = vlog2.f32 %v5410_v21  ;;  %v5439_v34 = vsel %vm5435_vm5, -1.0, %v13157_v11  ;;  %v5442_v18 = vsel %vm5430_vm6, 1.0, %v5438_v0  ;;  %v5412_v33 = vand.u32 2147483647, %v11582_v57 }
 0x373   : > { %4695 = vmatpush1.msra.mxu1 %v11523_v25  ;;  %4758 = vmatprep.mubr.f32.mxu1 %v13157_v11  ;;  %v5443_v48 = vsel %vm5431_vm7, 1.0, %v5439_v34  ;;  %v5413_v31 = vand.u32 2147483647, %v11584_v16  ;;  %v5397_v21 = vrot.slane %v11617_v2, %v11492_v49  ;;  %vm5436_vm9 = vcmp.lt.f32.partialorder %v11582_v57, 0.0 }
 0x374   : > { %4771 = vmatprep.subr.mxu1 %v4535_v3  ;;  %v5000_v3 = vand.u32 4294901760, %v4999_v45  ;;  %vm5437_vm10 = vcmp.lt.f32.partialorder %v11584_v16, 0.0  ;;  %vm5432_vm11 = vcmp.gt.f32.partialorder %v11582_v57, 0.0  ;;  %vm5433_vm12 = vcmp.gt.f32.partialorder %v11584_v16, 0.0 }
 0x37a   : > { %4762 = vmatmul.mubr.f32.vlgmr.msra.gmra.mrb[6].mxu1 %v11513_v6 }
 0x37b   : > { %4775 = vmatpush1.msra.mxu1 %v4541_v26  ;;  %4838 = vmatprep.mubr.f32.mxu1 %v13157_v11  ;;  %v5001_v26 = vsub.f32 %v4999_v45, %v5000_v3 }
 0x37c   : > { %4847 = vmatprep.subr.mxu1 %v11527_v36  ;;  %v10027_v28 = vpop.eup %10026 }
 0x37d   : > { %v5002_v36 = vand.u32 4294901760, %v5001_v26  ;;  %v5415_v61 = vmul.f32 0.6931472, %v10027_v28 }
 0x37f   : > { %v8485_v38 = vadd.f32 -70.0, %v5415_v61 }
 0x382   : > { %4840 = vmatmul.mubr.f32.vlgmr.msra.gmra.mrb[6].mxu1 %v11507_v62 }
 0x383   : > { %4849 = vmatpush1.msra.mxu1 %v11523_v25  ;;  %4912 = vmatprep.mubr.f32.mxu1 %v13157_v11  ;;  %v5411_v25 = vand.u32 2147483647, %v11580_v42 }
 0x384   : > { %4921 = vmatprep.subr.mxu1 %v4920_v17 }
 0x385   : > { %10028 = vlog2.f32 %v5411_v25 }
 0x38a   : > { %4914 = vmatmul.mubr.f32.vlgmr.msra.gmra.mrb[6].mxu1 %v11507_v62 }
 0x38b   : > { %4923 = vmatpush1.msra.mxu1 %v4922_v40  ;;  %4986 = vmatprep.mubr.f32.mxu1 %v13157_v11 }
 0x38c   : > { %5003 = vmatprep.subr.mxu1 %v5002_v36  ;;  %v8230_v36 = vunpack.c.l.s4 %v10410_v47  ;;  %v11720_v47 = vld [vmem:[#allocation16 + $0x18] sm:$0xff] }
 0x38e   : > { %4992 = vmatmul.mubr.f32.vlgmr.msra.gmra.mrb[8].mxu1 %v11529_v53  ;;  %v8231_v28 = vunpack.c.0.s8 %v8230_v36 }
 0x38f   : > { %5009 = vmatpush1.msra.mxu1 %v5008_v51  ;;  %5072 = vmatprep.mubr.f32.mxu1 %v13157_v11  ;;  %v10029_v37 = vpop.eup %10028 }
 0x390   : > { %5082 = vmatprep.subr.mxu1 %v4999_v45  ;;  %v5417_v63 = vmul.f32 0.6931472, %v10029_v37  ;;  %v5401_v37 = vrot.slane %v11617_v2, %v11495_v22 }
 0x392   : > { %v8486_v46 = vadd.f32 -70.0, %v5417_v63 }
 0x396   : > { %5074 = vmatmul.mubr.f32.vlgmr.msra.gmra.mrb[8].mxu1 %v11507_v62 }
 0x397   : > { %5085 = vmatpush1.msra.mxu1 %v5005_v44  ;;  %5148 = vmatprep.mubr.f32.mxu1 %v13157_v11 }
 0x398   : > { %5158 = vmatprep.subr.mxu1 %v4920_v17 }
 0x39e   : > { %5151 = vmatmul.mubr.f32.vlgmr.msra.gmra.mrb[8].mxu1 %v11510_v60 }
 0x39f   : > { %5160 = vmatpush1.msra.mxu1 %v4922_v40  ;;  %5223 = vmatprep.mubr.f32.mxu1 %v13157_v11 }
 0x3a0   : > { %5236 = vmatprep.subr.mxu1 %v5000_v3 }
 0x3a6   : > { %5227 = vmatmul.mubr.f32.vlgmr.msra.gmra.mrb[8].mxu1 %v11513_v6 }
 0x3a7   : > { %5240 = vmatpush1.msra.mxu1 %v5006_v55  ;;  %5303 = vmatprep.mubr.f32.mxu1 %v13157_v11 }
 0x3a8   : > { %5312 = vmatprep.subr.mxu1 %v4920_v17 }
 0x3ae   : > { %5305 = vmatmul.mubr.f32.vlgmr.msra.gmra.mrb[8].mxu1 %v11507_v62 }
 0x3af   : > { %5314 = vmatpush1.msra.mxu1 %v4922_v40  ;;  %5377 = vmatprep.mubr.f32.mxu1 %v13157_v11 }
 0x3b6   : > { %5379 = vmatmul.mubr.f32.vlgmr.msra.gmra.mrb[8].mxu1 %v11507_v62 }
 0x3b7   : > { %5994 = vmatprep.mubr.f32.mxu1 %v13157_v11 }
 0x45d   : > { %v4915_v1 = vpop.f32.mrb[6].mxu1 }
 0x45e   : > { %v11623_v4 = vadd.f32 %v5389_v54, %v4915_v1  ;;  %v4917_v12 = vpop.f32.mrb[7].mxu1 }
 0x45f   : > { %v11625_v8 = vadd.f32 %v5393_v52, %v4917_v12 }
 0x460   : > { %v11628_v13 = vmax.f32 %v11623_v4, %v8485_v38  ;;  %v11661_v38 = vsub.s32 %v8231_v28, %v11471_v43 }
 0x461   : > { %v11631_v14 = vmax.f32 %v11625_v8, %v8486_v46  ;;  %v8227_v5 = vcombine.high %v11623_v4, %v11625_v8  ;;  %v13313_v8 = vmov 0 }
 0x462   : > { %v5446_v39 = vsub.f32 %v5415_v61, %v11628_v13  ;;  %13310 = vst [vmem:[#allocation30_spill] sm:$0xff] %v11661_v38  ;;  %v13314_v8 = vsel %vm11682_vm8, 4294967295, %v13313_v8 }
 0x463   : > { %v5447_v59 = vsub.f32 %v5417_v63, %v11631_v14  ;;  %13315 = vst [vmem:[#allocation33_spill] sm:$0xff] %v13314_v8 }
 0x464   : > { %v5450_v19 = vmul.f32 1.442695, %v5446_v39 }
 0x465   : > { %v5452_v20 = vmul.f32 1.442695, %v5447_v59 }
 0x466   : > { %10030 = vpow2.f32 %v5450_v19 }
 0x467   : > { %10032 = vpow2.f32 %v5452_v20  ;;  %v8235_v20 = vrot.slane %v8227_v5, %v11661_v38 }
 0x468   : > { %10034 = vlog2.f32 %v5412_v33 }
 0x469   : > { %10036 = vlog2.f32 %v5413_v31  ;;  %v5440_v31 = vsel %vm5436_vm9, -1.0, %v13157_v11 }
 0x470   : > { %v10031_v56 = vpop.eup %10030 }
 0x471   : > { %v10033_v15 = vpop.eup %10032  ;;  %v5458_v27 = vmul.f32 %v10031_v56, %v5442_v18 }
 0x472   : > { %v5459_v10 = vmul.f32 %v10033_v15, %v5443_v48  ;;  %v10035_v26 = vpop.eup %10034  ;;  %v11676_v48 = vld [vmem:[#allocation16 + $0x80] sm:$0xff] }
 0x473   : > { %v11643_v41 = vand.u32 4294901760, %v5458_v27  ;;  %v10037_v51 = vpop.eup %10036  ;;  %v5419_v25 = vmul.f32 0.6931472, %v10035_v26  ;;  %v6547_v5 = vand.u32 4294901760, %v11676_v48  ;;  %v11718_v26 = vld [vmem:[#allocation16 + $0x10] sm:$0xff] }
 0x474   : > { %v5463_v29 = vand.u32 4294901760, %v5459_v10  ;;  %v5421_v54 = vmul.f32 0.6931472, %v10037_v51 }
 0x475   : > { %v5548_v9 = vsub.f32 %v5458_v27, %v11643_v41  ;;  %v8487_v63 = vadd.f32 -70.0, %v5419_v25  ;;  %v11678_v27 = vld [vmem:[#allocation16 + $0x88] sm:$0xff] }
 0x476   : > { %5464 = vmatprep.subr.mxu0 %v5463_v29  ;;  %v5542_v17 = vsub.f32 %v5459_v10, %v5463_v29  ;;  %v8488_v46 = vadd.f32 -70.0, %v5421_v54  ;;  %v6550_v10 = vand.u32 4294901760, %v11678_v27 }
 0x477   : > { %5466 = vmatpush1.msra.mxu0 %v11643_v41  ;;  %v5549_v42 = vand.u32 4294901760, %v5548_v9 }
 0x478   : > { %5535 = vmatmul.mubr.f32.vlgmr.msra.gmra.mrb[8].mxu0 %v11529_v53  ;;  %v5543_v40 = vand.u32 4294901760, %v5542_v17 }
 0x479   : > { %v5550_v45 = vsub.f32 %v5548_v9, %v5549_v42  ;;  %5615 = vmatprep.mubr.f32.mxu0 %v13157_v11 }
 0x47a   : > { %v5544_v44 = vsub.f32 %v5542_v17, %v5543_v40 }
 0x47b   : > { %v5551_v55 = vand.u32 4294901760, %v5550_v45  ;;  %v6499_v45 = vand.u32 4294901760, %v11699_v7 }
 0x47c   : > { %v5545_v3 = vand.u32 4294901760, %v5544_v44 }
 0x47e   : > { %5546 = vmatprep.subr.mxu0 %v5545_v3  ;;  %v5444_v3 = vsel %vm5432_vm11, 1.0, %v5440_v31 }
 0x47f   : > { %5552 = vmatpush1.msra.mxu0 %v5551_v55 }
 0x480   : > { %5617 = vmatmul.mubr.f32.vlgmr.msra.gmra.mrb[8].mxu0 %v11507_v62  ;;  %5625 = vmatprep.subr.mxu0 %v5542_v17  ;;  %v11707_v17 = vld [vmem:[#allocation16 + $0x90] sm:$0xff] }
 0x481   : > { %5628 = vmatpush1.msra.mxu0 %v5548_v9  ;;  %5691 = vmatprep.mubr.f32.mxu0 %v13157_v11  ;;  %v11701_v9 = vld [vmem:[#allocation16 + $0x8] sm:$0xff] }
 0x482   : > { %5701 = vmatprep.subr.mxu0 %v5463_v29  ;;  %v6502_v57 = vand.u32 4294901760, %v11701_v9 }
 0x484   : > { %v11730_v28 = vpack.c.bf16 %v6502_v57, %v6499_v45 }
 0x488   : > { %5694 = vmatmul.mubr.f32.vlgmr.msra.gmra.mrb[8].mxu0 %v11510_v60 }
 0x489   : > { %5703 = vmatpush1.msra.mxu0 %v11643_v41  ;;  %v5380_v61 = vpop.f32.mrb[8].mxu1  ;;  %5766 = vmatprep.mubr.f32.mxu0 %v13157_v11 }
 0x48a   : > { %v5408_v52 = vadd.f32 %v5397_v21, %v5380_v61  ;;  %5779 = vmatprep.subr.mxu0 %v5543_v40  ;;  %v5382_v1 = vpop.f32.mrb[9].mxu1  ;;  %v5441_v40 = vsel %vm5437_vm10, -1.0, %v13157_v11  ;;  %v11722_v21 = vld [vmem:[#allocation16 + $0xa0] sm:$0xff] }
 0x48b   : > { %v5409_v12 = vadd.f32 %v5401_v37, %v5382_v1  ;;  %v5445_v16 = vsel %vm5433_vm12, 1.0, %v5441_v40 }
 0x48c   : > { %v11663_v39 = vmax.f32 %v5408_v52, %v8487_v63  ;;  %v13147_v63 = vand.u32 4294901760, %v11720_v47 }
 0x48d   : > { %v11665_v2 = vmax.f32 %v5409_v12, %v8488_v46  ;;  %v8228_v59 = vcombine.high %v5408_v52, %v5409_v12  ;;  %v13148_v52 = vand.u32 4294901760, %v11718_v26  ;;  %v13146_v12 = vand.u32 4294901760, %v11722_v21 }
 0x48e   : > { %13311 = vst [vmem:[#allocation31_spill] sm:$0xff] %v11663_v39  ;;  %v5448_v19 = vsub.f32 %v5419_v25, %v11663_v39  ;;  %v11724_v25 = vld [vmem:[#allocation16 + $0xa8] sm:$0xff] }
 0x48f   : > { %13312 = vst [vmem:[#allocation32_spill] sm:$0xff] %v11665_v2  ;;  %v5449_v0 = vsub.f32 %v5421_v54, %v11665_v2  ;;  %v8242_v34 = vrot.slane %v8228_v59, %v11661_v38  ;;  %v13145_v46 = vand.u32 4294901760, %v11724_v25  ;;  %v11747_v59 = vld [vmem:[#allocation16 + $0x20] sm:$0xff] }
 0x490   : > { %v5454_v56 = vmul.f32 1.442695, %v5448_v19  ;;  %5770 = vmatmul.mubr.f32.vlgmr.msra.gmra.mrb[8].mxu0 %v11513_v6  ;;  %v11749_v19 = vld [vmem:[#allocation16 + $0x28] sm:$0xff] }
 0x491   : > { %v5456_v18 = vmul.f32 1.442695, %v5449_v0  ;;  %v8243_v15 = vcombine.high %v8235_v20, %v8242_v34  ;;  %5783 = vmatpush1.msra.mxu0 %v5549_v42  ;;  %5846 = vmatprep.mubr.f32.mxu0 %v13157_v11  ;;  %v11709_v42 = vld [vmem:[#allocation16 + $0x98] sm:$0xff]  ;;  %v11755_v0 = vld [vmem:[#allocation16 + $0xb0] sm:$0xff]  ;;  %v13149_v31 = vand.u32 4294901760, %v11749_v19 }
 0x492   : > { %10038 = vpow2.f32 %v5454_v56  ;;  %5855 = vmatprep.subr.mxu0 %v5463_v29  ;;  %v11693_v29 = vpack.c.bf16 %v6550_v10, %v6547_v5  ;;  %v6556_v55 = vand.u32 4294901760, %v11709_v42  ;;  %v11757_v34 = vld [vmem:[#allocation16 + $0xb8] sm:$0xff]  ;;  %v11763_v56 = vpack.c.bf16 %v13147_v63, %v13148_v52 }
 0x493   : > { %10040 = vpow2.f32 %v5456_v18  ;;  %v8250_v4 = vrot.slane %v8243_v15, %v11661_v38  ;;  %v11772_v15 = vpack.c.bf16 %v13145_v46, %v13146_v12 }
 0x495   : > { %v8251_v33 = vcombine.high %v8250_v4, %v8250_v4 }
 0x497   : > { %8257 = vst.msk [vmem:[#allocation2] sm:$0xf] %vm11682_vm8, %v8251_v33  ;;  %v6511_v33 = vand.u32 4294901760, %v11747_v59 }
 0x498   : > { %5848 = vmatmul.mubr.f32.vlgmr.msra.gmra.mrb[8].mxu0 %v11507_v62 }
 0x499   : > { %5857 = vmatpush1.msra.mxu0 %v11643_v41  ;;  %5920 = vmatprep.mubr.f32.mxu0 %v13157_v11  ;;  %v6553_v41 = vand.u32 4294901760, %v11707_v17 }
 0x49a   : > { %9334 = vmatprep.subr.bf16.mxu0 %v11693_v29 }
 0x49b   : > { %v11736_v54 = vpack.c.bf16 %v6556_v55, %v6553_v41 }
 0x49c   : > { %v10039_v44 = vpop.eup %10038 }
 0x49d   : > { %v10041_v36 = vpop.eup %10040  ;;  %v5460_v51 = vmul.f32 %v10039_v44, %v5444_v3  ;;  %v6565_v44 = vand.u32 4294901760, %v11755_v0  ;;  %v6568_v3 = vand.u32 4294901760, %v11757_v34 }
 0x49e   : > { %v5461_v37 = vmul.f32 %v10041_v36, %v5445_v16  ;;  %v11784_v16 = vld [vmem:[#allocation16 + $0x30] sm:$0xff] }
 0x49f   : > { %v11738_v61 = vand.u32 4294901760, %v5460_v51  ;;  %v11799_v30 = vpack.c.bf16 %v6568_v3, %v6565_v44  ;;  %v13159_v12 = vand.u32 4294901760, %v11784_v16 }
 0x4a0   : > { %5922 = vmatmul.mubr.f32.vlgmr.msra.gmra.mrb[8].mxu0 %v11507_v62  ;;  %v11743_v1 = vand.u32 4294901760, %v5461_v37 }
 0x4a1   : > { %v11752_v20 = vsub.f32 %v5460_v51, %v11738_v61  ;;  %9336 = vmatpush3.bf16.msra.mxu0 %v11730_v28  ;;  %v11786_v51 = vld [vmem:[#allocation16 + $0x38] sm:$0xff]  ;;  %13316 = vst [vmem:[#allocation34_spill] sm:$0xff] %v11799_v30 }
 0x4a2   : > { %5929 = vmatprep.subr.mxu1 %v11743_v1  ;;  %v6007_v18 = vsub.f32 %v5461_v37, %v11743_v1  ;;  %9338 = vmatprep.subr.bf16.mxu0 %v11736_v54  ;;  %v13158_v63 = vand.u32 4294901760, %v11786_v51 }
 0x4a3   : > { %5931 = vmatpush1.msra.mxu1 %v11738_v61  ;;  %v6014_v4 = vand.u32 4294901760, %v11752_v20 }
 0x4a4   : > { %6000 = vmatmul.mubr.f32.vlgmr.msra.gmra.mrb[10].mxu1 %v11529_v53  ;;  %v6008_v40 = vand.u32 4294901760, %v6007_v18  ;;  %v11792_v53 = vpack.c.bf16 %v13149_v31, %v6511_v33  ;;  %v11809_v31 = vpack.c.bf16 %v13158_v63, %v13159_v12 }
 0x4a5   : > { %v6015_v36 = vsub.f32 %v11752_v20, %v6014_v4  ;;  %6080 = vmatprep.mubr.f32.mxu1 %v13157_v11  ;;  %9340 = vmatpush3.bf16.msra.mxu0 %v11763_v56 }
 0x4a6   : > { %v6009_v37 = vsub.f32 %v6007_v18, %v6008_v40  ;;  %9342 = vmatprep.subr.bf16.mxu0 %v11772_v15  ;;  %13317 = vst [vmem:[#allocation35_spill] sm:$0xff] %v11809_v31 }
 0x4a7   : > { %v6016_v52 = vand.u32 4294901760, %v6015_v36 }
 0x4a8   : > { %v6010_v46 = vand.u32 4294901760, %v6009_v37 }
 0x4a9   : > { %9344 = vmatpush3.bf16.msra.mxu0 %v11792_v53 }
 0x4aa   : > { %6011 = vmatprep.subr.mxu1 %v6010_v46  ;;  %9346 = vmatprep.subr.bf16.mxu0 %v11799_v30  ;;  %v11819_v46 = vsub.f32 %v11676_v48, %v6547_v5  ;;  %v11840_v48 = vsub.f32 %v11707_v17, %v6553_v41 }
 0x4ab   : > { %6017 = vmatpush1.msra.mxu1 %v6016_v52  ;;  %v11824_v52 = vsub.f32 %v11678_v27, %v6550_v10  ;;  %v11849_v10 = vsub.f32 %v11709_v42, %v6556_v55  ;;  %v13319_v55 = vand.u32 4294901760, %v11720_v47 }
 0x4ac   : > { %6082 = vmatmul.mubr.f32.vlgmr.msra.gmra.mrb[10].mxu1 %v11507_v62  ;;  %6090 = vmatprep.subr.mxu1 %v6007_v18  ;;  %v11834_v18 = vsub.f32 %v11701_v9, %v6502_v57  ;;  %v13151_v27 = vand.u32 4294901760, %v11819_v46  ;;  %v13318_v9 = vand.u32 4294901760, %v11718_v26 }
 0x4ad   : > { %6093 = vmatpush1.msra.mxu1 %v11752_v20  ;;  %6156 = vmatprep.mubr.f32.mxu1 %v13157_v11  ;;  %v11829_v20 = vsub.f32 %v11699_v7, %v6499_v45  ;;  %v13150_v5 = vand.u32 4294901760, %v11824_v52  ;;  %v13154_v45 = vand.u32 4294901760, %v11840_v48  ;;  %v13155_v41 = vand.u32 4294901760, %v11849_v10 }
 0x4ae   : > { %6166 = vmatprep.subr.mxu1 %v11743_v1  ;;  %9348 = vmatpush3.bf16.msra.mxu0 %v11809_v31  ;;  %v13152_v7 = vand.u32 4294901760, %v11834_v18  ;;  %v11856_v17 = vsub.f32 %v11718_v26, %v13318_v9  ;;  %v6726_v57 = vsub.f32 %v11819_v46, %v13151_v27  ;;  %v13320_v9 = vand.u32 4294901760, %v11722_v21 }
 0x4af   : > { %v6733_v42 = vsub.f32 %v11824_v52, %v13150_v5  ;;  %v13321_v27 = vand.u32 4294901760, %v11724_v25 }
 0x4b0   : > { %v6621_v36 = vsub.f32 %v11834_v18, %v13152_v7  ;;  %v13156_v37 = vand.u32 4294901760, %v11856_v17  ;;  %v11881_v5 = vsub.f32 %v11722_v21, %v13320_v9  ;;  %v6727_v7 = vand.u32 4294901760, %v6726_v57 }
 0x4b1   : > { %v6747_v21 = vsub.f32 %v11849_v10, %v13155_v41  ;;  %v11906_v57 = vsub.f32 %v11747_v59, %v6511_v33 }
 0x4b3   : > { %13322 = vst [vmem:[#allocation36_spill] sm:$0xff] %v11906_v57 }
 0x4b4   : > { %6159 = vmatmul.mubr.f32.vlgmr.msra.gmra.mrb[10].mxu1 %v11510_v60  ;;  %v13153_v60 = vand.u32 4294901760, %v11829_v20 }
 0x4b5   : > { %6168 = vmatpush1.msra.mxu1 %v11738_v61  ;;  %6231 = vmatprep.mubr.f32.mxu1 %v13157_v11 }
 0x4b6   : > { %6244 = vmatprep.subr.mxu1 %v6008_v40  ;;  %v11869_v40 = vsub.f32 %v11720_v47, %v13319_v55  ;;  %v6614_v26 = vsub.f32 %v11829_v20, %v13153_v60  ;;  %v11886_v47 = vsub.f32 %v11724_v25, %v13321_v27  ;;  %v6740_v55 = vsub.f32 %v11840_v48, %v13154_v45 }
 0x4b7   : > { %v6734_v60 = vand.u32 4294901760, %v6733_v42  ;;  %v6622_v27 = vand.u32 4294901760, %v6621_v36  ;;  %v13323_v42 = vand.u32 4294901760, %v11749_v19  ;;  %v11920_v36 = vsub.f32 %v11755_v0, %v6565_v44  ;;  %v11932_v0 = vld [vmem:[#allocation16 + $0x40] sm:$0xff]  ;;  %v11934_v44 = vld [vmem:[#allocation16 + $0x48] sm:$0xff] }
 0x4b8   : > { %v13161_v9 = vand.u32 4294901760, %v11869_v40  ;;  %v6615_v25 = vand.u32 4294901760, %v6614_v26  ;;  %v11915_v26 = vld [vmem:[#allocation16 + $0xc8] sm:$0xff]  ;;  %v6741_v33 = vand.u32 4294901760, %v6740_v55  ;;  %v13332_v55 = vmov 0.0  }
 0x4b9   : > { %v11911_v41 = vsub.f32 %v11749_v19, %v13323_v42  ;;  %13325 = vst [vmem:[#allocation38_spill] sm:$0xff] %v11920_v36  ;;  %v9365_v59 = vpack.c.bf16 %v6734_v60, %v6727_v7  ;;  %v13343_v32 = vand.u32 4294901760, %v11934_v44  ;;  %v13362_v31 = vand.u32 4294901760, %v11915_v26 }
 0x4ba   : > { %v6635_v19 = vsub.f32 %v11869_v40, %v13161_v9  ;;  %v9367_v42 = vpack.c.bf16 %v6622_v27, %v6615_v25  ;;  %v11946_v25 = vld [vmem:[#allocation16 + $0xd8] sm:$0xff] }
 0x4bb   : > { %13324 = vst [vmem:[#allocation37_spill] sm:$0xff] %v11911_v41 }
 0x4bc   : > { %6235 = vmatmul.mubr.f32.vlgmr.msra.gmra.mrb[10].mxu1 %v11513_v6  ;;  %v6628_v6 = vsub.f32 %v11856_v17, %v13156_v37  ;;  %v11925_v37 = vsub.f32 %v11757_v34, %v6568_v3  ;;  %v13327_v3 = vand.u32 4294901760, %v11886_v47  ;;  %v6636_v12 = vand.u32 4294901760, %v6635_v19  ;;  %v11979_v19 = vld [vmem:[#allocation16 + $0x58] sm:$0xff] }
 0x4bd   : > { %6248 = vmatpush1.msra.mxu1 %v6014_v4  ;;  %6311 = vmatprep.mubr.f32.mxu1 %v13157_v11  ;;  %v13160_v4 = vand.u32 4294901760, %v11881_v5  ;;  %v6748_v11 = vand.u32 4294901760, %v6747_v21  ;;  %v11944_v21 = vld [vmem:[#allocation16 + $0xd0] sm:$0xff] }
 0x4be   : > { %6320 = vmatprep.subr.mxu1 %v11743_v1  ;;  %v11913_v1 = vld [vmem:[#allocation16 + $0xc0] sm:$0xff]  ;;  %13326 = vst [vmem:[#allocation39_spill] sm:$0xff] %v11925_v37  ;;  %v6629_v63 = vand.u32 4294901760, %v6628_v6  ;;  %v6761_v60 = vsub.f32 %v11886_v47, %v13327_v3  ;;  %v13330_v3 = vand.u32 4294901760, %v11786_v51  ;;  %v13338_v6 = vand.u32 4294901760, %v11911_v41 }
 0x4bf   : > { %v6754_v34 = vsub.f32 %v11881_v5, %v13160_v4  ;;  %v13328_v4 = vand.u32 4294901760, %v11784_v16  ;;  %v9369_v45 = vpack.c.bf16 %v6748_v11, %v6741_v33  ;;  %v13333_v8 = vand.u32 4294901760, %v11913_v1  ;;  %v11977_v33 = vld [vmem:[#allocation16 + $0x50] sm:$0xff] }
 0x4c0   : > { %v11959_v7 = vsub.f32 %v11786_v51, %v13330_v3  ;;  %v13337_v3 = vand.u32 4294901760, %v11906_v57  ;;  %v6649_v27 = vsub.f32 %v11911_v41, %v13338_v6  ;;  %v13340_v11 = vand.u32 4294901760, %v11925_v37 }
 0x4c1   : > { %v11954_v9 = vsub.f32 %v11784_v16, %v13328_v4  ;;  %v11968_v16 = vsub.f32 %v11913_v1, %v13333_v8  ;;  %v13335_v4 = vand.u32 4294901760, %v11915_v26  ;;  %v12003_v6 = vsub.f32 %v11934_v44, %v13343_v32 }
 0x4c2   : > { %13331 = vst [vmem:[#allocation41_spill] sm:$0xff] %v11959_v7  ;;  %v6642_v8 = vsub.f32 %v11906_v57, %v13337_v3  ;;  %v6775_v38 = vsub.f32 %v11925_v37, %v13340_v11  ;;  %v9371_v32 = vpack.c.bf16 %v6636_v12, %v6629_v63  ;;  %v13351_v12 = vand.u32 4294901760, %v11977_v33 }
 0x4c3   : > { %13329 = vst [vmem:[#allocation40_spill] sm:$0xff] %v11954_v9  ;;  %13334 = vst [vmem:[#allocation42_spill] sm:$0xff] %v11968_v16  ;;  %v11973_v51 = vsub.f32 %v11915_v26, %v13335_v4  ;;  %v13339_v4 = vand.u32 4294901760, %v11920_v36  ;;  %v13349_v23 = vand.u32 4294901760, %v11954_v9 }
 0x4c4   : > { %6313 = vmatmul.mubr.f32.vlgmr.msra.gmra.mrb[10].mxu1 %v11507_v62  ;;  %13344 = vst [vmem:[#allocation45_spill] sm:$0xff] %v12003_v6  ;;  %v6643_v37 = vand.u32 4294901760, %v6642_v8  ;;  %v6776_v11 = vand.u32 4294901760, %v6775_v38 }
 0x4c5   : > { %6322 = vmatpush1.msra.mxu1 %v11738_v61  ;;  %6385 = vmatprep.mubr.f32.mxu1 %v13332_v55  ;;  %13336 = vst [vmem:[#allocation43_spill] sm:$0xff] %v11973_v51  ;;  %v6755_v55 = vand.u32 4294901760, %v6754_v34  ;;  %v6768_v61 = vsub.f32 %v11920_v36, %v13339_v4  ;;  %v13345_v34 = vand.u32 4294901760, %v11944_v21  ;;  %v6650_v4 = vand.u32 4294901760, %v6649_v27 }
 0x4c6   : > { %9366 = vmatprep.subr.bf16.mxu1 %v9365_v59  ;;  %v6762_v59 = vand.u32 4294901760, %v6761_v60  ;;  %v13341_v60 = vand.u32 4294901760, %v11932_v0  ;;  %v6656_v36 = vsub.f32 %v11954_v9, %v13349_v23  ;;  %v12031_v27 = vsub.f32 %v11977_v33, %v13351_v12 }
 0x4c7   : > { %v12012_v49 = vsub.f32 %v11944_v21, %v13345_v34  ;;  %v6769_v22 = vand.u32 4294901760, %v6768_v61  ;;  %v13350_v34 = vand.u32 4294901760, %v11959_v7  ;;  %v13355_v23 = vand.u32 4294901760, %v11968_v16 }
 0x4c8   : > { %v11998_v3 = vsub.f32 %v11932_v0, %v13341_v60  ;;  %v13347_v60 = vand.u32 4294901760, %v11946_v25  ;;  %v9373_v39 = vpack.c.bf16 %v6762_v59, %v6755_v55  ;;  %13352 = vst [vmem:[#allocation48_spill] sm:$0xff] %v12031_v27  ;;  %v6657_v63 = vand.u32 4294901760, %v6656_v36 }
 0x4c9   : > { %13346 = vst [vmem:[#allocation46_spill] sm:$0xff] %v12012_v49  ;;  %v6663_v41 = vsub.f32 %v11959_v7, %v13350_v34  ;;  %v6782_v61 = vsub.f32 %v11968_v16, %v13355_v23  ;;  %v9375_v34 = vpack.c.bf16 %v6650_v4, %v6643_v37  ;;  %v9377_v12 = vpack.c.bf16 %v6776_v11, %v6769_v22 }
 0x4ca   : > { %13342 = vst [vmem:[#allocation44_spill] sm:$0xff] %v11998_v3  ;;  %v12017_v2 = vsub.f32 %v11946_v25, %v13347_v60  ;;  %v13358_v7 = vand.u32 4294901760, %v12003_v6  ;;  %v13182_v16 = vand.u32 4294901760, %v12031_v27  ;;  %v13359_v22 = vand.u32 4294901760, %v12012_v49 }
 0x4cb   : > { %v6664_v60 = vand.u32 4294901760, %v6663_v41  ;;  %v6783_v59 = vand.u32 4294901760, %v6782_v61 }
 0x4cc   : > { %13348 = vst [vmem:[#allocation47_spill] sm:$0xff] %v12017_v2  ;;  %6387 = vmatmul.mubr.f32.vlgmr.msra.gmra.mrb[10].mxu1 %v11507_v62  ;;  %v13353_v62 = vand.u32 4294901760, %v11979_v19  ;;  %v6677_v23 = vsub.f32 %v12003_v6, %v13358_v7  ;;  %v6796_v41 = vsub.f32 %v12012_v49, %v13359_v22  ;;  %v13360_v37 = vand.u32 4294901760, %v12017_v2 }
 0x4cd   : > { %9368 = vmatpush3.bf16.msra.mxu1 %v9367_v42  ;;  %v13356_v42 = vand.u32 4294901760, %v11973_v51  ;;  %v9379_v4 = vpack.c.bf16 %v6664_v60, %v6657_v63  ;;  %v6684_v7 = vsub.f32 %v12031_v27, %v13182_v16 }
 0x4ce   : > { %v12036_v38 = vsub.f32 %v11979_v19, %v13353_v62  ;;  %9370 = vmatprep.subr.bf16.mxu1 %v9369_v45  ;;  %v13357_v62 = vand.u32 4294901760, %v11998_v3  ;;  %v6803_v36 = vsub.f32 %v12017_v2, %v13360_v37 }
 0x4cf   : > { %v6789_v55 = vsub.f32 %v11973_v51, %v13356_v42  ;;  %v6685_v49 = vand.u32 4294901760, %v6684_v7  ;;  %v6465_v7 = vld [vmem:[#allocation16 + $0xf8] sm:$0xff] }
 0x4d0   : > { %13354 = vst [vmem:[#allocation49_spill] sm:$0xff] %v12036_v38  ;;  %v6670_v45 = vsub.f32 %v11998_v3, %v13357_v62  ;;  %v13181_v42 = vand.u32 4294901760, %v12036_v38  ;;  %v6804_v62 = vand.u32 4294901760, %v6803_v36 }
 0x4d1   : > { %9372 = vmatpush3.bf16.msra.mxu1 %v9371_v32  ;;  %v6790_v8 = vand.u32 4294901760, %v6789_v55  ;;  %v6678_v32 = vand.u32 4294901760, %v6677_v23  ;;  %v6797_v55 = vand.u32 4294901760, %v6796_v41 }
 0x4d2   : > { %9374 = vmatprep.subr.bf16.mxu1 %v9373_v39  ;;  %v6671_v11 = vand.u32 4294901760, %v6670_v45  ;;  %v6691_v39 = vsub.f32 %v12036_v38, %v13181_v42  ;;  %v6463_v45 = vld [vmem:[#allocation16 + $0xe8] sm:$0xff] }
 0x4d3   : > { %v9381_v61 = vpack.c.bf16 %v6790_v8, %v6783_v59  ;;  %v9385_v60 = vpack.c.bf16 %v6804_v62, %v6797_v55  ;;  %v6586_v42 = vand.u32 4294901760, %v6463_v45  ;;  %v6447_v59 = vld [vmem:[#allocation16 + $0x68] sm:$0xff]  ;;  %v6592_v62 = vand.u32 4294901760, %v6465_v7 }
 0x4d4   : > { %v9383_v22 = vpack.c.bf16 %v6678_v32, %v6671_v11  ;;  %v6692_v37 = vand.u32 4294901760, %v6691_v39  ;;  %v6538_v41 = vand.u32 4294901760, %v6447_v59  ;;  %v6464_v32 = vld [vmem:[#allocation16 + $0xf0] sm:$0xff] }
 0x4d5   : > { %9376 = vmatpush3.bf16.msra.mxu1 %v9375_v34  ;;  %v12066_v34 = vld [vmem:[#allocation16 + $0xe0] sm:$0xff]  ;;  %v6589_v55 = vand.u32 4294901760, %v6464_v32  ;;  %v12090_v38 = vsub.f32 %v6465_v7, %v6592_v62 }
 0x4d6   : > { %9378 = vmatprep.subr.bf16.mxu1 %v9377_v12  ;;  %v9387_v63 = vpack.c.bf16 %v6692_v37, %v6685_v49  ;;  %v6583_v23 = vand.u32 4294901760, %v12066_v34  ;;  %v6446_v12 = vld [vmem:[#allocation16 + $0x60] sm:$0xff]  ;;  %v12076_v49 = vsub.f32 %v6447_v59, %v6538_v41  ;;  %v6449_v37 = vld [vmem:[#allocation16 + $0x78] sm:$0xff] }
 0x4d7   : > { %v6535_v8 = vand.u32 4294901760, %v6446_v12  ;;  %v12088_v16 = vsub.f32 %v6464_v32, %v6589_v55 }
 0x4d8   : > { %v12070_v36 = vsub.f32 %v12066_v34, %v6583_v23 }
 0x4d9   : > { %9380 = vmatpush3.bf16.msra.mxu1 %v9379_v4  ;;  %v12072_v4 = vsub.f32 %v6463_v45, %v6586_v42  ;;  %v12074_v11 = vsub.f32 %v6446_v12, %v6535_v8  ;;  %v6544_v45 = vand.u32 4294901760, %v6449_v37  ;;  %v13210_v51 = vand.u32 4294901760, %v12088_v16 }
 0x4da   : > { %9382 = vmatprep.subr.bf16.mxu1 %v9381_v61  ;;  %v13193_v39 = vand.u32 4294901760, %v12070_v36 }
 0x4db   : > { %v13196_v61 = vand.u32 4294901760, %v12072_v4  ;;  %v12103_v57 = vsub.f32 %v6449_v37, %v6544_v45 }
 0x4dc   : > { %v6810_v12 = vsub.f32 %v12070_v36, %v13193_v39 }
 0x4dd   : > { %9384 = vmatpush3.bf16.msra.mxu1 %v9383_v22  ;;  %v6448_v22 = vld [vmem:[#allocation16 + $0x70] sm:$0xff]  ;;  %v6817_v59 = vsub.f32 %v12072_v4, %v13196_v61  ;;  %v13209_v61 = vand.u32 4294901760, %v12090_v38 }
 0x4de   : > { %9386 = vmatprep.subr.bf16.mxu1 %v9385_v60  ;;  %v13201_v60 = vand.u32 4294901760, %v12074_v11  ;;  %v6541_v34 = vand.u32 4294901760, %v6448_v22  ;;  %v6811_v3 = vand.u32 4294901760, %v6810_v12  ;;  %v6824_v12 = vsub.f32 %v12088_v16, %v13210_v51  ;;  %v13389_v51 = vld [vmem:[#allocation42_spill] sm:$0xff] }
 0x4df   : > { %v6818_v39 = vand.u32 4294901760, %v6817_v59  ;;  %v13364_v59 = vand.u32 4294901760, %v11932_v0 }
 0x4e0   : > { %v6698_v27 = vsub.f32 %v12074_v11, %v13201_v60  ;;  %v12098_v6 = vsub.f32 %v6448_v22, %v6541_v34  ;;  %v13361_v60 = vand.u32 4294901760, %v11913_v1  ;;  %v6831_v1 = vsub.f32 %v12090_v38, %v13209_v61  ;;  %v12239_v61 = vld [vmem:[#allocation16 + $0x1e8] sm:$0xff] }
 0x4e1   : > { %9388 = vmatpush3.bf16.msra.mxu1 %v9387_v63  ;;  %v13206_v63 = vand.u32 4294901760, %v12076_v49  ;;  %v9389_v22 = vpack.c.bf16 %v6818_v39, %v6811_v3  ;;  %v6825_v26 = vand.u32 4294901760, %v6824_v12  ;;  %v13207_v3 = vand.u32 4294901760, %v12103_v57  ;;  %13388 = vst [vmem:[#allocation57_spill] sm:$0xff] %v12239_v61 }
 0x4e2   : > { %v6699_v32 = vand.u32 4294901760, %v6698_v27  ;;  %v13208_v7 = vand.u32 4294901760, %v12098_v6  ;;  %v12109_v30 = vpack.c.bf16 %v13362_v31, %v13361_v60  ;;  %v13365_v27 = vand.u32 4294901760, %v11934_v44 }
 0x4e3   : > { %v6705_v2 = vsub.f32 %v12076_v49, %v13206_v63  ;;  %9390 = vmatprep.subr.bf16.mxu1 %v9389_v22  ;;  %v6832_v0 = vand.u32 4294901760, %v6831_v1  ;;  %v13368_v44 = vand.u32 4294901760, %v11946_v25  ;;  %v6719_v60 = vsub.f32 %v12103_v57, %v13207_v3  ;;  %v13395_v3 = vld [vmem:[#allocation31_spill] sm:$0xff] }
 0x4e4   : > { %13363 = vst [vmem:[#allocation50_spill] sm:$0xff] %v12109_v30  ;;  %v6712_v31 = vsub.f32 %v12098_v6, %v13208_v7  ;;  %9350 = vmatprep.subr.bf16.mxu0 %v12109_v30  ;;  %v13370_v22 = vand.u32 4294901760, %v11977_v33  ;;  %v13371_v12 = vand.u32 4294901760, %v11979_v19  ;;  %v12148_v25 = vpack.c.bf16 %v6538_v41, %v6535_v8  ;;  %v12252_v7 = vld [vmem:[#allocation16 + $0x1f8] sm:$0xff] }
 0x4e5   : > { %v6706_v9 = vand.u32 4294901760, %v6705_v2  ;;  %v12118_v2 = vpack.c.bf16 %v13365_v27, %v13364_v59  ;;  %v12151_v1 = vpack.c.bf16 %v6592_v62, %v6589_v55  ;;  %v12155_v33 = vpack.c.bf16 %v6544_v45, %v6541_v34  ;;  %v12171_v34 = vld [vmem:[#allocation3] sm:$0xf]  ;;  %13394 = vst [vmem:[#allocation61_spill] sm:$0xff] %v12252_v7 }
 0x4e6   : > { %v6713_v37 = vand.u32 4294901760, %v6712_v31  ;;  %v12142_v59 = vpack.c.bf16 %v13371_v12, %v13370_v22  ;;  %v9397_v19 = vpack.c.bf16 %v11824_v52, %v11819_v46  ;;  %v6418_v55 = vmul.f32 1.442695, %v11628_v13 }
 0x4e7   : > { %13366 = vst [vmem:[#allocation51_spill] sm:$0xff] %v12118_v2  ;;  %v9391_v63 = vpack.c.bf16 %v6706_v9, %v6699_v32  ;;  %9352 = vmatpush3.bf16.msra.mxu0 %v12118_v2  ;;  %v13367_v9 = vand.u32 4294901760, %v11944_v21  ;;  %v9393_v32 = vpack.c.bf16 %v6832_v0, %v6825_v26  ;;  %v12146_v21 = vpack.c.bf16 %v6586_v42, %v6583_v23  ;;  %v12178_v0 = vld [vmem:[#allocation10] sm:$0xff]  ;;  %v12250_v42 = vld [vmem:[#allocation16 + $0x1f0] sm:$0xff] }
 0x4e8   : > { %13372 = vst [vmem:[#allocation53_spill] sm:$0xff] %v12142_v59  ;;  %13374 = vst [vmem:[#allocation55_spill] sm:$0xff] %v12151_v1  ;;  %v6420_v62 = vmul.f32 1.442695, %v11631_v14  ;;  %10042 = vpow2.f32 %v6418_v55  ;;  %v520_v45 = vsub.s32 5, %v11471_v43  ;;  %v6397_v31 = vrot.slane %v12171_v34, %v11498_v24 }
 0x4e9   : > { %9392 = vmatpush3.bf16.msra.mxu1 %v9391_v63  ;;  %v12133_v39 = vpack.c.bf16 %v13368_v44, %v13367_v9  ;;  %v6720_v63 = vand.u32 4294901760, %v6719_v60  ;;  %13373 = vst [vmem:[#allocation54_spill] sm:$0xff] %v12146_v21  ;;  %v6401_v26 = vrot.slane %v12171_v34, %v11501_v50  ;;  %v13375_v9 = vsub.s32 4, %v11471_v43  ;;  %13393 = vst [vmem:[#allocation60_spill] sm:$0xff] %v12250_v42 }
 0x4ea   : > { %9394 = vmatprep.subr.bf16.mxu1 %v9393_v32  ;;  %10044 = vpow2.f32 %v6420_v62  ;;  %v521_v14 = vrot.slane %v12178_v0, %v520_v45 }
 0x4eb   : > { %13369 = vst [vmem:[#allocation52_spill] sm:$0xff] %v12133_v39  ;;  %9354 = vmatprep.subr.bf16.mxu0 %v12133_v39  ;;  %v9395_v27 = vpack.c.bf16 %v6720_v63, %v6713_v37  ;;  %v517_v13 = vrot.slane %v12178_v0, %v13375_v9 }
 0x4ec   : > { %9356 = vmatpush3.bf16.msra.mxu0 %v12142_v59  ;;  %v9722_v63 = vadd.f32 %v11464_v35, %v521_v14 }
 0x4ed   : > { %9358 = vmatprep.subr.bf16.mxu0 %v12146_v21  ;;  %9396 = vmatpush3.bf16.msra.mxu1 %v9395_v27  ;;  %v9721_v24 = vadd.f32 %v11462_v58, %v517_v13 }
 0x4ee   : > { %9430 = vmatprep.subr.bf16.mxu1 %v11693_v29 }
 0x4f0   : > { %9360 = vmatpush3.bf16.msra.mxu0 %v12148_v25 }
 0x4f1   : > { %9362 = vmatprep.subr.bf16.mxu0 %v12151_v1 }
 0x4f2   : > { %v10043_v32 = vpop.eup %10042 }
 0x4f4   : > { %9364 = vmatpush3.bf16.msra.mxu0 %v12155_v33  ;;  %v10045_v12 = vpop.eup %10044 }
 0x4f5   : > { %9398 = vmatprep.subr.bf16.mxu0 %v9397_v19  ;;  %v13390_v19 = vld [vmem:[#allocation43_spill] sm:$0xff] }
 0x4f6   : > { %v9413_v41 = vpack.c.bf16 %v13390_v19, %v13389_v51  ;;  %v12268_v19 = vld [vmem:[#allocation16 + $0x170] sm:$0xff]  ;;  %v12270_v51 = vld [vmem:[#allocation16 + $0x178] sm:$0xff] }
 0x4f7   : > { %13401 = vst [vmem:[#allocation62_spill] sm:$0xff] %v12268_v19  ;;  %13402 = vst [vmem:[#allocation63_spill] sm:$0xff] %v12270_v51 }
 0x573   : > { %v5923_v44 = vpop.f32.mrb[8].mxu0 }
 0x574   : > { %v12184_v37 = vadd.f32 %v6397_v31, %v5923_v44  ;;  %v5925_v60 = vpop.f32.mrb[9].mxu0 }
 0x575   : > { %v12186_v22 = vadd.f32 %v6401_v26, %v5925_v60  ;;  %v9399_v60 = vpack.c.bf16 %v11834_v18, %v11829_v20 }
 0x576   : > { %v6426_v50 = vmul.f32 %v10043_v32, %v12184_v37 }
 0x577   : > { %v6427_v27 = vmul.f32 %v10045_v12, %v12186_v22  ;;  %v9401_v12 = vpack.c.bf16 %v11849_v10, %v11840_v48 }
 0x578   : > { %v6430_v55 = vmul.f32 %v9721_v24, %v6426_v50  ;;  %v9403_v24 = vpack.c.bf16 %v11869_v40, %v11856_v17  ;;  %v9405_v50 = vpack.c.bf16 %v11886_v47, %v11881_v5 }
 0x579   : > { %v6431_v62 = vmul.f32 %v9722_v63, %v6427_v27  ;;  %v13377_v63 = vld [vmem:[#allocation34_spill] sm:$0xff]  ;;  %v13378_v27 = vld [vmem:[#allocation35_spill] sm:$0xff] }
 0x57a   : > { %v12194_v45 = vand.u32 4294901760, %v6430_v55 }
 0x57b   : > { %v12196_v31 = vand.u32 4294901760, %v6431_v62 }
 0x57c   : > { %13376 = vst [vmem:[#allocation56_spill] sm:$0xff] %v12194_v45  ;;  %v12199_v26 = vsub.f32 %v6430_v55, %v12194_v45  ;;  %v13379_v55 = vld [vmem:[#allocation36_spill] sm:$0xff] }
 0x57d   : > { %v6595_v58 = vsub.f32 %v6431_v62, %v12196_v31  ;;  %6835 = vmatprep.mubr.f32.mxu1 %v12196_v31  ;;  %v13380_v62 = vld [vmem:[#allocation37_spill] sm:$0xff] }
 0x57e   : > { %6837 = vmatmul.mubr.f32.vlgmr.msra.gmra.mrb[12].mxu1 %v12194_v45  ;;  %v13211_v35 = vand.u32 4294901760, %v12199_v26  ;;  %v6422_v45 = vmul.f32 1.442695, %v13395_v3  ;;  %v524_v3 = vsub.s32 6, %v11471_v43 }
 0x57f   : > { %9432 = vmatpush3.bf16.msra.mxu1 %v11730_v28  ;;  %v6596_v9 = vand.u32 4294901760, %v6595_v58 }
 0x580   : > { %9434 = vmatprep.subr.bf16.mxu1 %v11736_v54  ;;  %v6603_v13 = vsub.f32 %v12199_v26, %v13211_v35  ;;  %v12248_v35 = vld [vmem:[#allocation16 + $0x168] sm:$0xff]  ;;  %10046 = vpow2.f32 %v6422_v45 }
 0x581   : > { %7079 = vmatprep.mubr.f32.mxu1 %v6596_v9  ;;  %v6597_v14 = vsub.f32 %v6595_v58, %v6596_v9  ;;  %v9407_v9 = vpack.c.bf16 %v13380_v62, %v13379_v55  ;;  %13392 = vst [vmem:[#allocation59_spill] sm:$0xff] %v12248_v35 }
 0x582   : > { %v6604_v32 = vand.u32 4294901760, %v6603_v13  ;;  %v13381_v13 = vld [vmem:[#allocation38_spill] sm:$0xff] }
 0x583   : > { %9436 = vmatpush3.bf16.msra.mxu1 %v11763_v56  ;;  %v6598_v44 = vand.u32 4294901760, %v6597_v14  ;;  %v13382_v14 = vld [vmem:[#allocation39_spill] sm:$0xff] }
 0x584   : > { %9438 = vmatprep.subr.bf16.mxu1 %v11772_v15 }
 0x585   : > { %6599 = vmatprep.mubr.f32.mxu0 %v6598_v44  ;;  %v9409_v44 = vpack.c.bf16 %v13382_v14, %v13381_v13  ;;  %v13408_v14 = vld [vmem:[#allocation48_spill] sm:$0xff]  ;;  %v13412_v13 = vand.u32 4294901760, %v12248_v35 }
 0x586   : > { %6605 = vmatmul.mubr.f32.vlgmr.msra.gmra.mrb[10].mxu0 %v6604_v32  ;;  %v13385_v32 = vld [vmem:[#allocation40_spill] sm:$0xff] }
 0x587   : > { %9400 = vmatpush3.bf16.msra.mxu0 %v9399_v60  ;;  %9440 = vmatpush3.bf16.msra.mxu1 %v11792_v53  ;;  %v12228_v60 = vld [vmem:[#allocation16 + $0x150] sm:$0xff] }
 0x588   : > { %6972 = vmatprep.mubr.f32.mxu0 %v6595_v58  ;;  %9402 = vmatprep.subr.bf16.mxu0 %v9401_v12  ;;  %13383 = vst [vmem:[#allocation34_spill] sm:$0xff] %v12228_v60  ;;  %v12230_v58 = vld [vmem:[#allocation16 + $0x158] sm:$0xff]  ;;  %v13386_v12 = vld [vmem:[#allocation41_spill] sm:$0xff] }
 0x589   : > { %9442 = vmatprep.subr.bf16.mxu1 %v13377_v63  ;;  %13384 = vst [vmem:[#allocation36_spill] sm:$0xff] %v12230_v58  ;;  %v13399_v23 = vand.u32 4294901760, %v12230_v58 }
 0x58b   : > { %9404 = vmatpush3.bf16.msra.mxu0 %v9403_v24  ;;  %9444 = vmatpush3.bf16.msra.mxu1 %v13378_v27  ;;  %v9411_v24 = vpack.c.bf16 %v13386_v12, %v13385_v32  ;;  %v12266_v27 = vsub.f32 %v12230_v58, %v13399_v23  ;;  %v528_v12 = vsub.s32 7, %v11471_v43  ;;  %v12279_v23 = vld [vmem:[#allocation16 + $0x180] sm:$0xff]  ;;  %v12281_v58 = vld [vmem:[#allocation16 + $0x188] sm:$0xff]  ;;  %v13416_v43 = vand.u32 4294901760, %v12252_v7 }
 0x58c   : > { %9406 = vmatprep.subr.bf16.mxu0 %v9405_v50  ;;  %9446 = vmatprep.subr.bf16.mxu1 %v12109_v30  ;;  %v12237_v50 = vld [vmem:[#allocation16 + $0x1e0] sm:$0xff]  ;;  %v13398_v30 = vand.u32 4294901760, %v12228_v60 }
 0x58d   : > { %13387 = vst [vmem:[#allocation37_spill] sm:$0xff] %v12237_v50  ;;  %13400 = vst [vmem:[#allocation31_spill] sm:$0xff] %v12266_v27 }
 0x58e   : > { %v12261_v8 = vsub.f32 %v12228_v60, %v13398_v30 }
 0x58f   : > { %9408 = vmatpush3.bf16.msra.mxu0 %v9407_v9  ;;  %9448 = vmatpush3.bf16.msra.mxu1 %v12118_v2  ;;  %v12244_v9 = vld [vmem:[#allocation16 + $0x160] sm:$0xff] }
 0x590   : > { %9410 = vmatprep.subr.bf16.mxu0 %v9409_v44  ;;  %9450 = vmatprep.subr.bf16.mxu1 %v12133_v39  ;;  %13391 = vst [vmem:[#allocation58_spill] sm:$0xff] %v12244_v9  ;;  %v13396_v44 = vld [vmem:[#allocation44_spill] sm:$0xff]  ;;  %v13397_v39 = vld [vmem:[#allocation45_spill] sm:$0xff] }
 0x591   : > { %v9415_v2 = vpack.c.bf16 %v13397_v39, %v13396_v44  ;;  %v13404_v39 = vld [vmem:[#allocation46_spill] sm:$0xff]  ;;  %v13405_v44 = vld [vmem:[#allocation47_spill] sm:$0xff] }
 0x592   : > { %v9417_v30 = vpack.c.bf16 %v13405_v44, %v13404_v39  ;;  %v13407_v44 = vand.u32 4294901760, %v12239_v61  ;;  %v12306_v39 = vld [vmem:[#allocation16 + $0x100] sm:$0xff] }
 0x593   : > { %9412 = vmatpush3.bf16.msra.mxu0 %v9411_v24  ;;  %9452 = vmatpush3.bf16.msra.mxu1 %v12142_v59  ;;  %v13403_v24 = vld [vmem:[#allocation32_spill] sm:$0xff] }
 0x594   : > { %v6424_v59 = vmul.f32 1.442695, %v13403_v24  ;;  %9414 = vmatprep.subr.bf16.mxu0 %v9413_v41  ;;  %9454 = vmatprep.subr.bf16.mxu1 %v12146_v21  ;;  %v13406_v41 = vand.u32 4294901760, %v12237_v50  ;;  %v12294_v60 = vsub.f32 %v12239_v61, %v13407_v44  ;;  %v13409_v24 = vld [vmem:[#allocation49_spill] sm:$0xff] }
 0x595   : > { %v9419_v32 = vpack.c.bf16 %v13409_v24, %v13408_v14  ;;  %v12313_v61 = vld [vmem:[#allocation16 + $0x108] sm:$0xff] }
 0x596   : > { %v12289_v21 = vsub.f32 %v12237_v50, %v13406_v41  ;;  %10048 = vpow2.f32 %v6424_v59  ;;  %v12318_v59 = vsub.f32 %v12248_v35, %v13412_v13  ;;  %v12328_v41 = vsub.f32 %v12252_v7, %v13416_v43 }
 0x597   : > { %9416 = vmatpush3.bf16.msra.mxu0 %v9415_v2  ;;  %9456 = vmatpush3.bf16.msra.mxu1 %v12148_v25  ;;  %v13410_v2 = vand.u32 4294901760, %v12244_v9  ;;  %v13421_v35 = vand.u32 4294901760, %v12268_v19  ;;  %v525_v7 = vrot.slane %v12178_v0, %v524_v3  ;;  %v13427_v3 = vand.u32 4294901760, %v11819_v46 }
 0x598   : > { %9418 = vmatprep.subr.bf16.mxu0 %v9417_v30  ;;  %9458 = vmatprep.subr.bf16.mxu1 %v12151_v1  ;;  %13413 = vst [vmem:[#allocation48_spill] sm:$0xff] %v12318_v59  ;;  %v13414_v30 = vand.u32 4294901760, %v12250_v42  ;;  %13417 = vst [vmem:[#allocation64_spill] sm:$0xff] %v12328_v41  ;;  %v13430_v13 = vand.u32 4294901760, %v12294_v60  ;;  %v13437_v46 = vand.u32 4294901760, %v12306_v39 }
 0x599   : > { %v12311_v45 = vsub.f32 %v12244_v9, %v13410_v2  ;;  %v13418_v2 = vand.u32 4294901760, %v12261_v8  ;;  %v13419_v9 = vand.u32 4294901760, %v12266_v27  ;;  %v529_v27 = vrot.slane %v12178_v0, %v528_v12 }
 0x59a   : > { %v12323_v44 = vsub.f32 %v12250_v42, %v13414_v30  ;;  %v12341_v30 = vsub.f32 %v12268_v19, %v13421_v35  ;;  %v13423_v42 = vand.u32 4294901760, %v12270_v51  ;;  %v13425_v35 = vpack.c.bf16 %v12072_v4, %v12070_v36 }
 0x59b   : > { %13411 = vst [vmem:[#allocation32_spill] sm:$0xff] %v12311_v45  ;;  %v12334_v50 = vpack.c.bf16 %v13419_v9, %v13418_v2  ;;  %9420 = vmatpush3.bf16.msra.mxu0 %v9419_v32  ;;  %9460 = vmatpush3.bf16.msra.mxu1 %v12155_v33  ;;  %v13424_v9 = vld [vmem:[#allocation28_spill] sm:$0xff]  ;;  %v13428_v0 = vand.u32 4294901760, %v11824_v52  ;;  %v13436_v52 = vpack.c.bf16 %v12076_v49, %v12074_v11  ;;  %v13442_v12 = vand.u32 4294901760, %v12328_v41 }
 0x59c   : > { %13415 = vst [vmem:[#allocation49_spill] sm:$0xff] %v12323_v44  ;;  %13422 = vst [vmem:[#allocation66_spill] sm:$0xff] %v12341_v30  ;;  %v12346_v43 = vsub.f32 %v12270_v51, %v13423_v42  ;;  %v6405_v2 = vrot.slane %v12171_v34, %v13424_v9  ;;  %9422 = vmatprep.subr.bf16.mxu0 %v13425_v35  ;;  %9494 = vmatprep.subr.bf16.mxu1 %v11693_v29  ;;  %v13426_v42 = vld [vmem:[#allocation29_spill] sm:$0xff]  ;;  %v13429_v9 = vand.u32 4294901760, %v12289_v21  ;;  %v12371_v51 = vld [vmem:[#allocation16 + $0x190] sm:$0xff] }
 0x59d   : > { %13420 = vst [vmem:[#allocation65_spill] sm:$0xff] %v12334_v50  ;;  %v6409_v1 = vrot.slane %v12171_v34, %v13426_v42  ;;  %v9461_v32 = vpack.c.bf16 %v13428_v0, %v13427_v3  ;;  %v12373_v35 = vld [vmem:[#allocation16 + $0x198] sm:$0xff]  ;;  %v13236_v29 = vand.u32 4294901760, %v12311_v45  ;;  %v13432_v42 = vand.u32 4294901760, %v12199_v26 }
 0x59e   : > { %v12369_v50 = vpack.c.bf16 %v13430_v13, %v13429_v9  ;;  %v13433_v3 = vand.u32 4294901760, %v12279_v23  ;;  %v13434_v0 = vand.u32 4294901760, %v12281_v58  ;;  %v13441_v34 = vand.u32 4294901760, %v12323_v44  ;;  %v13451_v45 = vld [vmem:[#allocation27_spill] sm:$0xff] }
 0x59f   : > { %7083 = vmatmul.mubr.f32.vlgmr.msra.gmra.mrb[14].mxu1 %v13432_v42  ;;  %9424 = vmatpush3.bf16.msra.mxu0 %v13436_v52  ;;  %v6388_v42 = vpop.f32.mrb[10].mxu1 }
 0x5a0   : > { %13431 = vst [vmem:[#allocation28_spill] sm:$0xff] %v12369_v50  ;;  %v12384_v13 = vsub.f32 %v12279_v23, %v13433_v3  ;;  %v12389_v9 = vsub.f32 %v12281_v58, %v13434_v0  ;;  %9496 = vmatpush3.bf16.msra.mxu1 %v11730_v28  ;;  %v12400_v3 = vsub.f32 %v12306_v39, %v13437_v46  ;;  %v13439_v0 = vand.u32 4294901760, %v12318_v59  ;;  %v6390_v52 = vpop.f32.mrb[11].mxu1 }
 0x5a1   : > { %v12412_v19 = vpack.c.bf16 %v13442_v12, %v13441_v34  ;;  %7353 = vmatprep.mubr.f32.mxu1 %v12196_v31  ;;  %v6416_v28 = vadd.f32 %v6405_v2, %v6388_v42  ;;  %v13444_v46 = vpack.c.bf16 %v12090_v38, %v12088_v16  ;;  %v10047_v12 = vpop.eup %10046  ;;  %v13448_v34 = vld [vmem:[#allocation26_spill] sm:$0xff]  ;;  %v6417_v41 = vadd.f32 %v6409_v1, %v6390_v52 }
 0x5a2   : > { %13435 = vst [vmem:[#allocation29_spill] sm:$0xff] %v12389_v9  ;;  %13438 = vst [vmem:[#allocation67_spill] sm:$0xff] %v12400_v3  ;;  %v12406_v50 = vpack.c.bf16 %v13439_v0, %v13236_v29  ;;  %v13445_v0 = vand.u32 4294901760, %v12341_v30  ;;  %v13446_v29 = vand.u32 4294901760, %v12346_v43  ;;  %9498 = vmatprep.subr.bf16.mxu1 %v11736_v54  ;;  %v13449_v2 = vand.u32 4294901760, %v12313_v61 }
 0x5a3   : > { %13443 = vst [vmem:[#allocation69_spill] sm:$0xff] %v12412_v19  ;;  %9426 = vmatprep.subr.bf16.mxu0 %v13444_v46  ;;  %v9723_v19 = vadd.f32 %v13448_v34, %v525_v7  ;;  %v10049_v46 = vpop.eup %10048  ;;  %v9724_v59 = vadd.f32 %v13451_v45, %v529_v27  ;;  %v6428_v44 = vmul.f32 %v10047_v12, %v6416_v28  ;;  %v13452_v30 = vand.u32 4294901760, %v11829_v20  ;;  %v12448_v45 = vld [vmem:[#allocation16 + $0x110] sm:$0xff]  ;;  %v12472_v12 = vld [vmem:[#allocation16 + $0x118] sm:$0xff] }
 0x5a4   : > { %13440 = vst [vmem:[#allocation68_spill] sm:$0xff] %v12406_v50  ;;  %v12424_v50 = vpack.c.bf16 %v13446_v29, %v13445_v0  ;;  %v12431_v42 = vsub.f32 %v12313_v61, %v13449_v2  ;;  %v13453_v29 = vand.u32 4294901760, %v11834_v18  ;;  %v13455_v7 = vand.u32 4294901760, %v11849_v10  ;;  %9500 = vmatpush3.bf16.msra.mxu1 %v11763_v56 }
 0x5a5   : > { %v6429_v54 = vmul.f32 %v10049_v46, %v6417_v41  ;;  %v8263_v52 = vcombine.high %v6416_v28, %v6417_v41  ;;  %v13456_v34 = vpack.c.bf16 %v12103_v57, %v12098_v6  ;;  %v13246_v27 = vand.u32 4294901760, %v12384_v13  ;;  %9502 = vmatprep.subr.bf16.mxu1 %v11772_v15 }
 0x5a6   : > { %13447 = vst [vmem:[#allocation70_spill] sm:$0xff] %v12424_v50  ;;  %13450 = vst [vmem:[#allocation26_spill] sm:$0xff] %v12431_v42  ;;  %v9463_v0 = vpack.c.bf16 %v13453_v29, %v13452_v30  ;;  %v13454_v50 = vand.u32 4294901760, %v11840_v48  ;;  %v13245_v20 = vand.u32 4294901760, %v12389_v9  ;;  %v12450_v18 = vmul.f32 %v9723_v19, %v6428_v44  ;;  %v13461_v30 = vld [vmem:[#allocation30_spill] sm:$0xff] }
 0x5a7   : > { %9428 = vmatpush3.bf16.msra.mxu0 %v13456_v34  ;;  %v13244_v48 = vand.u32 4294901760, %v12400_v3  ;;  %v13457_v10 = vand.u32 4294901760, %v12371_v51  ;;  %v13459_v56 = vand.u32 4294901760, %v12373_v35  ;;  %v13462_v19 = vcombine.high %v12184_v37, %v12186_v22 }
 0x5a8   : > { %v9465_v1 = vpack.c.bf16 %v13455_v7, %v13454_v50  ;;  %9462 = vmatprep.subr.bf16.mxu0 %v9461_v32  ;;  %v12468_v32 = vmul.f32 %v9724_v59, %v6429_v54  ;;  %v8277_v15 = vrot.slane %v8263_v52, %v13461_v30  ;;  %v13243_v28 = vand.u32 4294901760, %v12431_v42  ;;  %9504 = vmatpush3.bf16.msra.mxu1 %v11792_v53 }
 0x5a9   : > { %v12457_v50 = vsub.f32 %v12371_v51, %v13457_v10  ;;  %v12462_v41 = vsub.f32 %v12373_v35, %v13459_v56  ;;  %v8270_v44 = vrot.slane %v13462_v19, %v13461_v30  ;;  %v13463_v2 = vand.u32 4294901760, %v11856_v17  ;;  %v12489_v17 = vld [vmem:[#allocation16 + $0x1a0] sm:$0xff]  ;;  %9506 = vmatprep.subr.bf16.mxu1 %v13377_v63  ;;  %v13469_v10 = vld [vmem:[#allocation38_spill] sm:$0xff]  ;;  %v13471_v19 = vld [vmem:[#allocation39_spill] sm:$0xff] }
 0x5aa   : > { %6975 = vmatmul.mubr.f32.vlgmr.msra.gmra.mrb[12].mxu0 %v12199_v26  ;;  %v13464_v46 = vand.u32 4294901760, %v11869_v40  ;;  %v13247_v7 = vand.u32 4294901760, %v12448_v45  ;;  %v13465_v37 = vand.u32 4294901760, %v11881_v5  ;;  %v13466_v22 = vand.u32 4294901760, %v11886_v47  ;;  %v12491_v40 = vld [vmem:[#allocation16 + $0x1a8] sm:$0xff] }
 0x5ab   : > { %13458 = vst [vmem:[#allocation27_spill] sm:$0xff] %v12457_v50  ;;  %13460 = vst [vmem:[#allocation71_spill] sm:$0xff] %v12462_v41  ;;  %v8278_v34 = vcombine.high %v8270_v44, %v8277_v15  ;;  %9464 = vmatpush3.bf16.msra.mxu0 %v9463_v0  ;;  %7249 = vmatprep.mubr.f32.mxu0 %v12196_v31  ;;  %v13467_v54 = vand.u32 4294901760, %v13379_v55  ;;  %v13468_v26 = vand.u32 4294901760, %v13380_v62  ;;  %v13249_v5 = vand.u32 4294901760, %v12457_v50 }
 0x5ac   : > { %v9467_v29 = vpack.c.bf16 %v13464_v46, %v13463_v2  ;;  %v9469_v59 = vpack.c.bf16 %v13466_v22, %v13465_v37  ;;  %9466 = vmatprep.subr.bf16.mxu0 %v9465_v1  ;;  %v7588_v31 = vsub.f32 %v12384_v13, %v13246_v27  ;;  %v13248_v47 = vand.u32 4294901760, %v12462_v41  ;;  %v13476_v22 = vld [vmem:[#allocation41_spill] sm:$0xff] }
 0x5ad   : > { %v9471_v52 = vpack.c.bf16 %v13468_v26, %v13467_v54  ;;  %v8285_v62 = vrot.slane %v8278_v34, %v13461_v30  ;;  %v7595_v0 = vsub.f32 %v12389_v9, %v13245_v20  ;;  %v7476_v53 = vsub.f32 %v12400_v3, %v13244_v48  ;;  %v13474_v34 = vld [vmem:[#allocation40_spill] sm:$0xff]  ;;  %v13484_v27 = vld [vmem:[#allocation45_spill] sm:$0xff] }
 0x5ae   : > { %v7483_v1 = vsub.f32 %v12431_v42, %v13243_v28  ;;  %v13470_v56 = vand.u32 4294901760, %v13469_v10  ;;  %v13472_v44 = vand.u32 4294901760, %v13471_v19  ;;  %v12518_v63 = vsub.f32 %v12448_v45, %v13247_v7  ;;  %v13478_v10 = vld [vmem:[#allocation42_spill] sm:$0xff]  ;;  %v13480_v19 = vld [vmem:[#allocation43_spill] sm:$0xff]  ;;  %v13482_v48 = vld [vmem:[#allocation44_spill] sm:$0xff] }
 0x5af   : > { %v13250_v2 = vand.u32 4294901760, %v12491_v40  ;;  %v8286_v46 = vcombine.high %v8285_v62, %v8285_v62  ;;  %9468 = vmatpush3.bf16.msra.mxu0 %v9467_v29  ;;  %v13475_v37 = vand.u32 4294901760, %v13474_v34  ;;  %v13477_v54 = vand.u32 4294901760, %v13476_v22  ;;  %v12536_v30 = vld [vmem:[#allocation16 + $0x120] sm:$0xff]  ;;  %v13486_v62 = vld [vmem:[#allocation35_spill] sm:$0xff] }
 0x5b0   : > { %v9473_v15 = vpack.c.bf16 %v13472_v44, %v13470_v56  ;;  %13473 = vst [vmem:[#allocation30_spill] sm:$0xff] %v12518_v63  ;;  %v13479_v28 = vand.u32 4294901760, %v13478_v10  ;;  %v13481_v56 = vand.u32 4294901760, %v13480_v19  ;;  %v13483_v20 = vand.u32 4294901760, %v13482_v48  ;;  %9508 = vmatpush3.bf16.msra.mxu1 %v13486_v62  ;;  %9470 = vmatprep.subr.bf16.mxu0 %v9469_v59  ;;  %v13490_v59 = vld [vmem:[#allocation50_spill] sm:$0xff] }
 0x5b1   : > { %v9475_v26 = vpack.c.bf16 %v13477_v54, %v13475_v37  ;;  %v13485_v7 = vand.u32 4294901760, %v13484_v27  ;;  %v7602_v29 = vsub.f32 %v12457_v50, %v13249_v5  ;;  %v7609_v34 = vsub.f32 %v12462_v41, %v13248_v47  ;;  %v12550_v27 = vld [vmem:[#allocation16 + $0x128] sm:$0xff]  ;;  %8288 = vst.msk [vmem:[#allocation3] sm:$0xf] %vm11682_vm8, %v8286_v46  ;;  %9510 = vmatprep.subr.bf16.mxu1 %v13490_v59  ;;  %v13500_v41 = vld [vmem:[#allocation51_spill] sm:$0xff] }
 0x5b2   : > { %v9477_v44 = vpack.c.bf16 %v13481_v56, %v13479_v28  ;;  %v13487_v28 = vand.u32 4294901760, %v12472_v12  ;;  %v7589_v37 = vand.u32 4294901760, %v7588_v31  ;;  %v7596_v22 = vand.u32 4294901760, %v7595_v0  ;;  %v13494_v31 = vld [vmem:[#allocation46_spill] sm:$0xff] }
 0x5b3   : > { %v12534_v55 = vpack.c.bf16 %v13485_v7, %v13483_v20  ;;  %v12552_v20 = vld [vmem:[#allocation16 + $0x1b0] sm:$0xff]  ;;  %v7477_v54 = vand.u32 4294901760, %v7476_v53  ;;  %v7484_v10 = vand.u32 4294901760, %v7483_v1  ;;  %v13491_v56 = vand.u32 4294901760, %v12489_v17  ;;  %v12569_v7 = vld [vmem:[#allocation16 + $0x1b8] sm:$0xff]  ;;  %9472 = vmatpush3.bf16.msra.mxu0 %v9471_v52 }
 0x5b4   : > { %v12548_v48 = vsub.f32 %v12472_v12, %v13487_v28  ;;  %v12566_v28 = vsub.f32 %v12491_v40, %v13250_v2  ;;  %v13495_v0 = vand.u32 4294901760, %v13494_v31  ;;  %v13496_v53 = vld [vmem:[#allocation47_spill] sm:$0xff]  ;;  %v13498_v47 = vand.u32 4294901760, %v13408_v14  ;;  %9512 = vmatpush3.bf16.msra.mxu1 %v13500_v41  ;;  %9474 = vmatprep.subr.bf16.mxu0 %v9473_v15 }
 0x5b5   : > { %v12561_v62 = vsub.f32 %v12489_v17, %v13491_v56  ;;  %v13497_v1 = vand.u32 4294901760, %v13496_v53  ;;  %v13499_v56 = vand.u32 4294901760, %v13409_v24  ;;  %v13255_v19 = vand.u32 4294901760, %v12550_v27  ;;  %v13503_v24 = vld [vmem:[#allocation52_spill] sm:$0xff] }
 0x5b6   : > { %13488 = vst [vmem:[#allocation38_spill] sm:$0xff] %v12548_v48  ;;  %13493 = vst [vmem:[#allocation40_spill] sm:$0xff] %v12566_v28  ;;  %v13253_v2 = vand.u32 4294901760, %v12552_v20  ;;  %v13501_v52 = vand.u32 4294901760, %v12070_v36  ;;  %v13502_v31 = vand.u32 4294901760, %v12072_v4  ;;  %v7610_v53 = vand.u32 4294901760, %v7609_v34  ;;  %9514 = vmatprep.subr.bf16.mxu1 %v13503_v24 }
 0x5b7   : > { %13492 = vst [vmem:[#allocation39_spill] sm:$0xff] %v12561_v62  ;;  %v9481_v59 = vpack.c.bf16 %v13497_v1, %v13495_v0  ;;  %v12579_v5 = vpack.c.bf16 %v13499_v56, %v13498_v47  ;;  %v7603_v0 = vand.u32 4294901760, %v7602_v29  ;;  %v13254_v14 = vand.u32 4294901760, %v12548_v48  ;;  %v12603_v4 = vld [vmem:[#allocation16 + $0x130] sm:$0xff]  ;;  %v12605_v29 = vld [vmem:[#allocation16 + $0x138] sm:$0xff]  ;;  %9476 = vmatpush3.bf16.msra.mxu0 %v9475_v26 }
 0x5b8   : > { %v12588_v46 = vpack.c.bf16 %v13502_v31, %v13501_v52  ;;  %v12592_v47 = vpack.c.bf16 %v7596_v22, %v7589_v37  ;;  %v13504_v1 = vand.u32 4294901760, %v12074_v11  ;;  %v13505_v56 = vand.u32 4294901760, %v12076_v49  ;;  %9478 = vmatprep.subr.bf16.mxu0 %v9477_v44 }
 0x5b9   : > { %v12600_v15 = vpack.c.bf16 %v7484_v10, %v7477_v54  ;;  %v13256_v36 = vand.u32 4294901760, %v12569_v7  ;;  %v13506_v34 = vand.u32 4294901760, %v12518_v63  ;;  %v13259_v37 = vand.u32 4294901760, %v12561_v62  ;;  %v12619_v54 = vld [vmem:[#allocation16 + $0x1c0] sm:$0xff]  ;;  %v12621_v10 = vld [vmem:[#allocation16 + $0x1c8] sm:$0xff] }
 0x5ba   : > { %v12598_v41 = vpack.c.bf16 %v13505_v56, %v13504_v1  ;;  %v13507_v49 = vand.u32 4294901760, %v12536_v30  ;;  %v13509_v31 = vand.u32 4294901760, %v12088_v16  ;;  %v13510_v24 = vand.u32 4294901760, %v12090_v38  ;;  %v13515_v16 = vld [vmem:[#allocation53_spill] sm:$0xff] }
 0x5bb   : > { %v12610_v52 = vsub.f32 %v12518_v63, %v13506_v34  ;;  %v13511_v56 = vand.u32 4294901760, %v12098_v6  ;;  %v13512_v34 = vand.u32 4294901760, %v12103_v57  ;;  %v12643_v26 = vsub.f32 %v12552_v20, %v13253_v2  ;;  %9516 = vmatpush3.bf16.msra.mxu1 %v13515_v16  ;;  %v13516_v2 = vld [vmem:[#allocation54_spill] sm:$0xff]  ;;  %9480 = vmatpush3.bf16.msra.mxu0 %v12534_v55 }
 0x5bc   : > { %v12617_v22 = vsub.f32 %v12536_v30, %v13507_v49  ;;  %v12627_v1 = vpack.c.bf16 %v13510_v24, %v13509_v31  ;;  %v12638_v49 = vsub.f32 %v12550_v27, %v13255_v19  ;;  %v12646_v38 = vpack.c.bf16 %v7610_v53, %v7603_v0  ;;  %v12653_v24 = vld [vmem:[#allocation16 + $0x140] sm:$0xff]  ;;  %9518 = vmatprep.subr.bf16.mxu1 %v13516_v2  ;;  %v12668_v16 = vld [vmem:[#allocation16 + $0x1d0] sm:$0xff] }
 0x5bd   : > { %v12633_v11 = vpack.c.bf16 %v13512_v34, %v13511_v56  ;;  %13514 = vst [vmem:[#allocation43_spill] sm:$0xff] %v12643_v26  ;;  %v7497_v57 = vsub.f32 %v12548_v48, %v13254_v14  ;;  %v12655_v56 = vld [vmem:[#allocation16 + $0x148] sm:$0xff]  ;;  %v12658_v34 = vand.u32 4294901760, %v12468_v32  ;;  %v12664_v44 = vsub.f32 %v12569_v7, %v13256_v36  ;;  %v12670_v14 = vld [vmem:[#allocation16 + $0x1d8] sm:$0xff]  ;;  %9482 = vmatprep.subr.bf16.mxu0 %v9481_v59 }
 0x5be   : > { %13508 = vst [vmem:[#allocation41_spill] sm:$0xff] %v12617_v22  ;;  %13513 = vst [vmem:[#allocation42_spill] sm:$0xff] %v12638_v49  ;;  %v7491_v19 = vand.u32 4294901760, %v12610_v52  ;;  %v7616_v31 = vsub.f32 %v12561_v62, %v13259_v37  ;;  %v13517_v2 = vand.u32 4294901760, %v12566_v28  ;;  %v13518_v37 = vand.u32 4294901760, %v12603_v4 }
 0x5bf   : > { %9520 = vmatpush3.bf16.msra.mxu1 %v12148_v25  ;;  %v12700_v52 = vsub.f32 %v12468_v32, %v12658_v34  ;;  %v13520_v25 = vld [vmem:[#allocation55_spill] sm:$0xff]  ;;  %v7498_v53 = vand.u32 4294901760, %v7497_v57  ;;  %v13523_v32 = vand.u32 4294901760, %v12617_v22  ;;  %9484 = vmatpush3.bf16.msra.mxu0 %v12579_v5 }
 0x5c0   : > { %v7623_v6 = vsub.f32 %v12566_v28, %v13517_v2  ;;  %v12689_v62 = vsub.f32 %v12603_v4, %v13518_v37  ;;  %v13519_v2 = vand.u32 4294901760, %v12605_v29  ;;  %9522 = vmatprep.subr.bf16.mxu1 %v13520_v25  ;;  %v13521_v37 = vand.u32 4294901760, %v12619_v54  ;;  %9486 = vmatprep.subr.bf16.mxu0 %v12588_v46 }
 0x5c1   : > { %v7617_v0 = vand.u32 4294901760, %v7616_v31  ;;  %v7504_v63 = vsub.f32 %v12617_v22, %v13523_v32  ;;  %v13524_v25 = vand.u32 4294901760, %v12638_v49  ;;  %v13530_v46 = vand.u32 4294901760, %v12664_v44 }
 0x5c2   : > { %v12694_v55 = vsub.f32 %v12605_v29, %v13519_v2  ;;  %v12707_v48 = vsub.f32 %v12619_v54, %v13521_v37  ;;  %v13522_v2 = vand.u32 4294901760, %v12621_v10  ;;  %v7624_v28 = vand.u32 4294901760, %v7623_v6 }
 0x5c3   : > { %v7511_v59 = vsub.f32 %v12638_v49, %v13524_v25  ;;  %v13525_v37 = vand.u32 4294901760, %v12643_v26  ;;  %v13527_v6 = vand.u32 4294901760, %v12655_v56  ;;  %9524 = vmatpush3.bf16.msra.mxu1 %v12155_v33  ;;  %v13528_v25 = vand.u32 4294901760, %v12668_v16  ;;  %9488 = vmatpush3.bf16.msra.mxu0 %v12598_v41 }
 0x5c4   : > { %v12712_v36 = vsub.f32 %v12621_v10, %v13522_v2  ;;  %v13526_v2 = vand.u32 4294901760, %v12653_v24  ;;  %9558 = vmatprep.subr.bf16.mxu1 %v12592_v47  ;;  %v9563_v49 = vpack.c.bf16 %v7498_v53, %v7491_v19  ;;  %v13532_v22 = vand.u32 4294901760, %v12281_v58  ;;  %v13533_v47 = vld [vmem:[#allocation56_spill] sm:$0xff]  ;;  %9490 = vmatprep.subr.bf16.mxu0 %v12627_v1 }
 0x5c5   : > { %v7630_v50 = vsub.f32 %v12643_v26, %v13525_v37  ;;  %v12732_v31 = vsub.f32 %v12655_v56, %v13527_v6  ;;  %v12741_v37 = vsub.f32 %v12668_v16, %v13528_v25  ;;  %v7637_v6 = vsub.f32 %v12664_v44, %v13530_v46 }
 0x5c6   : > { %v12727_v57 = vsub.f32 %v12653_v24, %v13526_v2  ;;  %v13529_v2 = vand.u32 4294901760, %v12670_v14  ;;  %v7650_v5 = vand.u32 4294901760, %v12712_v36  ;;  %v13531_v25 = vand.u32 4294901760, %v12279_v23  ;;  %7355 = vmatmul.mubr.f32.vlgmr.msra.gmra.mrb[16].mxu1 %v13533_v47 }
 0x5c7   : > { %v7505_v3 = vand.u32 4294901760, %v7504_v63  ;;  %v7512_v33 = vand.u32 4294901760, %v7511_v59  ;;  %v7631_v9 = vand.u32 4294901760, %v7630_v50  ;;  %v7538_v32 = vand.u32 4294901760, %v12732_v31  ;;  %9560 = vmatpush3.bf16.msra.mxu1 %v12600_v15  ;;  %7697 = vmatprep.mubr.f32.mxu1 %v12658_v34 }
 0x5c8   : > { %v12746_v26 = vsub.f32 %v12670_v14, %v13529_v2  ;;  %v12759_v42 = vpack.c.bf16 %v13532_v22, %v13531_v25  ;;  %v9565_v2 = vpack.c.bf16 %v7624_v28, %v7617_v0  ;;  %v7531_v46 = vand.u32 4294901760, %v12727_v57  ;;  %9562 = vmatprep.subr.bf16.mxu1 %v12646_v38  ;;  %9492 = vmatpush3.bf16.msra.mxu0 %v12633_v11 }
 0x5c9   : > { %v13534_v58 = vand.u32 4294901760, %v12689_v62  ;;  %v13535_v63 = vand.u32 4294901760, %v12694_v55  ;;  %v7657_v28 = vand.u32 4294901760, %v12741_v37  ;;  %v13536_v41 = vand.u32 4294901760, %v12700_v52 }
 0x5ca   : > { %v13280_v50 = vand.u32 4294901760, %v12746_v26  ;;  %v7638_v22 = vand.u32 4294901760, %v7637_v6  ;;  %v13537_v0 = vand.u32 4294901760, %v12707_v48  ;;  %v7651_v59 = vsub.f32 %v12712_v36, %v7650_v5  ;;  %9526 = vmatprep.subr.bf16.mxu0 %v12759_v42 }
 0x5cb   : > { %v7518_v23 = vsub.f32 %v12689_v62, %v13534_v58  ;;  %v7525_v19 = vsub.f32 %v12694_v55, %v13535_v63  ;;  %v7459_v15 = vsub.f32 %v12700_v52, %v13536_v41  ;;  %v13538_v25 = vand.u32 4294901760, %v12306_v39  ;;  %9564 = vmatpush3.bf16.msra.mxu1 %v9563_v49  ;;  %7251 = vmatmul.mubr.f32.vlgmr.msra.gmra.mrb[14].mxu0 %v13533_v47 }
 0x5cc   : > { %v7644_v53 = vsub.f32 %v12707_v48, %v13537_v0  ;;  %v13539_v58 = vand.u32 4294901760, %v12313_v61  ;;  %v9567_v38 = vpack.c.bf16 %v7512_v33, %v7505_v3  ;;  %v13540_v63 = vand.u32 4294901760, %v12371_v51  ;;  %9566 = vmatprep.subr.bf16.mxu1 %v9565_v2 }
 0x5cd   : > { %v13541_v6 = vand.u32 4294901760, %v12373_v35  ;;  %v7532_v0 = vsub.f32 %v12727_v57, %v7531_v46  ;;  %v7539_v39 = vsub.f32 %v12732_v31, %v7538_v32  ;;  %v7519_v61 = vand.u32 4294901760, %v7518_v23 }
 0x5ce   : > { %v12790_v1 = vpack.c.bf16 %v13539_v58, %v13538_v25  ;;  %v7526_v11 = vand.u32 4294901760, %v7525_v19  ;;  %v7658_v51 = vsub.f32 %v12741_v37, %v7657_v28  ;;  %v7665_v35 = vsub.f32 %v12746_v26, %v13280_v50 }
 0x5cf   : > { %v12797_v41 = vpack.c.bf16 %v13541_v6, %v13540_v63  ;;  %v7460_v3 = vand.u32 4294901760, %v7459_v15  ;;  %v9569_v33 = vpack.c.bf16 %v7638_v22, %v7631_v9  ;;  %v7645_v25 = vand.u32 4294901760, %v7644_v53  ;;  %v13545_v9 = vld [vmem:[#allocation31_spill] sm:$0xff]  ;;  %9568 = vmatpush3.bf16.msra.mxu1 %v9567_v38 }
 0x5d0   : > { %v7652_v58 = vand.u32 4294901760, %v7651_v59  ;;  %v13542_v49 = vand.u32 4294901760, %v12448_v45  ;;  %v13543_v23 = vand.u32 4294901760, %v12472_v12  ;;  %9528 = vmatpush3.bf16.msra.mxu0 %v12790_v1  ;;  %v7533_v63 = vand.u32 4294901760, %v7532_v0 }
 0x5d1   : > { %7461 = vmatprep.mubr.f32.mxu0 %v7460_v3  ;;  %v7540_v6 = vand.u32 4294901760, %v7539_v39  ;;  %v13544_v50 = vand.u32 4294901760, %v12261_v8  ;;  %v13546_v15 = vand.u32 4294901760, %v13545_v9  ;;  %9530 = vmatprep.subr.bf16.mxu0 %v12797_v41  ;;  %v9571_v45 = vpack.c.bf16 %v7526_v11, %v7519_v61 }
 0x5d2   : > { %v12817_v19 = vpack.c.bf16 %v13543_v23, %v13542_v49  ;;  %v13547_v12 = vand.u32 4294901760, %v12489_v17  ;;  %v13548_v47 = vand.u32 4294901760, %v12491_v40  ;;  %v7659_v59 = vand.u32 4294901760, %v7658_v51  ;;  %9570 = vmatprep.subr.bf16.mxu1 %v9569_v33 }
 0x5d3   : > { %v7546_v2 = vsub.f32 %v12261_v8, %v13544_v50  ;;  %v7553_v22 = vsub.f32 %v13545_v9, %v13546_v15  ;;  %v7666_v0 = vand.u32 4294901760, %v7665_v35  ;;  %v9573_v39 = vpack.c.bf16 %v7652_v58, %v7645_v25  ;;  %9572 = vmatpush3.bf16.msra.mxu1 %v9571_v45 }
 0x5d4   : > { %v12831_v53 = vpack.c.bf16 %v13548_v47, %v13547_v12  ;;  %v13549_v50 = vand.u32 4294901760, %v12289_v21  ;;  %v13550_v49 = vand.u32 4294901760, %v12294_v60  ;;  %v13551_v61 = vand.u32 4294901760, %v12536_v30  ;;  %9532 = vmatpush3.bf16.msra.mxu0 %v12817_v19  ;;  %v13555_v30 = vld [vmem:[#allocation32_spill] sm:$0xff] }
 0x5d5   : > { %v13552_v17 = vand.u32 4294901760, %v12550_v27  ;;  %v9575_v40 = vpack.c.bf16 %v7540_v6, %v7533_v63  ;;  %v13553_v51 = vand.u32 4294901760, %v12552_v20  ;;  %v13554_v35 = vand.u32 4294901760, %v12569_v7  ;;  %v13557_v12 = vld [vmem:[#allocation48_spill] sm:$0xff]  ;;  %9574 = vmatprep.subr.bf16.mxu1 %v9573_v39  ;;  %v13559_v7 = vld [vmem:[#allocation49_spill] sm:$0xff] }
 0x5d6   : > { %v7672_v3 = vsub.f32 %v12289_v21, %v13549_v50  ;;  %v7679_v38 = vsub.f32 %v12294_v60, %v13550_v49  ;;  %v7547_v25 = vand.u32 4294901760, %v7546_v2  ;;  %v7554_v58 = vand.u32 4294901760, %v7553_v22  ;;  %9534 = vmatprep.subr.bf16.mxu0 %v12831_v53  ;;  %v13561_v22 = vld [vmem:[#allocation64_spill] sm:$0xff] }
 0x5d7   : > { %v12843_v11 = vpack.c.bf16 %v13552_v17, %v13551_v61  ;;  %v12850_v33 = vpack.c.bf16 %v13554_v35, %v13553_v51  ;;  %v9577_v23 = vpack.c.bf16 %v7666_v0, %v7659_v59  ;;  %v13556_v15 = vand.u32 4294901760, %v13555_v30  ;;  %9576 = vmatpush3.bf16.msra.mxu1 %v9575_v40 }
 0x5d8   : > { %v13558_v47 = vand.u32 4294901760, %v13557_v12  ;;  %v7673_v20 = vand.u32 4294901760, %v7672_v3  ;;  %v7680_v6 = vand.u32 4294901760, %v7679_v38  ;;  %v13560_v50 = vand.u32 4294901760, %v13559_v7 }
 0x5d9   : > { %v7560_v27 = vsub.f32 %v13555_v30, %v13556_v15  ;;  %v13562_v45 = vand.u32 4294901760, %v13561_v22  ;;  %9536 = vmatpush3.bf16.msra.mxu0 %v12843_v11  ;;  %v13563_v59 = vand.u32 4294901760, %v12603_v4  ;;  %v13564_v0 = vand.u32 4294901760, %v12605_v29  ;;  %v13567_v15 = vld [vmem:[#allocation66_spill] sm:$0xff]  ;;  %9578 = vmatprep.subr.bf16.mxu1 %v9577_v23 }
 0x5da   : > { %v7567_v63 = vsub.f32 %v13557_v12, %v13558_v47  ;;  %v7686_v2 = vsub.f32 %v13559_v7, %v13560_v50  ;;  %v9579_v17 = vpack.c.bf16 %v7554_v58, %v7547_v25  ;;  %v13565_v39 = vand.u32 4294901760, %v12619_v54  ;;  %9538 = vmatprep.subr.bf16.mxu0 %v12850_v33 }
 0x5db   : > { %v7693_v49 = vsub.f32 %v13561_v22, %v13562_v45  ;;  %v12870_v61 = vpack.c.bf16 %v13564_v0, %v13563_v59  ;;  %v13566_v3 = vand.u32 4294901760, %v12621_v10  ;;  %v7561_v51 = vand.u32 4294901760, %v7560_v27 }
 0x5dc   : > { %v7568_v35 = vand.u32 4294901760, %v7567_v63  ;;  %v13568_v47 = vand.u32 4294901760, %v13567_v15  ;;  %v13569_v29 = vand.u32 4294901760, %v12346_v43  ;;  %v9581_v25 = vpack.c.bf16 %v7680_v6, %v7673_v20  ;;  %9580 = vmatpush3.bf16.msra.mxu1 %v9579_v17 }
 0x5dd   : > { %v12876_v38 = vpack.c.bf16 %v13566_v3, %v13565_v39  ;;  %v7687_v54 = vand.u32 4294901760, %v7686_v2  ;;  %v7694_v58 = vand.u32 4294901760, %v7693_v49  ;;  %9540 = vmatpush3.bf16.msra.mxu0 %v12870_v61  ;;  %v13570_v10 = vand.u32 4294901760, %v12653_v24  ;;  %v13578_v3 = vld [vmem:[#allocation37_spill] sm:$0xff] }
 0x5de   : > { %v7574_v4 = vsub.f32 %v13567_v15, %v13568_v47  ;;  %v7581_v50 = vsub.f32 %v12346_v43, %v13569_v29  ;;  %v13571_v40 = vand.u32 4294901760, %v12655_v56  ;;  %v13572_v63 = vand.u32 4294901760, %v12668_v16  ;;  %9582 = vmatprep.subr.bf16.mxu1 %v9581_v25  ;;  %v13574_v56 = vld [vmem:[#allocation34_spill] sm:$0xff]  ;;  %v13576_v16 = vld [vmem:[#allocation36_spill] sm:$0xff]  ;;  %v13584_v25 = vld [vmem:[#allocation59_spill] sm:$0xff] }
 0x5df   : > { %v13573_v45 = vand.u32 4294901760, %v12670_v14  ;;  %v12899_v0 = vand.u32 4294901760, %v12450_v18  ;;  %9542 = vmatprep.subr.bf16.mxu0 %v12876_v38  ;;  %v9583_v23 = vpack.c.bf16 %v7568_v35, %v7561_v51  ;;  %v9585_v24 = vpack.c.bf16 %v7694_v58, %v7687_v54  ;;  %v13580_v35 = vld [vmem:[#allocation57_spill] sm:$0xff]  ;;  %v13582_v29 = vld [vmem:[#allocation58_spill] sm:$0xff] }
 0x5e0   : > { %v12890_v27 = vpack.c.bf16 %v13571_v40, %v13570_v10  ;;  %v7575_v20 = vand.u32 4294901760, %v7574_v4  ;;  %v7582_v6 = vand.u32 4294901760, %v7581_v50  ;;  %v13575_v2 = vand.u32 4294901760, %v13574_v56  ;;  %v13586_v10 = vld [vmem:[#allocation60_spill] sm:$0xff] }
 0x5e1   : > { %v12896_v59 = vpack.c.bf16 %v13573_v45, %v13572_v63  ;;  %v13577_v49 = vand.u32 4294901760, %v13576_v16  ;;  %v12911_v39 = vsub.f32 %v12450_v18, %v12899_v0  ;;  %9584 = vmatpush3.bf16.msra.mxu1 %v9583_v23  ;;  %v13579_v51 = vand.u32 4294901760, %v13578_v3  ;;  %v13588_v63 = vld [vmem:[#allocation61_spill] sm:$0xff] }
 0x5e2   : > { %9544 = vmatpush3.bf16.msra.mxu0 %v12890_v27  ;;  %v9587_v17 = vpack.c.bf16 %v7582_v6, %v7575_v20  ;;  %v13581_v47 = vand.u32 4294901760, %v13580_v35  ;;  %9586 = vmatprep.subr.bf16.mxu1 %v9585_v24  ;;  %v13583_v50 = vand.u32 4294901760, %v13582_v29  ;;  %v13585_v54 = vand.u32 4294901760, %v13584_v25  ;;  %v13590_v20 = vld [vmem:[#allocation62_spill] sm:$0xff]  ;;  %v13592_v24 = vld [vmem:[#allocation63_spill] sm:$0xff] }
 0x5e3   : > { %v12907_v14 = vpack.c.bf16 %v13577_v49, %v13575_v2  ;;  %9546 = vmatprep.subr.bf16.mxu0 %v12896_v59  ;;  %v7464_v18 = vand.u32 4294901760, %v12911_v39  ;;  %v13587_v40 = vand.u32 4294901760, %v13586_v10  ;;  %v13589_v45 = vand.u32 4294901760, %v13588_v63  ;;  %v13597_v35 = vld [vmem:[#allocation26_spill] sm:$0xff]  ;;  %v13599_v25 = vld [vmem:[#allocation71_spill] sm:$0xff] }
 0x5e4   : > { %v12918_v4 = vpack.c.bf16 %v13581_v47, %v13579_v51  ;;  %v12925_v58 = vpack.c.bf16 %v13585_v54, %v13583_v50  ;;  %v13591_v6 = vand.u32 4294901760, %v13590_v20  ;;  %v13593_v56 = vand.u32 4294901760, %v13592_v24  ;;  %v13596_v51 = vld [vmem:[#allocation67_spill] sm:$0xff]  ;;  %v13600_v10 = vld [vmem:[#allocation30_spill] sm:$0xff]  ;;  %v13603_v20 = vld [vmem:[#allocation40_spill] sm:$0xff] }
 0x5e5   : > { %9588 = vmatpush3.bf16.msra.mxu1 %v9587_v17  ;;  %v12934_v23 = vpack.c.bf16 %v13589_v45, %v13587_v40  ;;  %v13594_v16 = vand.u32 4294901760, %v12700_v52  ;;  %v7465_v49 = vsub.f32 %v12911_v39, %v7464_v18  ;;  %v13595_v17 = vld [vmem:[#allocation29_spill] sm:$0xff]  ;;  %v9591_v47 = vpack.c.bf16 %v13597_v35, %v13596_v51  ;;  %v13598_v50 = vld [vmem:[#allocation27_spill] sm:$0xff]  ;;  %v13601_v40 = vld [vmem:[#allocation38_spill] sm:$0xff] }
 0x5e6   : > { %9548 = vmatpush3.bf16.msra.mxu0 %v12907_v14  ;;  %9622 = vmatprep.subr.bf16.mxu1 %v12759_v42  ;;  %v12942_v2 = vpack.c.bf16 %v13593_v56, %v13591_v6  ;;  %v9589_v3 = vpack.c.bf16 %v13595_v17, %v12384_v13  ;;  %v9593_v54 = vpack.c.bf16 %v13599_v25, %v13598_v50  ;;  %v13602_v45 = vld [vmem:[#allocation39_spill] sm:$0xff]  ;;  %v13604_v24 = vld [vmem:[#allocation41_spill] sm:$0xff]  ;;  %v13605_v56 = vld [vmem:[#allocation42_spill] sm:$0xff] }
 0x5e7   : > { %9550 = vmatprep.subr.bf16.mxu0 %v12918_v4  ;;  %v7466_v29 = vand.u32 4294901760, %v7465_v49  ;;  %v9595_v63 = vpack.c.bf16 %v13601_v40, %v13600_v10  ;;  %v9597_v6 = vpack.c.bf16 %v13603_v20, %v13602_v45  ;;  %v13606_v49 = vld [vmem:[#allocation43_spill] sm:$0xff] }
 0x5e8   : > { %7699 = vmatmul.mubr.f32.vlgmr.msra.gmra.mrb[18].mxu1 %v12899_v0 }
 0x5e9   : > { %9624 = vmatpush3.bf16.msra.mxu1 %v12790_v1  ;;  %7941 = vmatprep.mubr.f32.mxu1 %v13594_v16  ;;  %v9599_v16 = vpack.c.bf16 %v13605_v56, %v13604_v24 }
 0x5ea   : > { %9552 = vmatpush3.bf16.msra.mxu0 %v12925_v58  ;;  %9626 = vmatprep.subr.bf16.mxu1 %v12797_v41 }
 0x5eb   : > { %9554 = vmatprep.subr.bf16.mxu0 %v12934_v23 }
 0x5ed   : > { %9628 = vmatpush3.bf16.msra.mxu1 %v12817_v19 }
 0x5ee   : > { %9556 = vmatpush3.bf16.msra.mxu0 %v12942_v2  ;;  %9630 = vmatprep.subr.bf16.mxu1 %v12831_v53 }
 0x5ef   : > { %9590 = vmatprep.subr.bf16.mxu0 %v9589_v3  ;;  %v9603_v3 = vpack.c.bf16 %v12694_v55, %v12689_v62 }
 0x5f1   : > { %7467 = vmatmul.mubr.f32.vlgmr.msra.gmra.mrb[16].mxu0 %v7466_v29  ;;  %9632 = vmatpush3.bf16.msra.mxu1 %v12843_v11  ;;  %v9607_v29 = vpack.c.bf16 %v12732_v31, %v12727_v57  ;;  %v13627_v57 = vld [vmem:[#allocation68_spill] sm:$0xff]  ;;  %v13629_v31 = vld [vmem:[#allocation70_spill] sm:$0xff] }
 0x5f2   : > { %9592 = vmatpush3.bf16.msra.mxu0 %v9591_v47  ;;  %7834 = vmatprep.mubr.f32.mxu0 %v12700_v52  ;;  %v9601_v52 = vpack.c.bf16 %v12664_v44, %v13606_v49  ;;  %v9605_v47 = vpack.c.bf16 %v12712_v36, %v12707_v48  ;;  %v13626_v36 = vld [vmem:[#allocation28_spill] sm:$0xff] }
 0x5f3   : > { %9594 = vmatprep.subr.bf16.mxu0 %v9593_v54  ;;  %9634 = vmatprep.subr.bf16.mxu1 %v12850_v33  ;;  %v9609_v54 = vpack.c.bf16 %v12746_v26, %v12741_v37 }
 0x5f5   : > { %9636 = vmatpush3.bf16.msra.mxu1 %v12870_v61 }
 0x5f6   : > { %9596 = vmatpush3.bf16.msra.mxu0 %v9595_v63  ;;  %9638 = vmatprep.subr.bf16.mxu1 %v12876_v38  ;;  %v9611_v63 = vpack.c.bf16 %v13545_v9, %v12261_v8  ;;  %v9617_v8 = vpack.c.bf16 %v13561_v22, %v13559_v7  ;;  %v9619_v9 = vpack.c.bf16 %v12346_v43, %v13567_v15  ;;  %v13611_v43 = vand.u32 4294901760, %v13598_v50 }
 0x5f7   : > { %9598 = vmatprep.subr.bf16.mxu0 %v9597_v6  ;;  %v9613_v6 = vpack.c.bf16 %v12294_v60, %v12289_v21  ;;  %v13607_v21 = vand.u32 4294901760, %v12384_v13  ;;  %v13608_v60 = vand.u32 4294901760, %v13595_v17  ;;  %v13614_v22 = vand.u32 4294901760, %v13601_v40 }
 0x5f8   : > { %v13621_v50 = vand.u32 4294901760, %v12689_v62  ;;  %v13624_v62 = vand.u32 4294901760, %v12746_v26  ;;  %v13628_v26 = vld [vmem:[#allocation69_spill] sm:$0xff] }
 0x5f9   : > { %9640 = vmatpush3.bf16.msra.mxu1 %v12890_v27 }
 0x5fa   : > { %9600 = vmatpush3.bf16.msra.mxu0 %v9599_v16  ;;  %9642 = vmatprep.subr.bf16.mxu1 %v12896_v59  ;;  %v9615_v16 = vpack.c.bf16 %v13557_v12, %v13555_v30  ;;  %v9653_v30 = vpack.c.bf16 %v13608_v60, %v13607_v21  ;;  %v13610_v12 = vand.u32 4294901760, %v13597_v35 }
 0x5fb   : > { %9602 = vmatprep.subr.bf16.mxu0 %v9601_v52 }
 0x5fd   : > { %9644 = vmatpush3.bf16.msra.mxu1 %v12907_v14 }
 0x5fe   : > { %9604 = vmatpush3.bf16.msra.mxu0 %v9603_v3  ;;  %9646 = vmatprep.subr.bf16.mxu1 %v12918_v4 }
 0x5ff   : > { %9606 = vmatprep.subr.bf16.mxu0 %v9605_v47 }
 0x601   : > { %9648 = vmatpush3.bf16.msra.mxu1 %v12925_v58 }
 0x602   : > { %9608 = vmatpush3.bf16.msra.mxu0 %v9607_v29  ;;  %9650 = vmatprep.subr.bf16.mxu1 %v12934_v23 }
 0x603   : > { %9610 = vmatprep.subr.bf16.mxu0 %v9609_v54 }
 0x605   : > { %9652 = vmatpush3.bf16.msra.mxu1 %v12942_v2 }
 0x606   : > { %9612 = vmatpush3.bf16.msra.mxu0 %v9611_v63  ;;  %9686 = vmatprep.subr.bf16.mxu1 %v12759_v42  ;;  %v13609_v42 = vand.u32 4294901760, %v13596_v51  ;;  %v13619_v51 = vand.u32 4294901760, %v13606_v49 }
 0x607   : > { %9614 = vmatprep.subr.bf16.mxu0 %v9613_v6 }
 0x608   : > { %7945 = vmatmul.mubr.f32.vlgmr.msra.gmra.mrb[20].mxu1 %v7464_v18  ;;  %v9655_v7 = vpack.c.bf16 %v13610_v12, %v13609_v42  ;;  %v13616_v18 = vand.u32 4294901760, %v13603_v20 }
 0x609   : > { %9688 = vmatpush3.bf16.msra.mxu1 %v12790_v1  ;;  %8215 = vmatprep.mubr.f32.mxu1 %v12658_v34  ;;  %v13612_v1 = vand.u32 4294901760, %v13599_v25 }
 0x60a   : > { %9616 = vmatpush3.bf16.msra.mxu0 %v9615_v16  ;;  %9690 = vmatprep.subr.bf16.mxu1 %v12797_v41  ;;  %v13613_v41 = vand.u32 4294901760, %v13600_v10  ;;  %v13623_v10 = vand.u32 4294901760, %v12707_v48  ;;  %v13625_v48 = vld [vmem:[#allocation65_spill] sm:$0xff] }
 0x60b   : > { %9618 = vmatprep.subr.bf16.mxu0 %v9617_v8  ;;  %v9657_v13 = vpack.c.bf16 %v13612_v1, %v13611_v43 }
 0x60c   : > { %v9659_v15 = vpack.c.bf16 %v13614_v22, %v13613_v41 }
 0x60d   : > { %9692 = vmatpush3.bf16.msra.mxu1 %v12817_v19  ;;  %v13615_v19 = vand.u32 4294901760, %v13602_v45 }
 0x60e   : > { %9620 = vmatpush3.bf16.msra.mxu0 %v9619_v9  ;;  %9694 = vmatprep.subr.bf16.mxu1 %v12831_v53  ;;  %v13617_v53 = vand.u32 4294901760, %v13604_v24 }
 0x60f   : > { %9654 = vmatprep.subr.bf16.mxu0 %v9653_v30  ;;  %v9661_v17 = vpack.c.bf16 %v13616_v18, %v13615_v19 }
 0x611   : > { %7837 = vmatmul.mubr.f32.vlgmr.msra.gmra.mrb[18].mxu0 %v12911_v39  ;;  %9696 = vmatpush3.bf16.msra.mxu1 %v12843_v11  ;;  %v13620_v11 = vand.u32 4294901760, %v12664_v44  ;;  %v9671_v44 = vpack.c.bf16 %v7538_v32, %v7531_v46 }
 0x612   : > { %9656 = vmatpush3.bf16.msra.mxu0 %v9655_v7  ;;  %8111 = vmatprep.mubr.f32.mxu0 %v12658_v34  ;;  %v13618_v34 = vand.u32 4294901760, %v13605_v56 }
 0x613   : > { %9658 = vmatprep.subr.bf16.mxu0 %v9657_v13  ;;  %9698 = vmatprep.subr.bf16.mxu1 %v12850_v33  ;;  %v9665_v35 = vpack.c.bf16 %v13620_v11, %v13619_v51  ;;  %v13622_v33 = vand.u32 4294901760, %v12694_v55  ;;  %v9673_v55 = vpack.c.bf16 %v13624_v62, %v7657_v28 }
 0x614   : > { %v9663_v39 = vpack.c.bf16 %v13618_v34, %v13617_v53 }
 0x615   : > { %9700 = vmatpush3.bf16.msra.mxu1 %v12870_v61  ;;  %v9667_v25 = vpack.c.bf16 %v13622_v33, %v13621_v50  ;;  %v9669_v61 = vpack.c.bf16 %v7650_v5, %v13623_v10 }
 0x616   : > { %9660 = vmatpush3.bf16.msra.mxu0 %v9659_v15  ;;  %9702 = vmatprep.subr.bf16.mxu1 %v12876_v38 }
 0x617   : > { %9662 = vmatprep.subr.bf16.mxu0 %v9661_v17 }
 0x619   : > { %9704 = vmatpush3.bf16.msra.mxu1 %v12890_v27 }
 0x61a   : > { %9664 = vmatpush3.bf16.msra.mxu0 %v9663_v39  ;;  %9706 = vmatprep.subr.bf16.mxu1 %v12896_v59 }
 0x61b   : > { %9666 = vmatprep.subr.bf16.mxu0 %v9665_v35 }
 0x61d   : > { %9708 = vmatpush3.bf16.msra.mxu1 %v12907_v14 }
 0x61e   : > { %9668 = vmatpush3.bf16.msra.mxu0 %v9667_v25  ;;  %9710 = vmatprep.subr.bf16.mxu1 %v12918_v4 }
 0x61f   : > { %9670 = vmatprep.subr.bf16.mxu0 %v9669_v61 }
 0x621   : > { %9712 = vmatpush3.bf16.msra.mxu1 %v12925_v58 }
 0x622   : > { %9672 = vmatpush3.bf16.msra.mxu0 %v9671_v44  ;;  %9714 = vmatprep.subr.bf16.mxu1 %v12934_v23 }
 0x623   : > { %9674 = vmatprep.subr.bf16.mxu0 %v9673_v55 }
 0x625   : > { %9716 = vmatpush3.bf16.msra.mxu1 %v12942_v2 }
 0x626   : > { %9676 = vmatpush3.bf16.msra.mxu0 %v13625_v48 }
 0x627   : > { %9678 = vmatprep.subr.bf16.mxu0 %v13626_v36 }
 0x628   : > { %8217 = vmatmul.mubr.f32.vlgmr.msra.gmra.mrb[22].mxu1 %v12899_v0 }
 0x62a   : > { %9680 = vmatpush3.bf16.msra.mxu0 %v13627_v57 }
 0x62b   : > { %9682 = vmatprep.subr.bf16.mxu0 %v13628_v26 }
 0x62e   : > { %9684 = vmatpush3.bf16.msra.mxu0 %v13629_v31 }
 0x631   : > { %8113 = vmatmul.mubr.f32.vlgmr.msra.gmra.mrb[20].mxu0 %v12899_v0 }
 0x651   : > { %v8590_v5 = vpop.f32.mrb[12].mxu1 }
 0x652   : > { %v8591_v32 = vpop.f32.mrb[13].mxu1 }
 0x653   : > { %v8592_v37 = vadd.f32 %v8591_v32, %v8590_v5 }
 0x659   : > { %v8555_v46 = vpop.f32.mrb[10].mxu0 }
 0x65a   : > { %v8556_v28 = vpop.f32.mrb[11].mxu0 }
 0x65b   : > { %v8557_v38 = vadd.f32 %v8556_v28, %v8555_v46 }
 0x65d   : > { %v6839_v27 = vadd.f32 %v8592_v37, %v8557_v38 }
 0x672   : > { %v8660_v59 = vpop.f32.mrb[14].mxu1 }
 0x673   : > { %v8661_v14 = vpop.f32.mrb[15].mxu1 }
 0x674   : > { %v8662_v4 = vadd.f32 %v8661_v14, %v8660_v59 }
 0x67d   : > { %v8625_v58 = vpop.f32.mrb[12].mxu0 }
 0x67e   : > { %v8626_v23 = vpop.f32.mrb[13].mxu0 }
 0x67f   : > { %v8627_v2 = vadd.f32 %v8626_v23, %v8625_v58 }
 0x681   : > { %v6977_v40 = vadd.f32 %v8627_v2, %v6839_v27 }
 0x683   : > { %v7085_v45 = vadd.f32 %v8662_v4, %v6977_v40 }
 0x699   : > { %v8730_v20 = vpop.f32.mrb[16].mxu1 }
 0x69a   : > { %v8731_v24 = vpop.f32.mrb[17].mxu1 }
 0x69b   : > { %v8732_v56 = vadd.f32 %v8731_v24, %v8730_v20 }
 0x69e   : > { %v8695_v49 = vpop.f32.mrb[14].mxu0 }
 0x69f   : > { %v8696_v0 = vpop.f32.mrb[15].mxu0 }
 0x6a0   : > { %v8697_v52 = vadd.f32 %v8696_v0, %v8695_v49 }
 0x6a2   : > { %v7253_v3 = vadd.f32 %v8697_v52, %v7085_v45 }
 0x6a4   : > { %v7357_v47 = vadd.f32 %v8732_v56, %v7253_v3 }
 0x6bb   : > { %v8800_v29 = vpop.f32.mrb[18].mxu1 }
 0x6bc   : > { %v8801_v54 = vpop.f32.mrb[19].mxu1 }
 0x6bd   : > { %v8802_v63 = vadd.f32 %v8801_v54, %v8800_v29 }
 0x6c4   : > { %v8765_v6 = vpop.f32.mrb[16].mxu0 }
 0x6c5   : > { %v8766_v16 = vpop.f32.mrb[17].mxu0 }
 0x6c6   : > { %v8767_v8 = vadd.f32 %v8766_v16, %v8765_v6 }
 0x6c8   : > { %v7469_v9 = vadd.f32 %v8767_v8, %v7357_v47 }
 0x6ca   : > { %v7701_v21 = vadd.f32 %v8802_v63, %v7469_v9 }
 0x6db   : > { %v8870_v60 = vpop.f32.mrb[20].mxu1 }
 0x6dc   : > { %v8871_v30 = vpop.f32.mrb[21].mxu1 }
 0x6dd   : > { %v8872_v42 = vadd.f32 %v8871_v30, %v8870_v60 }
 0x6e4   : > { %v8835_v12 = vpop.f32.mrb[18].mxu0 }
 0x6e5   : > { %v8836_v7 = vpop.f32.mrb[19].mxu0 }
 0x6e6   : > { %v8837_v43 = vadd.f32 %v8836_v7, %v8835_v12 }
 0x6e8   : > { %v7839_v1 = vadd.f32 %v8837_v43, %v7701_v21 }
 0x6ea   : > { %v7947_v13 = vadd.f32 %v8872_v42, %v7839_v1 }
 0x6fb   : > { %v8940_v41 = vpop.f32.mrb[22].mxu1 }
 0x6fc   : > { %v8941_v22 = vpop.f32.mrb[23].mxu1 }
 0x6fd   : > { %v8942_v15 = vadd.f32 %v8941_v22, %v8940_v41 }
 0x704   : > { %v8905_v19 = vpop.f32.mrb[20].mxu0 }
 0x705   : > { %v8906_v18 = vpop.f32.mrb[21].mxu0 }
 0x706   : > { %v8907_v17 = vadd.f32 %v8906_v18, %v8905_v19 }
 0x708   : > { %v8115_v53 = vadd.f32 %v8907_v17, %v7947_v13 }
 0x70a   : > { %v8219_v34 = vadd.f32 %v8942_v15, %v8115_v53 }
 0x70c   : > { %8222 = vst.msk [vmem:[%s10784_s2] sm:$0xff] %vm563_vm1, %v8219_v34 }
 0x70d   : > { %10290 = shalt.err (!%p10287_p9)
}
 0x70e   : > { %s10291_s13 = scalar_lea.hbm %s13073_s17, 128  ;;  %s10295_s5 = scalar_lea.hbm %s13631_s22, 768 }
 0x70f   : > { %p10292_p1 = scmp.ne.s32.totalorder %s13073_s17, %s10291_s13  ;;  %p10296_p5 = scmp.lt.u32.totalorder %s13073_s17, %s13631_s22 }
 0x710   : > { %p10297_p13 = scmp.lt.u32.totalorder %s10295_s5, %s10291_s13  ;;  %p10299_p0 = scmp.lt.u32.totalorder %s10291_s13, %s13073_s17 }
 0x711   : > { %p10293_p3 = pnand %p10292_p1, %p13632_p7 }
 0x712   : > { %p10298_p12 = por %p10297_p13, %p10296_p5 }
 0x713   : > { %p10294_p10 = pneg %p10293_p3 }
 0x714   : > { %p10300_p8 = por %p10299_p0, %p10298_p12 }
 0x716   : > { %p10301_p11 = pnand %p10300_p8, %p10294_p10 }
 0x718   : > { %10304 = shalt.err (!%p10301_p11)
}
 0x719   : > { %9872 = dma.vmem_to_hbm [thread:$0]  (%p13632_p7), %s13075_s1, 128, %s13073_s17, %s8290_s23  }
 0x71a PF: > { %p9919_p2 = scmp.ge.s32.totalorder %s10391_s12, 2  ;;  %s8317_s25 = sand.u32 1, %s10363_s27  }
 0x71b   : > { %p13633_p4 = scmp.ne.s32.totalorder %s13302_s19, 0  ;;  %s8318_s9 = scalar_lea.sflag [#allocation6], %s8317_s25 }
 0x71d   : > { %p9901_p6 = pnand %p9919_p2, %p13633_p4 }
 0x71f   : > { %10358 = dma.done.wait (!%p9901_p6), %s8318_s9, 128  }
 0x720   : > { %10360 = vsyncadd (!%p9901_p6), %s8318_s9, 4294967168  ;;  %s28_s12 = sadd.s32 1, %s10391_s12   ;;  %s13634_s27 = smov %s10367_s28 }
 0x721   : > { %p25_p9 = scmp.ge.s32.totalorder %s28_s12, 8   ;;  %s13635_s28 = smov %s10371_s29 }
 0x722   : > { %s13636_s29 = smov %s10713_s16  ;;  %s13637_s30 = smov %s10383_s10 }
 0x723   : > { %s13638_s9 = smov %s10387_s11  ;;  %s13639_s10 = smov %s13642_s8 }
 0x724   : > { %s13640_s11 = smov %s13646_s3  ;;  %27 = sbr.rel (!%p25_p9) target bundleno = 18 (0x12), region = 129 }
 0x72b   :  { %8323 = vsyncpa [#allocation5], 1 }
 0x72c   :  { %8325 = vsyncpa [#allocation5 + $0x1], 1 }
 0x72d   :  { %8326 = vsyncpa [#allocation8], 1 }
 0x72e   :  { %8327 = vsyncpa [#allocation11], 1 }
 0x72f   :  { %8328 = vsyncpa [#allocation14], 1 }
 0x730   :  { %8329 = vsyncpa [#allocation17], 1 }
 0x731   :  { %8330 = vsyncpa [#allocation6], 1 }
 0x732   :  { %8332 = vsyncpa [#allocation6 + $0x1], 1 }

</bundles_post_ra>
